<compile_context>
chip_gen: v6e
topology: v6e:2x2x1
jax: 0.10.0
libtpu: 0.0.40
codegen_flags: <defaults>
</compile_context>

<pallas_src>
import functools

import jax
import jax.numpy as jnp
from jax.experimental import pallas as pl
from jax.experimental.pallas import tpu as pltpu


# ------------------------------ fused kernel -------------------------------- #

def _fused_forward_kernel(
    xw_ref,                                            # (W*N, C) time-major windows
    enc_wih_ref, enc_whh_ref, enc_b_ref,               # encoder LSTM
    lstm_wih_ref, lstm_whh_ref, lstm_b_ref,            # main LSTM
    ae_w1_ref, ae_b1_ref, ae_w2r_ref, ae_b2_ref,       # attnenc: Linear(E,64), Linear(64,1)
    at_w1a_ref, at_w1b_ref, at_b1_ref, at_w2r_ref, at_b2_ref,   # attn: Linear(2H,128) split, Linear(128,1)
    dec_w1_ref, dec_b1_ref, dec_w2_ref, dec_b2_ref,    # decoder: Linear(H,200), Linear(200,out)
    out_ref,                                           # (B, out)
    enc_flat_ref,                                      # scratch (W*N, E)
    *, B, S, W):
    N = B * S
    E = enc_whh_ref.shape[0]
    H = lstm_whh_ref.shape[0]
    f32 = jnp.float32

    # ---------------- encoder LSTM (PyTorch gate order i, f, g, o) ------------- #
    # Hoisted input projection: one (W*N, C) @ (C, 4E) matmul for all timesteps.
    gx = (jnp.dot(xw_ref[...], enc_wih_ref[...], preferred_element_type=f32)
          + enc_b_ref[...])                                           # (W*N, 4E)

    h = jnp.zeros((N, E), f32)
    c = jnp.zeros((N, E), f32)
    for t in range(W):                                  # fully unrolled recurrence
        gates = gx[t * N:(t + 1) * N, :] + jnp.dot(
            h, enc_whh_ref[...], preferred_element_type=f32)          # (N, 4E)
        # NOTE: packed single matmul + 32-lane gate slices kept; per-gate split
        # matmuls would trade one MXU push for four without a measured win here.
        i_g = jax.nn.sigmoid(gates[:, 0 * E:1 * E])
        f_g = jax.nn.sigmoid(gates[:, 1 * E:2 * E])
        g_g = jnp.tanh(gates[:, 2 * E:3 * E])
        o_g = jax.nn.sigmoid(gates[:, 3 * E:4 * E])
        c = f_g * c + i_g * g_g
        h = o_g * jnp.tanh(c)
        enc_flat_ref[t * N:(t + 1) * N, :] = h          # rows ordered t*N + n

    # -------- attnenc MLP (batched over all W*N rows) + softmax pooling -------- #
    enc_all = enc_flat_ref[...]                                        # (W*N, E)
    ae_h1 = (jnp.dot(enc_all, ae_w1_ref[...], preferred_element_type=f32)
             + ae_b1_ref[...])                                         # (W*N, 64)
    # Linear(64, 1) as VPU multiply + lane reduce (lane-dense, MXU-free).
    s_all = jnp.sum(ae_h1 * ae_w2r_ref[...], axis=1, keepdims=True) + ae_b2_ref[...]  # (W*N, 1)

    s_list = [s_all[t * N:(t + 1) * N, :] for t in range(W)]           # W x (N, 1)
    m = s_list[0]
    for t in range(1, W):
        m = jnp.maximum(m, s_list[t])
    den = jnp.zeros((N, 1), f32)
    ctx = jnp.zeros((N, E), f32)
    for t in range(W):
        e_t = jnp.exp(s_list[t] - m)
        den = den + e_t
        ctx = ctx + e_t * enc_flat_ref[t * N:(t + 1) * N, :]
    ctx = ctx * pl.reciprocal(den, approx=True)                        # (N, E), n = b*S + s

    # ------------------------------ main LSTM ---------------------------------- #
    gxm = (jnp.dot(ctx, lstm_wih_ref[...], preferred_element_type=f32)
           + lstm_b_ref[...])                                          # (N, 4H)
    gxm = gxm.reshape(B, S, 4 * H)                                     # tile-aligned split

    h2 = jnp.zeros((B, H), f32)
    c2 = jnp.zeros((B, H), f32)
    hs = []
    for si in range(S):                                 # fully unrolled recurrence
        gates = gxm[:, si, :] + jnp.dot(
            h2, lstm_whh_ref[...], preferred_element_type=f32)         # (B, 4H)
        i_g = jax.nn.sigmoid(gates[:, 0 * H:1 * H])
        f_g = jax.nn.sigmoid(gates[:, 1 * H:2 * H])
        g_g = jnp.tanh(gates[:, 2 * H:3 * H])
        o_g = jax.nn.sigmoid(gates[:, 3 * H:4 * H])
        c2 = f_g * c2 + i_g * g_g
        h2 = o_g * jnp.tanh(c2)
        hs.append(h2)

    # ------- attn over the window sequence: no concat, last-term computed once --- #
    lastproj = (jnp.dot(hs[-1], at_w1b_ref[...], preferred_element_type=f32)
                + at_b1_ref[...])                                      # (B, 128)
    sc = []
    for si in range(S):
        h1s = jnp.dot(hs[si], at_w1a_ref[...], preferred_element_type=f32) + lastproj
        sc.append(jnp.sum(h1s * at_w2r_ref[...], axis=1, keepdims=True) + at_b2_ref[...])

    m2 = sc[0]
    for si in range(1, S):
        m2 = jnp.maximum(m2, sc[si])
    den2 = jnp.zeros((B, 1), f32)
    ctx2 = jnp.zeros((B, H), f32)
    for si in range(S):
        e_s = jnp.exp(sc[si] - m2)
        den2 = den2 + e_s
        ctx2 = ctx2 + e_s * hs[si]
    ctx2 = ctx2 * pl.reciprocal(den2, approx=True)                     # (B, H)

    # -------------------------------- decoder ---------------------------------- #
    d1 = (jnp.dot(ctx2, dec_w1_ref[...], preferred_element_type=f32)
          + dec_b1_ref[...])                                           # (B, 200)
    out_ref[...] = (jnp.dot(d1, dec_w2_ref[...], preferred_element_type=f32)
                    + dec_b2_ref[...])                                 # (B, out)


# ------------------------------ kernel wrapper ------------------------------- #

def _vmem_specs(n):
    return [pl.BlockSpec(memory_space=pltpu.MemorySpace.VMEM) for _ in range(n)]


@jax.jit
def lstm_model_forward(x, params):
    B, S, C, W = x.shape
    N = B * S
    E = params['enc_whh_t'].shape[0]
    H = params['lstm_whh_t'].shape[0]
    out_dim = params['dec_w2_t'].shape[1]

    # torch: x.view(-1, C, wsize).permute(0, 2, 1) -> (N, W, C); kernel wants
    # time-major flat (W*N, C) so the hoisted projection can be sliced per step.
    xw_flat = jnp.transpose(x.reshape(N, C, W), (2, 0, 1)).reshape(W * N, C)

    # Split attn W1 (2H, 128) into the lstm_out half and the broadcast-last half.
    at_w1a = params['attn_w1_t'][:H, :]
    at_w1b = params['attn_w1_t'][H:, :]
    # Second Linear of the two score MLPs as a lane-dense row vector.
    ae_w2_row = params['attnenc_w2_t'].T          # (1, 64)
    at_w2_row = params['attn_w2_t'].T             # (1, 128)

    kernel = functools.partial(_fused_forward_kernel, B=B, S=S, W=W)
    return pl.pallas_call(
        kernel,
        out_shape=jax.ShapeDtypeStruct((B, out_dim), jnp.float32),
        in_specs=_vmem_specs(20),
        out_specs=pl.BlockSpec(memory_space=pltpu.MemorySpace.VMEM),
        scratch_shapes=[pltpu.VMEM((W * N, E), jnp.float32)],
    )(xw_flat,
      params['enc_wih_t'], params['enc_whh_t'], params['enc_b'],
      params['lstm_wih_t'], params['lstm_whh_t'], params['lstm_b'],
      params['attnenc_w1_t'], params['attnenc_b1'], ae_w2_row, params['attnenc_b2'],
      at_w1a, at_w1b, params['attn_b1'], at_w2_row, params['attn_b2'],
      params['dec_w1_t'], params['dec_b1'], params['dec_w2_t'], params['dec_b2'])


# --------------------------- parameters (synthetic) --------------------------- #

def init_params(key, enc_input_size, input_size, hidden, output_size, gain=1.0):
    E, H, C = input_size, hidden, enc_input_size
    ks = jax.random.split(key, 20)

    def xavier(k, shape):                       # shape = (fan_out, fan_in), torch layout
        fan_out, fan_in = shape
        std = gain * (2.0 / (fan_in + fan_out)) ** 0.5
        return std * jax.random.normal(k, shape, jnp.float32)

    def bias(k, n):
        return 0.05 * jax.random.normal(k, (1, n), jnp.float32)

    p = {}
    # encoder = nn.LSTM(enc_input_size, E): weight_ih (4E, C), weight_hh (4E, E)
    p['enc_wih_t'] = xavier(ks[0], (4 * E, C)).T
    p['enc_whh_t'] = xavier(ks[1], (4 * E, E)).T
    p['enc_b'] = bias(ks[2], 4 * E) + bias(ks[3], 4 * E)        # b_ih + b_hh
    # lstm = nn.LSTM(E, H): weight_ih (4H, E), weight_hh (4H, H)
    p['lstm_wih_t'] = xavier(ks[4], (4 * H, E)).T
    p['lstm_whh_t'] = xavier(ks[5], (4 * H, H)).T
    p['lstm_b'] = bias(ks[6], 4 * H) + bias(ks[7], 4 * H)
    # attnenc = Linear(E, 64) -> Linear(64, 1)
    p['attnenc_w1_t'] = xavier(ks[8], (64, E)).T
    p['attnenc_b1'] = bias(ks[9], 64)
    p['attnenc_w2_t'] = xavier(ks[10], (1, 64)).T
    p['attnenc_b2'] = bias(ks[11], 1)
    # attn = Linear(2H, 128) -> Linear(128, 1)
    p['attn_w1_t'] = xavier(ks[12], (128, 2 * H)).T
    p['attn_b1'] = bias(ks[13], 128)
    p['attn_w2_t'] = xavier(ks[14], (1, 128)).T
    p['attn_b2'] = bias(ks[15], 1)
    # decoder = Linear(H, 200) -> Linear(200, output_size)
    p['dec_w1_t'] = xavier(ks[16], (200, H)).T
    p['dec_b1'] = bias(ks[17], 200)
    p['dec_w2_t'] = xavier(ks[18], (output_size, 200)).T
    p['dec_b2'] = bias(ks[19], output_size)
    return p


# ----------------------------------- main ------------------------------------- #

if __name__ == "__main__":
    B, S = 2, 8                 # batch, number of windows (sequence_size)
    enc_input_size = 4          # channels fed to the encoder LSTM
    wsize = 16                  # window length (args.wsize)
    input_size = 32             # encoder hidden size == main-LSTM input size
    hidden_nodes = 32           # main LSTM hidden size
    output_size = 16            # decoder output size
    gain = 1.0

    key = jax.random.PRNGKey(0)
    kx, kp = jax.random.split(key)
    x = jax.random.normal(kx, (B, S, enc_input_size, wsize), jnp.float32)
    params = init_params(kp, enc_input_size, input_size, hidden_nodes, output_size, gain)

    out = lstm_model_forward(x, params)
    out = jax.block_until_ready(out)
    assert out.shape == (B, output_size), out.shape
    print("KERNEL_OK")
</pallas_src>

<mosaic_0001>
module attributes {stable_mosaic.version = 11 : i64} {
  func.func @_fused_forward_kernel(%arg0: memref<256x4xf32, #tpu.memory_space<vmem>>, %arg1: memref<4x128xf32, #tpu.memory_space<vmem>>, %arg2: memref<32x128xf32, #tpu.memory_space<vmem>>, %arg3: memref<1x128xf32, #tpu.memory_space<vmem>>, %arg4: memref<32x128xf32, #tpu.memory_space<vmem>>, %arg5: memref<32x128xf32, #tpu.memory_space<vmem>>, %arg6: memref<1x128xf32, #tpu.memory_space<vmem>>, %arg7: memref<32x64xf32, #tpu.memory_space<vmem>>, %arg8: memref<1x64xf32, #tpu.memory_space<vmem>>, %arg9: memref<1x64xf32, #tpu.memory_space<vmem>>, %arg10: memref<1x1xf32, #tpu.memory_space<vmem>>, %arg11: memref<32x128xf32, #tpu.memory_space<vmem>>, %arg12: memref<32x128xf32, #tpu.memory_space<vmem>>, %arg13: memref<1x128xf32, #tpu.memory_space<vmem>>, %arg14: memref<1x128xf32, #tpu.memory_space<vmem>>, %arg15: memref<1x1xf32, #tpu.memory_space<vmem>>, %arg16: memref<32x200xf32, #tpu.memory_space<vmem>>, %arg17: memref<1x200xf32, #tpu.memory_space<vmem>>, %arg18: memref<200x16xf32, #tpu.memory_space<vmem>>, %arg19: memref<1x16xf32, #tpu.memory_space<vmem>>, %arg20: memref<2x16xf32, #tpu.memory_space<vmem>>, %arg21: memref<256x32xf32, #tpu.memory_space<vmem>>) attributes {dimension_semantics = [], scalar_prefetch = 0 : i64, scratch_operands = 1 : i64, tpu.core_type = #tpu.core_type<tc>} {
    %c0 = arith.constant 0 : index
    %c0_0 = arith.constant 0 : index
    %0 = vector.load %arg0[%c0, %c0_0] : memref<256x4xf32, #tpu.memory_space<vmem>>, vector<256x4xf32>
    %c0_1 = arith.constant 0 : index
    %c0_2 = arith.constant 0 : index
    %1 = vector.load %arg1[%c0_1, %c0_2] : memref<4x128xf32, #tpu.memory_space<vmem>>, vector<4x128xf32>
    %cst = arith.constant dense<0.000000e+00> : vector<256x128xf32>
    %2 = tpu.matmul %0, %1, %cst {dimension_numbers = #tpu.dot_dimension_numbers<[1], [0], [0], [1], [0, 0, 1, 1], [], []>} : vector<256x4xf32>, vector<4x128xf32>, vector<256x128xf32> -> vector<256x128xf32>
    %c0_3 = arith.constant 0 : index
    %c0_4 = arith.constant 0 : index
    %3 = vector.load %arg3[%c0_3, %c0_4] : memref<1x128xf32, #tpu.memory_space<vmem>>, vector<1x128xf32>
    %4 = vector.broadcast %3 : vector<1x128xf32> to vector<256x128xf32>
    %5 = arith.addf %2, %4 : vector<256x128xf32>
    %cst_5 = arith.constant 0.000000e+00 : f32
    %6 = vector.broadcast %cst_5 : f32 to vector<16x32xf32>
    %cst_6 = arith.constant 0.000000e+00 : f32
    %7 = vector.broadcast %cst_6 : f32 to vector<16x32xf32>
    %8 = vector.extract_strided_slice %5 {offsets = [0, 0], sizes = [16, 128], strides = [1, 1]} : vector<256x128xf32> to vector<16x128xf32>
    %c0_7 = arith.constant 0 : index
    %c0_8 = arith.constant 0 : index
    %9 = vector.load %arg2[%c0_7, %c0_8] : memref<32x128xf32, #tpu.memory_space<vmem>>, vector<32x128xf32>
    %cst_9 = arith.constant dense<0.000000e+00> : vector<16x128xf32>
    %10 = tpu.matmul %6, %9, %cst_9 {dimension_numbers = #tpu.dot_dimension_numbers<[1], [0], [0], [1], [0, 0, 1, 1], [], []>} : vector<16x32xf32>, vector<32x128xf32>, vector<16x128xf32> -> vector<16x128xf32>
    %11 = arith.addf %8, %10 : vector<16x128xf32>
    %12 = vector.extract_strided_slice %11 {offsets = [0, 0], sizes = [16, 32], strides = [1, 1]} : vector<16x128xf32> to vector<16x32xf32>
    %13 = arith.negf %12 : vector<16x32xf32>
    %14 = math.exp %13 : vector<16x32xf32>
    %cst_10 = arith.constant 1.000000e+00 : f32
    %15 = vector.broadcast %cst_10 : f32 to vector<16x32xf32>
    %16 = arith.addf %15, %14 : vector<16x32xf32>
    %17 = arith.divf %15, %16 : vector<16x32xf32>
    %18 = vector.extract_strided_slice %11 {offsets = [0, 32], sizes = [16, 32], strides = [1, 1]} : vector<16x128xf32> to vector<16x32xf32>
    %19 = arith.negf %18 : vector<16x32xf32>
    %20 = math.exp %19 : vector<16x32xf32>
    %cst_11 = arith.constant 1.000000e+00 : f32
    %21 = vector.broadcast %cst_11 : f32 to vector<16x32xf32>
    %22 = arith.addf %21, %20 : vector<16x32xf32>
    %23 = arith.divf %21, %22 : vector<16x32xf32>
    %24 = vector.extract_strided_slice %11 {offsets = [0, 64], sizes = [16, 32], strides = [1, 1]} : vector<16x128xf32> to vector<16x32xf32>
    %25 = math.tanh %24 : vector<16x32xf32>
    %26 = vector.extract_strided_slice %11 {offsets = [0, 96], sizes = [16, 32], strides = [1, 1]} : vector<16x128xf32> to vector<16x32xf32>
    %27 = arith.negf %26 : vector<16x32xf32>
    %28 = math.exp %27 : vector<16x32xf32>
    %cst_12 = arith.constant 1.000000e+00 : f32
    %29 = vector.broadcast %cst_12 : f32 to vector<16x32xf32>
    %30 = arith.addf %29, %28 : vector<16x32xf32>
    %31 = arith.divf %29, %30 : vector<16x32xf32>
    %32 = arith.mulf %23, %7 : vector<16x32xf32>
    %33 = arith.mulf %17, %25 : vector<16x32xf32>
    %34 = arith.addf %32, %33 : vector<16x32xf32>
    %35 = math.tanh %34 : vector<16x32xf32>
    %36 = arith.mulf %31, %35 : vector<16x32xf32>
    %c0_13 = arith.constant 0 : index
    %c0_14 = arith.constant 0 : index
    %37 = vector.load %arg21[%c0_13, %c0_14] : memref<256x32xf32, #tpu.memory_space<vmem>>, vector<16x32xf32>
    tpu.vector_store %arg21[%c0_13, %c0_14], %36 {strides = array<i32>} : memref<256x32xf32, #tpu.memory_space<vmem>>, vector<16x32xf32>,
    %38 = vector.extract_strided_slice %5 {offsets = [16, 0], sizes = [16, 128], strides = [1, 1]} : vector<256x128xf32> to vector<16x128xf32>
    %c0_15 = arith.constant 0 : index
    %c0_16 = arith.constant 0 : index
    %39 = vector.load %arg2[%c0_15, %c0_16] : memref<32x128xf32, #tpu.memory_space<vmem>>, vector<32x128xf32>
    %cst_17 = arith.constant dense<0.000000e+00> : vector<16x128xf32>
    %40 = tpu.matmul %36, %39, %cst_17 {dimension_numbers = #tpu.dot_dimension_numbers<[1], [0], [0], [1], [0, 0, 1, 1], [], []>} : vector<16x32xf32>, vector<32x128xf32>, vector<16x128xf32> -> vector<16x128xf32>
    %41 = arith.addf %38, %40 : vector<16x128xf32>
    %42 = vector.extract_strided_slice %41 {offsets = [0, 0], sizes = [16, 32], strides = [1, 1]} : vector<16x128xf32> to vector<16x32xf32>
    %43 = arith.negf %42 : vector<16x32xf32>
    %44 = math.exp %43 : vector<16x32xf32>
    %cst_18 = arith.constant 1.000000e+00 : f32
    %45 = vector.broadcast %cst_18 : f32 to vector<16x32xf32>
    %46 = arith.addf %45, %44 : vector<16x32xf32>
    %47 = arith.divf %45, %46 : vector<16x32xf32>
    %48 = vector.extract_strided_slice %41 {offsets = [0, 32], sizes = [16, 32], strides = [1, 1]} : vector<16x128xf32> to vector<16x32xf32>
    %49 = arith.negf %48 : vector<16x32xf32>
    %50 = math.exp %49 : vector<16x32xf32>
    %cst_19 = arith.constant 1.000000e+00 : f32
    %51 = vector.broadcast %cst_19 : f32 to vector<16x32xf32>
    %52 = arith.addf %51, %50 : vector<16x32xf32>
    %53 = arith.divf %51, %52 : vector<16x32xf32>
    %54 = vector.extract_strided_slice %41 {offsets = [0, 64], sizes = [16, 32], strides = [1, 1]} : vector<16x128xf32> to vector<16x32xf32>
    %55 = math.tanh %54 : vector<16x32xf32>
    %56 = vector.extract_strided_slice %41 {offsets = [0, 96], sizes = [16, 32], strides = [1, 1]} : vector<16x128xf32> to vector<16x32xf32>
    %57 = arith.negf %56 : vector<16x32xf32>
    %58 = math.exp %57 : vector<16x32xf32>
    %cst_20 = arith.constant 1.000000e+00 : f32
    %59 = vector.broadcast %cst_20 : f32 to vector<16x32xf32>
    %60 = arith.addf %59, %58 : vector<16x32xf32>
    %61 = arith.divf %59, %60 : vector<16x32xf32>
    %62 = arith.mulf %53, %34 : vector<16x32xf32>
    %63 = arith.mulf %47, %55 : vector<16x32xf32>
    %64 = arith.addf %62, %63 : vector<16x32xf32>
    %65 = math.tanh %64 : vector<16x32xf32>
    %66 = arith.mulf %61, %65 : vector<16x32xf32>
    %c16 = arith.constant 16 : index
    %c0_21 = arith.constant 0 : index
    %67 = vector.load %arg21[%c16, %c0_21] : memref<256x32xf32, #tpu.memory_space<vmem>>, vector<16x32xf32>
    tpu.vector_store %arg21[%c16, %c0_21], %66 {strides = array<i32>} : memref<256x32xf32, #tpu.memory_space<vmem>>, vector<16x32xf32>,
    %68 = vector.extract_strided_slice %5 {offsets = [32, 0], sizes = [16, 128], strides = [1, 1]} : vector<256x128xf32> to vector<16x128xf32>
    %c0_22 = arith.constant 0 : index
    %c0_23 = arith.constant 0 : index
    %69 = vector.load %arg2[%c0_22, %c0_23] : memref<32x128xf32, #tpu.memory_space<vmem>>, vector<32x128xf32>
    %cst_24 = arith.constant dense<0.000000e+00> : vector<16x128xf32>
    %70 = tpu.matmul %66, %69, %cst_24 {dimension_numbers = #tpu.dot_dimension_numbers<[1], [0], [0], [1], [0, 0, 1, 1], [], []>} : vector<16x32xf32>, vector<32x128xf32>, vector<16x128xf32> -> vector<16x128xf32>
    %71 = arith.addf %68, %70 : vector<16x128xf32>
    %72 = vector.extract_strided_slice %71 {offsets = [0, 0], sizes = [16, 32], strides = [1, 1]} : vector<16x128xf32> to vector<16x32xf32>
    %73 = arith.negf %72 : vector<16x32xf32>
    %74 = math.exp %73 : vector<16x32xf32>
    %cst_25 = arith.constant 1.000000e+00 : f32
    %75 = vector.broadcast %cst_25 : f32 to vector<16x32xf32>
    %76 = arith.addf %75, %74 : vector<16x32xf32>
    %77 = arith.divf %75, %76 : vector<16x32xf32>
    %78 = vector.extract_strided_slice %71 {offsets = [0, 32], sizes = [16, 32], strides = [1, 1]} : vector<16x128xf32> to vector<16x32xf32>
    %79 = arith.negf %78 : vector<16x32xf32>
    %80 = math.exp %79 : vector<16x32xf32>
    %cst_26 = arith.constant 1.000000e+00 : f32
    %81 = vector.broadcast %cst_26 : f32 to vector<16x32xf32>
    %82 = arith.addf %81, %80 : vector<16x32xf32>
    %83 = arith.divf %81, %82 : vector<16x32xf32>
    %84 = vector.extract_strided_slice %71 {offsets = [0, 64], sizes = [16, 32], strides = [1, 1]} : vector<16x128xf32> to vector<16x32xf32>
    %85 = math.tanh %84 : vector<16x32xf32>
    %86 = vector.extract_strided_slice %71 {offsets = [0, 96], sizes = [16, 32], strides = [1, 1]} : vector<16x128xf32> to vector<16x32xf32>
    %87 = arith.negf %86 : vector<16x32xf32>
    %88 = math.exp %87 : vector<16x32xf32>
    %cst_27 = arith.constant 1.000000e+00 : f32
    %89 = vector.broadcast %cst_27 : f32 to vector<16x32xf32>
    %90 = arith.addf %89, %88 : vector<16x32xf32>
    %91 = arith.divf %89, %90 : vector<16x32xf32>
    %92 = arith.mulf %83, %64 : vector<16x32xf32>
    %93 = arith.mulf %77, %85 : vector<16x32xf32>
    %94 = arith.addf %92, %93 : vector<16x32xf32>
    %95 = math.tanh %94 : vector<16x32xf32>
    %96 = arith.mulf %91, %95 : vector<16x32xf32>
    %c32 = arith.constant 32 : index
    %c0_28 = arith.constant 0 : index
    %97 = vector.load %arg21[%c32, %c0_28] : memref<256x32xf32, #tpu.memory_space<vmem>>, vector<16x32xf32>
    tpu.vector_store %arg21[%c32, %c0_28], %96 {strides = array<i32>} : memref<256x32xf32, #tpu.memory_space<vmem>>, vector<16x32xf32>,
    %98 = vector.extract_strided_slice %5 {offsets = [48, 0], sizes = [16, 128], strides = [1, 1]} : vector<256x128xf32> to vector<16x128xf32>
    %c0_29 = arith.constant 0 : index
    %c0_30 = arith.constant 0 : index
    %99 = vector.load %arg2[%c0_29, %c0_30] : memref<32x128xf32, #tpu.memory_space<vmem>>, vector<32x128xf32>
    %cst_31 = arith.constant dense<0.000000e+00> : vector<16x128xf32>
    %100 = tpu.matmul %96, %99, %cst_31 {dimension_numbers = #tpu.dot_dimension_numbers<[1], [0], [0], [1], [0, 0, 1, 1], [], []>} : vector<16x32xf32>, vector<32x128xf32>, vector<16x128xf32> -> vector<16x128xf32>
    %101 = arith.addf %98, %100 : vector<16x128xf32>
    %102 = vector.extract_strided_slice %101 {offsets = [0, 0], sizes = [16, 32], strides = [1, 1]} : vector<16x128xf32> to vector<16x32xf32>
    %103 = arith.negf %102 : vector<16x32xf32>
    %104 = math.exp %103 : vector<16x32xf32>
    %cst_32 = arith.constant 1.000000e+00 : f32
    %105 = vector.broadcast %cst_32 : f32 to vector<16x32xf32>
    %106 = arith.addf %105, %104 : vector<16x32xf32>
    %107 = arith.divf %105, %106 : vector<16x32xf32>
    %108 = vector.extract_strided_slice %101 {offsets = [0, 32], sizes = [16, 32], strides = [1, 1]} : vector<16x128xf32> to vector<16x32xf32>
    %109 = arith.negf %108 : vector<16x32xf32>
    %110 = math.exp %109 : vector<16x32xf32>
    %cst_33 = arith.constant 1.000000e+00 : f32
    %111 = vector.broadcast %cst_33 : f32 to vector<16x32xf32>
    %112 = arith.addf %111, %110 : vector<16x32xf32>
    %113 = arith.divf %111, %112 : vector<16x32xf32>
    %114 = vector.extract_strided_slice %101 {offsets = [0, 64], sizes = [16, 32], strides = [1, 1]} : vector<16x128xf32> to vector<16x32xf32>
    %115 = math.tanh %114 : vector<16x32xf32>
    %116 = vector.extract_strided_slice %101 {offsets = [0, 96], sizes = [16, 32], strides = [1, 1]} : vector<16x128xf32> to vector<16x32xf32>
    %117 = arith.negf %116 : vector<16x32xf32>
    %118 = math.exp %117 : vector<16x32xf32>
    %cst_34 = arith.constant 1.000000e+00 : f32
    %119 = vector.broadcast %cst_34 : f32 to vector<16x32xf32>
    %120 = arith.addf %119, %118 : vector<16x32xf32>
    %121 = arith.divf %119, %120 : vector<16x32xf32>
    %122 = arith.mulf %113, %94 : vector<16x32xf32>
    %123 = arith.mulf %107, %115 : vector<16x32xf32>
    %124 = arith.addf %122, %123 : vector<16x32xf32>
    %125 = math.tanh %124 : vector<16x32xf32>
    %126 = arith.mulf %121, %125 : vector<16x32xf32>
    %c48 = arith.constant 48 : index
    %c0_35 = arith.constant 0 : index
    %127 = vector.load %arg21[%c48, %c0_35] : memref<256x32xf32, #tpu.memory_space<vmem>>, vector<16x32xf32>
    tpu.vector_store %arg21[%c48, %c0_35], %126 {strides = array<i32>} : memref<256x32xf32, #tpu.memory_space<vmem>>, vector<16x32xf32>,
    %128 = vector.extract_strided_slice %5 {offsets = [64, 0], sizes = [16, 128], strides = [1, 1]} : vector<256x128xf32> to vector<16x128xf32>
    %c0_36 = arith.constant 0 : index
    %c0_37 = arith.constant 0 : index
    %129 = vector.load %arg2[%c0_36, %c0_37] : memref<32x128xf32, #tpu.memory_space<vmem>>, vector<32x128xf32>
    %cst_38 = arith.constant dense<0.000000e+00> : vector<16x128xf32>
    %130 = tpu.matmul %126, %129, %cst_38 {dimension_numbers = #tpu.dot_dimension_numbers<[1], [0], [0], [1], [0, 0, 1, 1], [], []>} : vector<16x32xf32>, vector<32x128xf32>, vector<16x128xf32> -> vector<16x128xf32>
    %131 = arith.addf %128, %130 : vector<16x128xf32>
    %132 = vector.extract_strided_slice %131 {offsets = [0, 0], sizes = [16, 32], strides = [1, 1]} : vector<16x128xf32> to vector<16x32xf32>
    %133 = arith.negf %132 : vector<16x32xf32>
    %134 = math.exp %133 : vector<16x32xf32>
    %cst_39 = arith.constant 1.000000e+00 : f32
    %135 = vector.broadcast %cst_39 : f32 to vector<16x32xf32>
    %136 = arith.addf %135, %134 : vector<16x32xf32>
    %137 = arith.divf %135, %136 : vector<16x32xf32>
    %138 = vector.extract_strided_slice %131 {offsets = [0, 32], sizes = [16, 32], strides = [1, 1]} : vector<16x128xf32> to vector<16x32xf32>
    %139 = arith.negf %138 : vector<16x32xf32>
    %140 = math.exp %139 : vector<16x32xf32>
    %cst_40 = arith.constant 1.000000e+00 : f32
    %141 = vector.broadcast %cst_40 : f32 to vector<16x32xf32>
    %142 = arith.addf %141, %140 : vector<16x32xf32>
    %143 = arith.divf %141, %142 : vector<16x32xf32>
    %144 = vector.extract_strided_slice %131 {offsets = [0, 64], sizes = [16, 32], strides = [1, 1]} : vector<16x128xf32> to vector<16x32xf32>
    %145 = math.tanh %144 : vector<16x32xf32>
    %146 = vector.extract_strided_slice %131 {offsets = [0, 96], sizes = [16, 32], strides = [1, 1]} : vector<16x128xf32> to vector<16x32xf32>
    %147 = arith.negf %146 : vector<16x32xf32>
    %148 = math.exp %147 : vector<16x32xf32>
    %cst_41 = arith.constant 1.000000e+00 : f32
    %149 = vector.broadcast %cst_41 : f32 to vector<16x32xf32>
    %150 = arith.addf %149, %148 : vector<16x32xf32>
    %151 = arith.divf %149, %150 : vector<16x32xf32>
    %152 = arith.mulf %143, %124 : vector<16x32xf32>
    %153 = arith.mulf %137, %145 : vector<16x32xf32>
    %154 = arith.addf %152, %153 : vector<16x32xf32>
    %155 = math.tanh %154 : vector<16x32xf32>
    %156 = arith.mulf %151, %155 : vector<16x32xf32>
    %c64 = arith.constant 64 : index
    %c0_42 = arith.constant 0 : index
    %157 = vector.load %arg21[%c64, %c0_42] : memref<256x32xf32, #tpu.memory_space<vmem>>, vector<16x32xf32>
    tpu.vector_store %arg21[%c64, %c0_42], %156 {strides = array<i32>} : memref<256x32xf32, #tpu.memory_space<vmem>>, vector<16x32xf32>,
    %158 = vector.extract_strided_slice %5 {offsets = [80, 0], sizes = [16, 128], strides = [1, 1]} : vector<256x128xf32> to vector<16x128xf32>
    %c0_43 = arith.constant 0 : index
    %c0_44 = arith.constant 0 : index
    %159 = vector.load %arg2[%c0_43, %c0_44] : memref<32x128xf32, #tpu.memory_space<vmem>>, vector<32x128xf32>
    %cst_45 = arith.constant dense<0.000000e+00> : vector<16x128xf32>
    %160 = tpu.matmul %156, %159, %cst_45 {dimension_numbers = #tpu.dot_dimension_numbers<[1], [0], [0], [1], [0, 0, 1, 1], [], []>} : vector<16x32xf32>, vector<32x128xf32>, vector<16x128xf32> -> vector<16x128xf32>
    %161 = arith.addf %158, %160 : vector<16x128xf32>
    %162 = vector.extract_strided_slice %161 {offsets = [0, 0], sizes = [16, 32], strides = [1, 1]} : vector<16x128xf32> to vector<16x32xf32>
    %163 = arith.negf %162 : vector<16x32xf32>
    %164 = math.exp %163 : vector<16x32xf32>
    %cst_46 = arith.constant 1.000000e+00 : f32
    %165 = vector.broadcast %cst_46 : f32 to vector<16x32xf32>
    %166 = arith.addf %165, %164 : vector<16x32xf32>
    %167 = arith.divf %165, %166 : vector<16x32xf32>
    %168 = vector.extract_strided_slice %161 {offsets = [0, 32], sizes = [16, 32], strides = [1, 1]} : vector<16x128xf32> to vector<16x32xf32>
    %169 = arith.negf %168 : vector<16x32xf32>
    %170 = math.exp %169 : vector<16x32xf32>
    %cst_47 = arith.constant 1.000000e+00 : f32
    %171 = vector.broadcast %cst_47 : f32 to vector<16x32xf32>
    %172 = arith.addf %171, %170 : vector<16x32xf32>
    %173 = arith.divf %171, %172 : vector<16x32xf32>
    %174 = vector.extract_strided_slice %161 {offsets = [0, 64], sizes = [16, 32], strides = [1, 1]} : vector<16x128xf32> to vector<16x32xf32>
    %175 = math.tanh %174 : vector<16x32xf32>
    %176 = vector.extract_strided_slice %161 {offsets = [0, 96], sizes = [16, 32], strides = [1, 1]} : vector<16x128xf32> to vector<16x32xf32>
    %177 = arith.negf %176 : vector<16x32xf32>
    %178 = math.exp %177 : vector<16x32xf32>
    %cst_48 = arith.constant 1.000000e+00 : f32
    %179 = vector.broadcast %cst_48 : f32 to vector<16x32xf32>
    %180 = arith.addf %179, %178 : vector<16x32xf32>
    %181 = arith.divf %179, %180 : vector<16x32xf32>
    %182 = arith.mulf %173, %154 : vector<16x32xf32>
    %183 = arith.mulf %167, %175 : vector<16x32xf32>
    %184 = arith.addf %182, %183 : vector<16x32xf32>
    %185 = math.tanh %184 : vector<16x32xf32>
    %186 = arith.mulf %181, %185 : vector<16x32xf32>
    %c80 = arith.constant 80 : index
    %c0_49 = arith.constant 0 : index
    %187 = vector.load %arg21[%c80, %c0_49] : memref<256x32xf32, #tpu.memory_space<vmem>>, vector<16x32xf32>
    tpu.vector_store %arg21[%c80, %c0_49], %186 {strides = array<i32>} : memref<256x32xf32, #tpu.memory_space<vmem>>, vector<16x32xf32>,
    %188 = vector.extract_strided_slice %5 {offsets = [96, 0], sizes = [16, 128], strides = [1, 1]} : vector<256x128xf32> to vector<16x128xf32>
    %c0_50 = arith.constant 0 : index
    %c0_51 = arith.constant 0 : index
    %189 = vector.load %arg2[%c0_50, %c0_51] : memref<32x128xf32, #tpu.memory_space<vmem>>, vector<32x128xf32>
    %cst_52 = arith.constant dense<0.000000e+00> : vector<16x128xf32>
    %190 = tpu.matmul %186, %189, %cst_52 {dimension_numbers = #tpu.dot_dimension_numbers<[1], [0], [0], [1], [0, 0, 1, 1], [], []>} : vector<16x32xf32>, vector<32x128xf32>, vector<16x128xf32> -> vector<16x128xf32>
    %191 = arith.addf %188, %190 : vector<16x128xf32>
    %192 = vector.extract_strided_slice %191 {offsets = [0, 0], sizes = [16, 32], strides = [1, 1]} : vector<16x128xf32> to vector<16x32xf32>
    %193 = arith.negf %192 : vector<16x32xf32>
    %194 = math.exp %193 : vector<16x32xf32>
    %cst_53 = arith.constant 1.000000e+00 : f32
    %195 = vector.broadcast %cst_53 : f32 to vector<16x32xf32>
    %196 = arith.addf %195, %194 : vector<16x32xf32>
    %197 = arith.divf %195, %196 : vector<16x32xf32>
    %198 = vector.extract_strided_slice %191 {offsets = [0, 32], sizes = [16, 32], strides = [1, 1]} : vector<16x128xf32> to vector<16x32xf32>
    %199 = arith.negf %198 : vector<16x32xf32>
    %200 = math.exp %199 : vector<16x32xf32>
    %cst_54 = arith.constant 1.000000e+00 : f32
    %201 = vector.broadcast %cst_54 : f32 to vector<16x32xf32>
    %202 = arith.addf %201, %200 : vector<16x32xf32>
    %203 = arith.divf %201, %202 : vector<16x32xf32>
    %204 = vector.extract_strided_slice %191 {offsets = [0, 64], sizes = [16, 32], strides = [1, 1]} : vector<16x128xf32> to vector<16x32xf32>
    %205 = math.tanh %204 : vector<16x32xf32>
    %206 = vector.extract_strided_slice %191 {offsets = [0, 96], sizes = [16, 32], strides = [1, 1]} : vector<16x128xf32> to vector<16x32xf32>
    %207 = arith.negf %206 : vector<16x32xf32>
    %208 = math.exp %207 : vector<16x32xf32>
    %cst_55 = arith.constant 1.000000e+00 : f32
    %209 = vector.broadcast %cst_55 : f32 to vector<16x32xf32>
    %210 = arith.addf %209, %208 : vector<16x32xf32>
    %211 = arith.divf %209, %210 : vector<16x32xf32>
    %212 = arith.mulf %203, %184 : vector<16x32xf32>
    %213 = arith.mulf %197, %205 : vector<16x32xf32>
    %214 = arith.addf %212, %213 : vector<16x32xf32>
    %215 = math.tanh %214 : vector<16x32xf32>
    %216 = arith.mulf %211, %215 : vector<16x32xf32>
    %c96 = arith.constant 96 : index
    %c0_56 = arith.constant 0 : index
    %217 = vector.load %arg21[%c96, %c0_56] : memref<256x32xf32, #tpu.memory_space<vmem>>, vector<16x32xf32>
    tpu.vector_store %arg21[%c96, %c0_56], %216 {strides = array<i32>} : memref<256x32xf32, #tpu.memory_space<vmem>>, vector<16x32xf32>,
    %218 = vector.extract_strided_slice %5 {offsets = [112, 0], sizes = [16, 128], strides = [1, 1]} : vector<256x128xf32> to vector<16x128xf32>
    %c0_57 = arith.constant 0 : index
    %c0_58 = arith.constant 0 : index
    %219 = vector.load %arg2[%c0_57, %c0_58] : memref<32x128xf32, #tpu.memory_space<vmem>>, vector<32x128xf32>
    %cst_59 = arith.constant dense<0.000000e+00> : vector<16x128xf32>
    %220 = tpu.matmul %216, %219, %cst_59 {dimension_numbers = #tpu.dot_dimension_numbers<[1], [0], [0], [1], [0, 0, 1, 1], [], []>} : vector<16x32xf32>, vector<32x128xf32>, vector<16x128xf32> -> vector<16x128xf32>
    %221 = arith.addf %218, %220 : vector<16x128xf32>
    %222 = vector.extract_strided_slice %221 {offsets = [0, 0], sizes = [16, 32], strides = [1, 1]} : vector<16x128xf32> to vector<16x32xf32>
    %223 = arith.negf %222 : vector<16x32xf32>
    %224 = math.exp %223 : vector<16x32xf32>
    %cst_60 = arith.constant 1.000000e+00 : f32
    %225 = vector.broadcast %cst_60 : f32 to vector<16x32xf32>
    %226 = arith.addf %225, %224 : vector<16x32xf32>
    %227 = arith.divf %225, %226 : vector<16x32xf32>
    %228 = vector.extract_strided_slice %221 {offsets = [0, 32], sizes = [16, 32], strides = [1, 1]} : vector<16x128xf32> to vector<16x32xf32>
    %229 = arith.negf %228 : vector<16x32xf32>
    %230 = math.exp %229 : vector<16x32xf32>
    %cst_61 = arith.constant 1.000000e+00 : f32
    %231 = vector.broadcast %cst_61 : f32 to vector<16x32xf32>
    %232 = arith.addf %231, %230 : vector<16x32xf32>
    %233 = arith.divf %231, %232 : vector<16x32xf32>
    %234 = vector.extract_strided_slice %221 {offsets = [0, 64], sizes = [16, 32], strides = [1, 1]} : vector<16x128xf32> to vector<16x32xf32>
    %235 = math.tanh %234 : vector<16x32xf32>
    %236 = vector.extract_strided_slice %221 {offsets = [0, 96], sizes = [16, 32], strides = [1, 1]} : vector<16x128xf32> to vector<16x32xf32>
    %237 = arith.negf %236 : vector<16x32xf32>
    %238 = math.exp %237 : vector<16x32xf32>
    %cst_62 = arith.constant 1.000000e+00 : f32
    %239 = vector.broadcast %cst_62 : f32 to vector<16x32xf32>
    %240 = arith.addf %239, %238 : vector<16x32xf32>
    %241 = arith.divf %239, %240 : vector<16x32xf32>
    %242 = arith.mulf %233, %214 : vector<16x32xf32>
    %243 = arith.mulf %227, %235 : vector<16x32xf32>
    %244 = arith.addf %242, %243 : vector<16x32xf32>
    %245 = math.tanh %244 : vector<16x32xf32>
    %246 = arith.mulf %241, %245 : vector<16x32xf32>
    %c112 = arith.constant 112 : index
    %c0_63 = arith.constant 0 : index
    %247 = vector.load %arg21[%c112, %c0_63] : memref<256x32xf32, #tpu.memory_space<vmem>>, vector<16x32xf32>
    tpu.vector_store %arg21[%c112, %c0_63], %246 {strides = array<i32>} : memref<256x32xf32, #tpu.memory_space<vmem>>, vector<16x32xf32>,
    %248 = vector.extract_strided_slice %5 {offsets = [128, 0], sizes = [16, 128], strides = [1, 1]} : vector<256x128xf32> to vector<16x128xf32>
    %c0_64 = arith.constant 0 : index
    %c0_65 = arith.constant 0 : index
    %249 = vector.load %arg2[%c0_64, %c0_65] : memref<32x128xf32, #tpu.memory_space<vmem>>, vector<32x128xf32>
    %cst_66 = arith.constant dense<0.000000e+00> : vector<16x128xf32>
    %250 = tpu.matmul %246, %249, %cst_66 {dimension_numbers = #tpu.dot_dimension_numbers<[1], [0], [0], [1], [0, 0, 1, 1], [], []>} : vector<16x32xf32>, vector<32x128xf32>, vector<16x128xf32> -> vector<16x128xf32>
    %251 = arith.addf %248, %250 : vector<16x128xf32>
    %252 = vector.extract_strided_slice %251 {offsets = [0, 0], sizes = [16, 32], strides = [1, 1]} : vector<16x128xf32> to vector<16x32xf32>
    %253 = arith.negf %252 : vector<16x32xf32>
    %254 = math.exp %253 : vector<16x32xf32>
    %cst_67 = arith.constant 1.000000e+00 : f32
    %255 = vector.broadcast %cst_67 : f32 to vector<16x32xf32>
    %256 = arith.addf %255, %254 : vector<16x32xf32>
    %257 = arith.divf %255, %256 : vector<16x32xf32>
    %258 = vector.extract_strided_slice %251 {offsets = [0, 32], sizes = [16, 32], strides = [1, 1]} : vector<16x128xf32> to vector<16x32xf32>
    %259 = arith.negf %258 : vector<16x32xf32>
    %260 = math.exp %259 : vector<16x32xf32>
    %cst_68 = arith.constant 1.000000e+00 : f32
    %261 = vector.broadcast %cst_68 : f32 to vector<16x32xf32>
    %262 = arith.addf %261, %260 : vector<16x32xf32>
    %263 = arith.divf %261, %262 : vector<16x32xf32>
    %264 = vector.extract_strided_slice %251 {offsets = [0, 64], sizes = [16, 32], strides = [1, 1]} : vector<16x128xf32> to vector<16x32xf32>
    %265 = math.tanh %264 : vector<16x32xf32>
    %266 = vector.extract_strided_slice %251 {offsets = [0, 96], sizes = [16, 32], strides = [1, 1]} : vector<16x128xf32> to vector<16x32xf32>
    %267 = arith.negf %266 : vector<16x32xf32>
    %268 = math.exp %267 : vector<16x32xf32>
    %cst_69 = arith.constant 1.000000e+00 : f32
    %269 = vector.broadcast %cst_69 : f32 to vector<16x32xf32>
    %270 = arith.addf %269, %268 : vector<16x32xf32>
    %271 = arith.divf %269, %270 : vector<16x32xf32>
    %272 = arith.mulf %263, %244 : vector<16x32xf32>
    %273 = arith.mulf %257, %265 : vector<16x32xf32>
    %274 = arith.addf %272, %273 : vector<16x32xf32>
    %275 = math.tanh %274 : vector<16x32xf32>
    %276 = arith.mulf %271, %275 : vector<16x32xf32>
    %c128 = arith.constant 128 : index
    %c0_70 = arith.constant 0 : index
    %277 = vector.load %arg21[%c128, %c0_70] : memref<256x32xf32, #tpu.memory_space<vmem>>, vector<16x32xf32>
    tpu.vector_store %arg21[%c128, %c0_70], %276 {strides = array<i32>} : memref<256x32xf32, #tpu.memory_space<vmem>>, vector<16x32xf32>,
    %278 = vector.extract_strided_slice %5 {offsets = [144, 0], sizes = [16, 128], strides = [1, 1]} : vector<256x128xf32> to vector<16x128xf32>
    %c0_71 = arith.constant 0 : index
    %c0_72 = arith.constant 0 : index
    %279 = vector.load %arg2[%c0_71, %c0_72] : memref<32x128xf32, #tpu.memory_space<vmem>>, vector<32x128xf32>
    %cst_73 = arith.constant dense<0.000000e+00> : vector<16x128xf32>
    %280 = tpu.matmul %276, %279, %cst_73 {dimension_numbers = #tpu.dot_dimension_numbers<[1], [0], [0], [1], [0, 0, 1, 1], [], []>} : vector<16x32xf32>, vector<32x128xf32>, vector<16x128xf32> -> vector<16x128xf32>
    %281 = arith.addf %278, %280 : vector<16x128xf32>
    %282 = vector.extract_strided_slice %281 {offsets = [0, 0], sizes = [16, 32], strides = [1, 1]} : vector<16x128xf32> to vector<16x32xf32>
    %283 = arith.negf %282 : vector<16x32xf32>
    %284 = math.exp %283 : vector<16x32xf32>
    %cst_74 = arith.constant 1.000000e+00 : f32
    %285 = vector.broadcast %cst_74 : f32 to vector<16x32xf32>
    %286 = arith.addf %285, %284 : vector<16x32xf32>
    %287 = arith.divf %285, %286 : vector<16x32xf32>
    %288 = vector.extract_strided_slice %281 {offsets = [0, 32], sizes = [16, 32], strides = [1, 1]} : vector<16x128xf32> to vector<16x32xf32>
    %289 = arith.negf %288 : vector<16x32xf32>
    %290 = math.exp %289 : vector<16x32xf32>
    %cst_75 = arith.constant 1.000000e+00 : f32
    %291 = vector.broadcast %cst_75 : f32 to vector<16x32xf32>
    %292 = arith.addf %291, %290 : vector<16x32xf32>
    %293 = arith.divf %291, %292 : vector<16x32xf32>
    %294 = vector.extract_strided_slice %281 {offsets = [0, 64], sizes = [16, 32], strides = [1, 1]} : vector<16x128xf32> to vector<16x32xf32>
    %295 = math.tanh %294 : vector<16x32xf32>
    %296 = vector.extract_strided_slice %281 {offsets = [0, 96], sizes = [16, 32], strides = [1, 1]} : vector<16x128xf32> to vector<16x32xf32>
    %297 = arith.negf %296 : vector<16x32xf32>
    %298 = math.exp %297 : vector<16x32xf32>
    %cst_76 = arith.constant 1.000000e+00 : f32
    %299 = vector.broadcast %cst_76 : f32 to vector<16x32xf32>
    %300 = arith.addf %299, %298 : vector<16x32xf32>
    %301 = arith.divf %299, %300 : vector<16x32xf32>
    %302 = arith.mulf %293, %274 : vector<16x32xf32>
    %303 = arith.mulf %287, %295 : vector<16x32xf32>
    %304 = arith.addf %302, %303 : vector<16x32xf32>
    %305 = math.tanh %304 : vector<16x32xf32>
    %306 = arith.mulf %301, %305 : vector<16x32xf32>
    %c144 = arith.constant 144 : index
    %c0_77 = arith.constant 0 : index
    %307 = vector.load %arg21[%c144, %c0_77] : memref<256x32xf32, #tpu.memory_space<vmem>>, vector<16x32xf32>
    tpu.vector_store %arg21[%c144, %c0_77], %306 {strides = array<i32>} : memref<256x32xf32, #tpu.memory_space<vmem>>, vector<16x32xf32>,
    %308 = vector.extract_strided_slice %5 {offsets = [160, 0], sizes = [16, 128], strides = [1, 1]} : vector<256x128xf32> to vector<16x128xf32>
    %c0_78 = arith.constant 0 : index
    %c0_79 = arith.constant 0 : index
    %309 = vector.load %arg2[%c0_78, %c0_79] : memref<32x128xf32, #tpu.memory_space<vmem>>, vector<32x128xf32>
    %cst_80 = arith.constant dense<0.000000e+00> : vector<16x128xf32>
    %310 = tpu.matmul %306, %309, %cst_80 {dimension_numbers = #tpu.dot_dimension_numbers<[1], [0], [0], [1], [0, 0, 1, 1], [], []>} : vector<16x32xf32>, vector<32x128xf32>, vector<16x128xf32> -> vector<16x128xf32>
    %311 = arith.addf %308, %310 : vector<16x128xf32>
    %312 = vector.extract_strided_slice %311 {offsets = [0, 0], sizes = [16, 32], strides = [1, 1]} : vector<16x128xf32> to vector<16x32xf32>
    %313 = arith.negf %312 : vector<16x32xf32>
    %314 = math.exp %313 : vector<16x32xf32>
    %cst_81 = arith.constant 1.000000e+00 : f32
    %315 = vector.broadcast %cst_81 : f32 to vector<16x32xf32>
    %316 = arith.addf %315, %314 : vector<16x32xf32>
    %317 = arith.divf %315, %316 : vector<16x32xf32>
    %318 = vector.extract_strided_slice %311 {offsets = [0, 32], sizes = [16, 32], strides = [1, 1]} : vector<16x128xf32> to vector<16x32xf32>
    %319 = arith.negf %318 : vector<16x32xf32>
    %320 = math.exp %319 : vector<16x32xf32>
    %cst_82 = arith.constant 1.000000e+00 : f32
    %321 = vector.broadcast %cst_82 : f32 to vector<16x32xf32>
    %322 = arith.addf %321, %320 : vector<16x32xf32>
    %323 = arith.divf %321, %322 : vector<16x32xf32>
    %324 = vector.extract_strided_slice %311 {offsets = [0, 64], sizes = [16, 32], strides = [1, 1]} : vector<16x128xf32> to vector<16x32xf32>
    %325 = math.tanh %324 : vector<16x32xf32>
    %326 = vector.extract_strided_slice %311 {offsets = [0, 96], sizes = [16, 32], strides = [1, 1]} : vector<16x128xf32> to vector<16x32xf32>
    %327 = arith.negf %326 : vector<16x32xf32>
    %328 = math.exp %327 : vector<16x32xf32>
    %cst_83 = arith.constant 1.000000e+00 : f32
    %329 = vector.broadcast %cst_83 : f32 to vector<16x32xf32>
    %330 = arith.addf %329, %328 : vector<16x32xf32>
    %331 = arith.divf %329, %330 : vector<16x32xf32>
    %332 = arith.mulf %323, %304 : vector<16x32xf32>
    %333 = arith.mulf %317, %325 : vector<16x32xf32>
    %334 = arith.addf %332, %333 : vector<16x32xf32>
    %335 = math.tanh %334 : vector<16x32xf32>
    %336 = arith.mulf %331, %335 : vector<16x32xf32>
    %c160 = arith.constant 160 : index
    %c0_84 = arith.constant 0 : index
    %337 = vector.load %arg21[%c160, %c0_84] : memref<256x32xf32, #tpu.memory_space<vmem>>, vector<16x32xf32>
    tpu.vector_store %arg21[%c160, %c0_84], %336 {strides = array<i32>} : memref<256x32xf32, #tpu.memory_space<vmem>>, vector<16x32xf32>,
    %338 = vector.extract_strided_slice %5 {offsets = [176, 0], sizes = [16, 128], strides = [1, 1]} : vector<256x128xf32> to vector<16x128xf32>
    %c0_85 = arith.constant 0 : index
    %c0_86 = arith.constant 0 : index
    %339 = vector.load %arg2[%c0_85, %c0_86] : memref<32x128xf32, #tpu.memory_space<vmem>>, vector<32x128xf32>
    %cst_87 = arith.constant dense<0.000000e+00> : vector<16x128xf32>
    %340 = tpu.matmul %336, %339, %cst_87 {dimension_numbers = #tpu.dot_dimension_numbers<[1], [0], [0], [1], [0, 0, 1, 1], [], []>} : vector<16x32xf32>, vector<32x128xf32>, vector<16x128xf32> -> vector<16x128xf32>
    %341 = arith.addf %338, %340 : vector<16x128xf32>
    %342 = vector.extract_strided_slice %341 {offsets = [0, 0], sizes = [16, 32], strides = [1, 1]} : vector<16x128xf32> to vector<16x32xf32>
    %343 = arith.negf %342 : vector<16x32xf32>
    %344 = math.exp %343 : vector<16x32xf32>
    %cst_88 = arith.constant 1.000000e+00 : f32
    %345 = vector.broadcast %cst_88 : f32 to vector<16x32xf32>
    %346 = arith.addf %345, %344 : vector<16x32xf32>
    %347 = arith.divf %345, %346 : vector<16x32xf32>
    %348 = vector.extract_strided_slice %341 {offsets = [0, 32], sizes = [16, 32], strides = [1, 1]} : vector<16x128xf32> to vector<16x32xf32>
    %349 = arith.negf %348 : vector<16x32xf32>
    %350 = math.exp %349 : vector<16x32xf32>
    %cst_89 = arith.constant 1.000000e+00 : f32
    %351 = vector.broadcast %cst_89 : f32 to vector<16x32xf32>
    %352 = arith.addf %351, %350 : vector<16x32xf32>
    %353 = arith.divf %351, %352 : vector<16x32xf32>
    %354 = vector.extract_strided_slice %341 {offsets = [0, 64], sizes = [16, 32], strides = [1, 1]} : vector<16x128xf32> to vector<16x32xf32>
    %355 = math.tanh %354 : vector<16x32xf32>
    %356 = vector.extract_strided_slice %341 {offsets = [0, 96], sizes = [16, 32], strides = [1, 1]} : vector<16x128xf32> to vector<16x32xf32>
    %357 = arith.negf %356 : vector<16x32xf32>
    %358 = math.exp %357 : vector<16x32xf32>
    %cst_90 = arith.constant 1.000000e+00 : f32
    %359 = vector.broadcast %cst_90 : f32 to vector<16x32xf32>
    %360 = arith.addf %359, %358 : vector<16x32xf32>
    %361 = arith.divf %359, %360 : vector<16x32xf32>
    %362 = arith.mulf %353, %334 : vector<16x32xf32>
    %363 = arith.mulf %347, %355 : vector<16x32xf32>
    %364 = arith.addf %362, %363 : vector<16x32xf32>
    %365 = math.tanh %364 : vector<16x32xf32>
    %366 = arith.mulf %361, %365 : vector<16x32xf32>
    %c176 = arith.constant 176 : index
    %c0_91 = arith.constant 0 : index
    %367 = vector.load %arg21[%c176, %c0_91] : memref<256x32xf32, #tpu.memory_space<vmem>>, vector<16x32xf32>
    tpu.vector_store %arg21[%c176, %c0_91], %366 {strides = array<i32>} : memref<256x32xf32, #tpu.memory_space<vmem>>, vector<16x32xf32>,
    %368 = vector.extract_strided_slice %5 {offsets = [192, 0], sizes = [16, 128], strides = [1, 1]} : vector<256x128xf32> to vector<16x128xf32>
    %c0_92 = arith.constant 0 : index
    %c0_93 = arith.constant 0 : index
    %369 = vector.load %arg2[%c0_92, %c0_93] : memref<32x128xf32, #tpu.memory_space<vmem>>, vector<32x128xf32>
    %cst_94 = arith.constant dense<0.000000e+00> : vector<16x128xf32>
    %370 = tpu.matmul %366, %369, %cst_94 {dimension_numbers = #tpu.dot_dimension_numbers<[1], [0], [0], [1], [0, 0, 1, 1], [], []>} : vector<16x32xf32>, vector<32x128xf32>, vector<16x128xf32> -> vector<16x128xf32>
    %371 = arith.addf %368, %370 : vector<16x128xf32>
    %372 = vector.extract_strided_slice %371 {offsets = [0, 0], sizes = [16, 32], strides = [1, 1]} : vector<16x128xf32> to vector<16x32xf32>
    %373 = arith.negf %372 : vector<16x32xf32>
    %374 = math.exp %373 : vector<16x32xf32>
    %cst_95 = arith.constant 1.000000e+00 : f32
    %375 = vector.broadcast %cst_95 : f32 to vector<16x32xf32>
    %376 = arith.addf %375, %374 : vector<16x32xf32>
    %377 = arith.divf %375, %376 : vector<16x32xf32>
    %378 = vector.extract_strided_slice %371 {offsets = [0, 32], sizes = [16, 32], strides = [1, 1]} : vector<16x128xf32> to vector<16x32xf32>
    %379 = arith.negf %378 : vector<16x32xf32>
    %380 = math.exp %379 : vector<16x32xf32>
    %cst_96 = arith.constant 1.000000e+00 : f32
    %381 = vector.broadcast %cst_96 : f32 to vector<16x32xf32>
    %382 = arith.addf %381, %380 : vector<16x32xf32>
    %383 = arith.divf %381, %382 : vector<16x32xf32>
    %384 = vector.extract_strided_slice %371 {offsets = [0, 64], sizes = [16, 32], strides = [1, 1]} : vector<16x128xf32> to vector<16x32xf32>
    %385 = math.tanh %384 : vector<16x32xf32>
    %386 = vector.extract_strided_slice %371 {offsets = [0, 96], sizes = [16, 32], strides = [1, 1]} : vector<16x128xf32> to vector<16x32xf32>
    %387 = arith.negf %386 : vector<16x32xf32>
    %388 = math.exp %387 : vector<16x32xf32>
    %cst_97 = arith.constant 1.000000e+00 : f32
    %389 = vector.broadcast %cst_97 : f32 to vector<16x32xf32>
    %390 = arith.addf %389, %388 : vector<16x32xf32>
    %391 = arith.divf %389, %390 : vector<16x32xf32>
    %392 = arith.mulf %383, %364 : vector<16x32xf32>
    %393 = arith.mulf %377, %385 : vector<16x32xf32>
    %394 = arith.addf %392, %393 : vector<16x32xf32>
    %395 = math.tanh %394 : vector<16x32xf32>
    %396 = arith.mulf %391, %395 : vector<16x32xf32>
    %c192 = arith.constant 192 : index
    %c0_98 = arith.constant 0 : index
    %397 = vector.load %arg21[%c192, %c0_98] : memref<256x32xf32, #tpu.memory_space<vmem>>, vector<16x32xf32>
    tpu.vector_store %arg21[%c192, %c0_98], %396 {strides = array<i32>} : memref<256x32xf32, #tpu.memory_space<vmem>>, vector<16x32xf32>,
    %398 = vector.extract_strided_slice %5 {offsets = [208, 0], sizes = [16, 128], strides = [1, 1]} : vector<256x128xf32> to vector<16x128xf32>
    %c0_99 = arith.constant 0 : index
    %c0_100 = arith.constant 0 : index
    %399 = vector.load %arg2[%c0_99, %c0_100] : memref<32x128xf32, #tpu.memory_space<vmem>>, vector<32x128xf32>
    %cst_101 = arith.constant dense<0.000000e+00> : vector<16x128xf32>
    %400 = tpu.matmul %396, %399, %cst_101 {dimension_numbers = #tpu.dot_dimension_numbers<[1], [0], [0], [1], [0, 0, 1, 1], [], []>} : vector<16x32xf32>, vector<32x128xf32>, vector<16x128xf32> -> vector<16x128xf32>
    %401 = arith.addf %398, %400 : vector<16x128xf32>
    %402 = vector.extract_strided_slice %401 {offsets = [0, 0], sizes = [16, 32], strides = [1, 1]} : vector<16x128xf32> to vector<16x32xf32>
    %403 = arith.negf %402 : vector<16x32xf32>
    %404 = math.exp %403 : vector<16x32xf32>
    %cst_102 = arith.constant 1.000000e+00 : f32
    %405 = vector.broadcast %cst_102 : f32 to vector<16x32xf32>
    %406 = arith.addf %405, %404 : vector<16x32xf32>
    %407 = arith.divf %405, %406 : vector<16x32xf32>
    %408 = vector.extract_strided_slice %401 {offsets = [0, 32], sizes = [16, 32], strides = [1, 1]} : vector<16x128xf32> to vector<16x32xf32>
    %409 = arith.negf %408 : vector<16x32xf32>
    %410 = math.exp %409 : vector<16x32xf32>
    %cst_103 = arith.constant 1.000000e+00 : f32
    %411 = vector.broadcast %cst_103 : f32 to vector<16x32xf32>
    %412 = arith.addf %411, %410 : vector<16x32xf32>
    %413 = arith.divf %411, %412 : vector<16x32xf32>
    %414 = vector.extract_strided_slice %401 {offsets = [0, 64], sizes = [16, 32], strides = [1, 1]} : vector<16x128xf32> to vector<16x32xf32>
    %415 = math.tanh %414 : vector<16x32xf32>
    %416 = vector.extract_strided_slice %401 {offsets = [0, 96], sizes = [16, 32], strides = [1, 1]} : vector<16x128xf32> to vector<16x32xf32>
    %417 = arith.negf %416 : vector<16x32xf32>
    %418 = math.exp %417 : vector<16x32xf32>
    %cst_104 = arith.constant 1.000000e+00 : f32
    %419 = vector.broadcast %cst_104 : f32 to vector<16x32xf32>
    %420 = arith.addf %419, %418 : vector<16x32xf32>
    %421 = arith.divf %419, %420 : vector<16x32xf32>
    %422 = arith.mulf %413, %394 : vector<16x32xf32>
    %423 = arith.mulf %407, %415 : vector<16x32xf32>
    %424 = arith.addf %422, %423 : vector<16x32xf32>
    %425 = math.tanh %424 : vector<16x32xf32>
    %426 = arith.mulf %421, %425 : vector<16x32xf32>
    %c208 = arith.constant 208 : index
    %c0_105 = arith.constant 0 : index
    %427 = vector.load %arg21[%c208, %c0_105] : memref<256x32xf32, #tpu.memory_space<vmem>>, vector<16x32xf32>
    tpu.vector_store %arg21[%c208, %c0_105], %426 {strides = array<i32>} : memref<256x32xf32, #tpu.memory_space<vmem>>, vector<16x32xf32>,
    %428 = vector.extract_strided_slice %5 {offsets = [224, 0], sizes = [16, 128], strides = [1, 1]} : vector<256x128xf32> to vector<16x128xf32>
    %c0_106 = arith.constant 0 : index
    %c0_107 = arith.constant 0 : index
    %429 = vector.load %arg2[%c0_106, %c0_107] : memref<32x128xf32, #tpu.memory_space<vmem>>, vector<32x128xf32>
    %cst_108 = arith.constant dense<0.000000e+00> : vector<16x128xf32>
    %430 = tpu.matmul %426, %429, %cst_108 {dimension_numbers = #tpu.dot_dimension_numbers<[1], [0], [0], [1], [0, 0, 1, 1], [], []>} : vector<16x32xf32>, vector<32x128xf32>, vector<16x128xf32> -> vector<16x128xf32>
    %431 = arith.addf %428, %430 : vector<16x128xf32>
    %432 = vector.extract_strided_slice %431 {offsets = [0, 0], sizes = [16, 32], strides = [1, 1]} : vector<16x128xf32> to vector<16x32xf32>
    %433 = arith.negf %432 : vector<16x32xf32>
    %434 = math.exp %433 : vector<16x32xf32>
    %cst_109 = arith.constant 1.000000e+00 : f32
    %435 = vector.broadcast %cst_109 : f32 to vector<16x32xf32>
    %436 = arith.addf %435, %434 : vector<16x32xf32>
    %437 = arith.divf %435, %436 : vector<16x32xf32>
    %438 = vector.extract_strided_slice %431 {offsets = [0, 32], sizes = [16, 32], strides = [1, 1]} : vector<16x128xf32> to vector<16x32xf32>
    %439 = arith.negf %438 : vector<16x32xf32>
    %440 = math.exp %439 : vector<16x32xf32>
    %cst_110 = arith.constant 1.000000e+00 : f32
    %441 = vector.broadcast %cst_110 : f32 to vector<16x32xf32>
    %442 = arith.addf %441, %440 : vector<16x32xf32>
    %443 = arith.divf %441, %442 : vector<16x32xf32>
    %444 = vector.extract_strided_slice %431 {offsets = [0, 64], sizes = [16, 32], strides = [1, 1]} : vector<16x128xf32> to vector<16x32xf32>
    %445 = math.tanh %444 : vector<16x32xf32>
    %446 = vector.extract_strided_slice %431 {offsets = [0, 96], sizes = [16, 32], strides = [1, 1]} : vector<16x128xf32> to vector<16x32xf32>
    %447 = arith.negf %446 : vector<16x32xf32>
    %448 = math.exp %447 : vector<16x32xf32>
    %cst_111 = arith.constant 1.000000e+00 : f32
    %449 = vector.broadcast %cst_111 : f32 to vector<16x32xf32>
    %450 = arith.addf %449, %448 : vector<16x32xf32>
    %451 = arith.divf %449, %450 : vector<16x32xf32>
    %452 = arith.mulf %443, %424 : vector<16x32xf32>
    %453 = arith.mulf %437, %445 : vector<16x32xf32>
    %454 = arith.addf %452, %453 : vector<16x32xf32>
    %455 = math.tanh %454 : vector<16x32xf32>
    %456 = arith.mulf %451, %455 : vector<16x32xf32>
    %c224 = arith.constant 224 : index
    %c0_112 = arith.constant 0 : index
    %457 = vector.load %arg21[%c224, %c0_112] : memref<256x32xf32, #tpu.memory_space<vmem>>, vector<16x32xf32>
    tpu.vector_store %arg21[%c224, %c0_112], %456 {strides = array<i32>} : memref<256x32xf32, #tpu.memory_space<vmem>>, vector<16x32xf32>,
    %458 = vector.extract_strided_slice %5 {offsets = [240, 0], sizes = [16, 128], strides = [1, 1]} : vector<256x128xf32> to vector<16x128xf32>
    %c0_113 = arith.constant 0 : index
    %c0_114 = arith.constant 0 : index
    %459 = vector.load %arg2[%c0_113, %c0_114] : memref<32x128xf32, #tpu.memory_space<vmem>>, vector<32x128xf32>
    %cst_115 = arith.constant dense<0.000000e+00> : vector<16x128xf32>
    %460 = tpu.matmul %456, %459, %cst_115 {dimension_numbers = #tpu.dot_dimension_numbers<[1], [0], [0], [1], [0, 0, 1, 1], [], []>} : vector<16x32xf32>, vector<32x128xf32>, vector<16x128xf32> -> vector<16x128xf32>
    %461 = arith.addf %458, %460 : vector<16x128xf32>
    %462 = vector.extract_strided_slice %461 {offsets = [0, 0], sizes = [16, 32], strides = [1, 1]} : vector<16x128xf32> to vector<16x32xf32>
    %463 = arith.negf %462 : vector<16x32xf32>
    %464 = math.exp %463 : vector<16x32xf32>
    %cst_116 = arith.constant 1.000000e+00 : f32
    %465 = vector.broadcast %cst_116 : f32 to vector<16x32xf32>
    %466 = arith.addf %465, %464 : vector<16x32xf32>
    %467 = arith.divf %465, %466 : vector<16x32xf32>
    %468 = vector.extract_strided_slice %461 {offsets = [0, 32], sizes = [16, 32], strides = [1, 1]} : vector<16x128xf32> to vector<16x32xf32>
    %469 = arith.negf %468 : vector<16x32xf32>
    %470 = math.exp %469 : vector<16x32xf32>
    %cst_117 = arith.constant 1.000000e+00 : f32
    %471 = vector.broadcast %cst_117 : f32 to vector<16x32xf32>
    %472 = arith.addf %471, %470 : vector<16x32xf32>
    %473 = arith.divf %471, %472 : vector<16x32xf32>
    %474 = vector.extract_strided_slice %461 {offsets = [0, 64], sizes = [16, 32], strides = [1, 1]} : vector<16x128xf32> to vector<16x32xf32>
    %475 = math.tanh %474 : vector<16x32xf32>
    %476 = vector.extract_strided_slice %461 {offsets = [0, 96], sizes = [16, 32], strides = [1, 1]} : vector<16x128xf32> to vector<16x32xf32>
    %477 = arith.negf %476 : vector<16x32xf32>
    %478 = math.exp %477 : vector<16x32xf32>
    %cst_118 = arith.constant 1.000000e+00 : f32
    %479 = vector.broadcast %cst_118 : f32 to vector<16x32xf32>
    %480 = arith.addf %479, %478 : vector<16x32xf32>
    %481 = arith.divf %479, %480 : vector<16x32xf32>
    %482 = arith.mulf %473, %454 : vector<16x32xf32>
    %483 = arith.mulf %467, %475 : vector<16x32xf32>
    %484 = arith.addf %482, %483 : vector<16x32xf32>
    %485 = math.tanh %484 : vector<16x32xf32>
    %486 = arith.mulf %481, %485 : vector<16x32xf32>
    %c240 = arith.constant 240 : index
    %c0_119 = arith.constant 0 : index
    %487 = vector.load %arg21[%c240, %c0_119] : memref<256x32xf32, #tpu.memory_space<vmem>>, vector<16x32xf32>
    tpu.vector_store %arg21[%c240, %c0_119], %486 {strides = array<i32>} : memref<256x32xf32, #tpu.memory_space<vmem>>, vector<16x32xf32>,
    %c0_120 = arith.constant 0 : index
    %c0_121 = arith.constant 0 : index
    %488 = vector.load %arg21[%c0_120, %c0_121] : memref<256x32xf32, #tpu.memory_space<vmem>>, vector<256x32xf32>
    %c0_122 = arith.constant 0 : index
    %c0_123 = arith.constant 0 : index
    %489 = vector.load %arg7[%c0_122, %c0_123] : memref<32x64xf32, #tpu.memory_space<vmem>>, vector<32x64xf32>
    %cst_124 = arith.constant dense<0.000000e+00> : vector<256x64xf32>
    %490 = tpu.matmul %488, %489, %cst_124 {dimension_numbers = #tpu.dot_dimension_numbers<[1], [0], [0], [1], [0, 0, 1, 1], [], []>} : vector<256x32xf32>, vector<32x64xf32>, vector<256x64xf32> -> vector<256x64xf32>
    %c0_125 = arith.constant 0 : index
    %c0_126 = arith.constant 0 : index
    %491 = vector.load %arg8[%c0_125, %c0_126] : memref<1x64xf32, #tpu.memory_space<vmem>>, vector<1x64xf32>
    %492 = vector.broadcast %491 : vector<1x64xf32> to vector<256x64xf32>
    %493 = arith.addf %490, %492 : vector<256x64xf32>
    %c0_127 = arith.constant 0 : index
    %c0_128 = arith.constant 0 : index
    %494 = vector.load %arg9[%c0_127, %c0_128] : memref<1x64xf32, #tpu.memory_space<vmem>>, vector<1x64xf32>
    %495 = vector.broadcast %494 : vector<1x64xf32> to vector<256x64xf32>
    %496 = arith.mulf %493, %495 : vector<256x64xf32>
    %cst_129 = arith.constant dense<0.000000e+00> : vector<256xf32>
    %497 = vector.multi_reduction <add>, %496, %cst_129 [1] : vector<256x64xf32> to vector<256xf32>
    %498 = vector.shape_cast %497 : vector<256xf32> to vector<256x1xf32>
    %c0_130 = arith.constant 0 : index
    %c0_131 = arith.constant 0 : index
    %499 = vector.load %arg10[%c0_130, %c0_131] : memref<1x1xf32, #tpu.memory_space<vmem>>, vector<1x1xf32>
    %500 = vector.broadcast %499 : vector<1x1xf32> to vector<256x1xf32>
    %501 = arith.addf %498, %500 : vector<256x1xf32>
    %502 = vector.extract_strided_slice %501 {offsets = [0, 0], sizes = [16, 1], strides = [1, 1]} : vector<256x1xf32> to vector<16x1xf32>
    %503 = vector.extract_strided_slice %501 {offsets = [16, 0], sizes = [16, 1], strides = [1, 1]} : vector<256x1xf32> to vector<16x1xf32>
    %504 = vector.extract_strided_slice %501 {offsets = [32, 0], sizes = [16, 1], strides = [1, 1]} : vector<256x1xf32> to vector<16x1xf32>
    %505 = vector.extract_strided_slice %501 {offsets = [48, 0], sizes = [16, 1], strides = [1, 1]} : vector<256x1xf32> to vector<16x1xf32>
    %506 = vector.extract_strided_slice %501 {offsets = [64, 0], sizes = [16, 1], strides = [1, 1]} : vector<256x1xf32> to vector<16x1xf32>
    %507 = vector.extract_strided_slice %501 {offsets = [80, 0], sizes = [16, 1], strides = [1, 1]} : vector<256x1xf32> to vector<16x1xf32>
    %508 = vector.extract_strided_slice %501 {offsets = [96, 0], sizes = [16, 1], strides = [1, 1]} : vector<256x1xf32> to vector<16x1xf32>
    %509 = vector.extract_strided_slice %501 {offsets = [112, 0], sizes = [16, 1], strides = [1, 1]} : vector<256x1xf32> to vector<16x1xf32>
    %510 = vector.extract_strided_slice %501 {offsets = [128, 0], sizes = [16, 1], strides = [1, 1]} : vector<256x1xf32> to vector<16x1xf32>
    %511 = vector.extract_strided_slice %501 {offsets = [144, 0], sizes = [16, 1], strides = [1, 1]} : vector<256x1xf32> to vector<16x1xf32>
    %512 = vector.extract_strided_slice %501 {offsets = [160, 0], sizes = [16, 1], strides = [1, 1]} : vector<256x1xf32> to vector<16x1xf32>
    %513 = vector.extract_strided_slice %501 {offsets = [176, 0], sizes = [16, 1], strides = [1, 1]} : vector<256x1xf32> to vector<16x1xf32>
    %514 = vector.extract_strided_slice %501 {offsets = [192, 0], sizes = [16, 1], strides = [1, 1]} : vector<256x1xf32> to vector<16x1xf32>
    %515 = vector.extract_strided_slice %501 {offsets = [208, 0], sizes = [16, 1], strides = [1, 1]} : vector<256x1xf32> to vector<16x1xf32>
    %516 = vector.extract_strided_slice %501 {offsets = [224, 0], sizes = [16, 1], strides = [1, 1]} : vector<256x1xf32> to vector<16x1xf32>
    %517 = vector.extract_strided_slice %501 {offsets = [240, 0], sizes = [16, 1], strides = [1, 1]} : vector<256x1xf32> to vector<16x1xf32>
    %518 = arith.maximumf %502, %503 : vector<16x1xf32>
    %519 = arith.maximumf %518, %504 : vector<16x1xf32>
    %520 = arith.maximumf %519, %505 : vector<16x1xf32>
    %521 = arith.maximumf %520, %506 : vector<16x1xf32>
    %522 = arith.maximumf %521, %507 : vector<16x1xf32>
    %523 = arith.maximumf %522, %508 : vector<16x1xf32>
    %524 = arith.maximumf %523, %509 : vector<16x1xf32>
    %525 = arith.maximumf %524, %510 : vector<16x1xf32>
    %526 = arith.maximumf %525, %511 : vector<16x1xf32>
    %527 = arith.maximumf %526, %512 : vector<16x1xf32>
    %528 = arith.maximumf %527, %513 : vector<16x1xf32>
    %529 = arith.maximumf %528, %514 : vector<16x1xf32>
    %530 = arith.maximumf %529, %515 : vector<16x1xf32>
    %531 = arith.maximumf %530, %516 : vector<16x1xf32>
    %532 = arith.maximumf %531, %517 : vector<16x1xf32>
    %cst_132 = arith.constant 0.000000e+00 : f32
    %533 = vector.broadcast %cst_132 : f32 to vector<16x1xf32>
    %cst_133 = arith.constant 0.000000e+00 : f32
    %534 = vector.broadcast %cst_133 : f32 to vector<16x32xf32>
    %535 = arith.subf %502, %532 : vector<16x1xf32>
    %536 = math.exp %535 : vector<16x1xf32>
    %537 = arith.addf %533, %536 : vector<16x1xf32>
    %c0_134 = arith.constant 0 : index
    %c0_135 = arith.constant 0 : index
    %538 = vector.load %arg21[%c0_134, %c0_135] : memref<256x32xf32, #tpu.memory_space<vmem>>, vector<16x32xf32>
    %539 = vector.broadcast %536 : vector<16x1xf32> to vector<16x32xf32>
    %540 = arith.mulf %539, %538 : vector<16x32xf32>
    %541 = arith.addf %534, %540 : vector<16x32xf32>
    %542 = arith.subf %503, %532 : vector<16x1xf32>
    %543 = math.exp %542 : vector<16x1xf32>
    %544 = arith.addf %537, %543 : vector<16x1xf32>
    %c16_136 = arith.constant 16 : index
    %c0_137 = arith.constant 0 : index
    %545 = vector.load %arg21[%c16_136, %c0_137] : memref<256x32xf32, #tpu.memory_space<vmem>>, vector<16x32xf32>
    %546 = vector.broadcast %543 : vector<16x1xf32> to vector<16x32xf32>
    %547 = arith.mulf %546, %545 : vector<16x32xf32>
    %548 = arith.addf %541, %547 : vector<16x32xf32>
    %549 = arith.subf %504, %532 : vector<16x1xf32>
    %550 = math.exp %549 : vector<16x1xf32>
    %551 = arith.addf %544, %550 : vector<16x1xf32>
    %c32_138 = arith.constant 32 : index
    %c0_139 = arith.constant 0 : index
    %552 = vector.load %arg21[%c32_138, %c0_139] : memref<256x32xf32, #tpu.memory_space<vmem>>, vector<16x32xf32>
    %553 = vector.broadcast %550 : vector<16x1xf32> to vector<16x32xf32>
    %554 = arith.mulf %553, %552 : vector<16x32xf32>
    %555 = arith.addf %548, %554 : vector<16x32xf32>
    %556 = arith.subf %505, %532 : vector<16x1xf32>
    %557 = math.exp %556 : vector<16x1xf32>
    %558 = arith.addf %551, %557 : vector<16x1xf32>
    %c48_140 = arith.constant 48 : index
    %c0_141 = arith.constant 0 : index
    %559 = vector.load %arg21[%c48_140, %c0_141] : memref<256x32xf32, #tpu.memory_space<vmem>>, vector<16x32xf32>
    %560 = vector.broadcast %557 : vector<16x1xf32> to vector<16x32xf32>
    %561 = arith.mulf %560, %559 : vector<16x32xf32>
    %562 = arith.addf %555, %561 : vector<16x32xf32>
    %563 = arith.subf %506, %532 : vector<16x1xf32>
    %564 = math.exp %563 : vector<16x1xf32>
    %565 = arith.addf %558, %564 : vector<16x1xf32>
    %c64_142 = arith.constant 64 : index
    %c0_143 = arith.constant 0 : index
    %566 = vector.load %arg21[%c64_142, %c0_143] : memref<256x32xf32, #tpu.memory_space<vmem>>, vector<16x32xf32>
    %567 = vector.broadcast %564 : vector<16x1xf32> to vector<16x32xf32>
    %568 = arith.mulf %567, %566 : vector<16x32xf32>
    %569 = arith.addf %562, %568 : vector<16x32xf32>
    %570 = arith.subf %507, %532 : vector<16x1xf32>
    %571 = math.exp %570 : vector<16x1xf32>
    %572 = arith.addf %565, %571 : vector<16x1xf32>
    %c80_144 = arith.constant 80 : index
    %c0_145 = arith.constant 0 : index
    %573 = vector.load %arg21[%c80_144, %c0_145] : memref<256x32xf32, #tpu.memory_space<vmem>>, vector<16x32xf32>
    %574 = vector.broadcast %571 : vector<16x1xf32> to vector<16x32xf32>
    %575 = arith.mulf %574, %573 : vector<16x32xf32>
    %576 = arith.addf %569, %575 : vector<16x32xf32>
    %577 = arith.subf %508, %532 : vector<16x1xf32>
    %578 = math.exp %577 : vector<16x1xf32>
    %579 = arith.addf %572, %578 : vector<16x1xf32>
    %c96_146 = arith.constant 96 : index
    %c0_147 = arith.constant 0 : index
    %580 = vector.load %arg21[%c96_146, %c0_147] : memref<256x32xf32, #tpu.memory_space<vmem>>, vector<16x32xf32>
    %581 = vector.broadcast %578 : vector<16x1xf32> to vector<16x32xf32>
    %582 = arith.mulf %581, %580 : vector<16x32xf32>
    %583 = arith.addf %576, %582 : vector<16x32xf32>
    %584 = arith.subf %509, %532 : vector<16x1xf32>
    %585 = math.exp %584 : vector<16x1xf32>
    %586 = arith.addf %579, %585 : vector<16x1xf32>
    %c112_148 = arith.constant 112 : index
    %c0_149 = arith.constant 0 : index
    %587 = vector.load %arg21[%c112_148, %c0_149] : memref<256x32xf32, #tpu.memory_space<vmem>>, vector<16x32xf32>
    %588 = vector.broadcast %585 : vector<16x1xf32> to vector<16x32xf32>
    %589 = arith.mulf %588, %587 : vector<16x32xf32>
    %590 = arith.addf %583, %589 : vector<16x32xf32>
    %591 = arith.subf %510, %532 : vector<16x1xf32>
    %592 = math.exp %591 : vector<16x1xf32>
    %593 = arith.addf %586, %592 : vector<16x1xf32>
    %c128_150 = arith.constant 128 : index
    %c0_151 = arith.constant 0 : index
    %594 = vector.load %arg21[%c128_150, %c0_151] : memref<256x32xf32, #tpu.memory_space<vmem>>, vector<16x32xf32>
    %595 = vector.broadcast %592 : vector<16x1xf32> to vector<16x32xf32>
    %596 = arith.mulf %595, %594 : vector<16x32xf32>
    %597 = arith.addf %590, %596 : vector<16x32xf32>
    %598 = arith.subf %511, %532 : vector<16x1xf32>
    %599 = math.exp %598 : vector<16x1xf32>
    %600 = arith.addf %593, %599 : vector<16x1xf32>
    %c144_152 = arith.constant 144 : index
    %c0_153 = arith.constant 0 : index
    %601 = vector.load %arg21[%c144_152, %c0_153] : memref<256x32xf32, #tpu.memory_space<vmem>>, vector<16x32xf32>
    %602 = vector.broadcast %599 : vector<16x1xf32> to vector<16x32xf32>
    %603 = arith.mulf %602, %601 : vector<16x32xf32>
    %604 = arith.addf %597, %603 : vector<16x32xf32>
    %605 = arith.subf %512, %532 : vector<16x1xf32>
    %606 = math.exp %605 : vector<16x1xf32>
    %607 = arith.addf %600, %606 : vector<16x1xf32>
    %c160_154 = arith.constant 160 : index
    %c0_155 = arith.constant 0 : index
    %608 = vector.load %arg21[%c160_154, %c0_155] : memref<256x32xf32, #tpu.memory_space<vmem>>, vector<16x32xf32>
    %609 = vector.broadcast %606 : vector<16x1xf32> to vector<16x32xf32>
    %610 = arith.mulf %609, %608 : vector<16x32xf32>
    %611 = arith.addf %604, %610 : vector<16x32xf32>
    %612 = arith.subf %513, %532 : vector<16x1xf32>
    %613 = math.exp %612 : vector<16x1xf32>
    %614 = arith.addf %607, %613 : vector<16x1xf32>
    %c176_156 = arith.constant 176 : index
    %c0_157 = arith.constant 0 : index
    %615 = vector.load %arg21[%c176_156, %c0_157] : memref<256x32xf32, #tpu.memory_space<vmem>>, vector<16x32xf32>
    %616 = vector.broadcast %613 : vector<16x1xf32> to vector<16x32xf32>
    %617 = arith.mulf %616, %615 : vector<16x32xf32>
    %618 = arith.addf %611, %617 : vector<16x32xf32>
    %619 = arith.subf %514, %532 : vector<16x1xf32>
    %620 = math.exp %619 : vector<16x1xf32>
    %621 = arith.addf %614, %620 : vector<16x1xf32>
    %c192_158 = arith.constant 192 : index
    %c0_159 = arith.constant 0 : index
    %622 = vector.load %arg21[%c192_158, %c0_159] : memref<256x32xf32, #tpu.memory_space<vmem>>, vector<16x32xf32>
    %623 = vector.broadcast %620 : vector<16x1xf32> to vector<16x32xf32>
    %624 = arith.mulf %623, %622 : vector<16x32xf32>
    %625 = arith.addf %618, %624 : vector<16x32xf32>
    %626 = arith.subf %515, %532 : vector<16x1xf32>
    %627 = math.exp %626 : vector<16x1xf32>
    %628 = arith.addf %621, %627 : vector<16x1xf32>
    %c208_160 = arith.constant 208 : index
    %c0_161 = arith.constant 0 : index
    %629 = vector.load %arg21[%c208_160, %c0_161] : memref<256x32xf32, #tpu.memory_space<vmem>>, vector<16x32xf32>
    %630 = vector.broadcast %627 : vector<16x1xf32> to vector<16x32xf32>
    %631 = arith.mulf %630, %629 : vector<16x32xf32>
    %632 = arith.addf %625, %631 : vector<16x32xf32>
    %633 = arith.subf %516, %532 : vector<16x1xf32>
    %634 = math.exp %633 : vector<16x1xf32>
    %635 = arith.addf %628, %634 : vector<16x1xf32>
    %c224_162 = arith.constant 224 : index
    %c0_163 = arith.constant 0 : index
    %636 = vector.load %arg21[%c224_162, %c0_163] : memref<256x32xf32, #tpu.memory_space<vmem>>, vector<16x32xf32>
    %637 = vector.broadcast %634 : vector<16x1xf32> to vector<16x32xf32>
    %638 = arith.mulf %637, %636 : vector<16x32xf32>
    %639 = arith.addf %632, %638 : vector<16x32xf32>
    %640 = arith.subf %517, %532 : vector<16x1xf32>
    %641 = math.exp %640 : vector<16x1xf32>
    %642 = arith.addf %635, %641 : vector<16x1xf32>
    %c240_164 = arith.constant 240 : index
    %c0_165 = arith.constant 0 : index
    %643 = vector.load %arg21[%c240_164, %c0_165] : memref<256x32xf32, #tpu.memory_space<vmem>>, vector<16x32xf32>
    %644 = vector.broadcast %641 : vector<16x1xf32> to vector<16x32xf32>
    %645 = arith.mulf %644, %643 : vector<16x32xf32>
    %646 = arith.addf %639, %645 : vector<16x32xf32>
    %647 = tpu.reciprocal %642 {approx = true} : vector<16x1xf32> -> vector<16x1xf32>
    %648 = vector.broadcast %647 : vector<16x1xf32> to vector<16x32xf32>
    %649 = arith.mulf %646, %648 : vector<16x32xf32>
    %c0_166 = arith.constant 0 : index
    %c0_167 = arith.constant 0 : index
    %650 = vector.load %arg4[%c0_166, %c0_167] : memref<32x128xf32, #tpu.memory_space<vmem>>, vector<32x128xf32>
    %cst_168 = arith.constant dense<0.000000e+00> : vector<16x128xf32>
    %651 = tpu.matmul %649, %650, %cst_168 {dimension_numbers = #tpu.dot_dimension_numbers<[1], [0], [0], [1], [0, 0, 1, 1], [], []>} : vector<16x32xf32>, vector<32x128xf32>, vector<16x128xf32> -> vector<16x128xf32>
    %c0_169 = arith.constant 0 : index
    %c0_170 = arith.constant 0 : index
    %652 = vector.load %arg6[%c0_169, %c0_170] : memref<1x128xf32, #tpu.memory_space<vmem>>, vector<1x128xf32>
    %653 = vector.broadcast %652 : vector<1x128xf32> to vector<16x128xf32>
    %654 = arith.addf %651, %653 : vector<16x128xf32>
    %655 = vector.shape_cast %654 : vector<16x128xf32> to vector<2x8x128xf32>
    %cst_171 = arith.constant 0.000000e+00 : f32
    %656 = vector.broadcast %cst_171 : f32 to vector<2x32xf32>
    %cst_172 = arith.constant 0.000000e+00 : f32
    %657 = vector.broadcast %cst_172 : f32 to vector<2x32xf32>
    %658 = vector.extract_strided_slice %655 {offsets = [0, 0, 0], sizes = [2, 1, 128], strides = [1, 1, 1]} : vector<2x8x128xf32> to vector<2x1x128xf32>
    %659 = vector.shape_cast %658 : vector<2x1x128xf32> to vector<2x128xf32>
    %c0_173 = arith.constant 0 : index
    %c0_174 = arith.constant 0 : index
    %660 = vector.load %arg5[%c0_173, %c0_174] : memref<32x128xf32, #tpu.memory_space<vmem>>, vector<32x128xf32>
    %cst_175 = arith.constant dense<0.000000e+00> : vector<2x128xf32>
    %661 = tpu.matmul %656, %660, %cst_175 {dimension_numbers = #tpu.dot_dimension_numbers<[1], [0], [0], [1], [0, 0, 1, 1], [], []>} : vector<2x32xf32>, vector<32x128xf32>, vector<2x128xf32> -> vector<2x128xf32>
    %662 = arith.addf %659, %661 : vector<2x128xf32>
    %663 = vector.extract_strided_slice %662 {offsets = [0, 0], sizes = [2, 32], strides = [1, 1]} : vector<2x128xf32> to vector<2x32xf32>
    %664 = arith.negf %663 : vector<2x32xf32>
    %665 = math.exp %664 : vector<2x32xf32>
    %cst_176 = arith.constant 1.000000e+00 : f32
    %666 = vector.broadcast %cst_176 : f32 to vector<2x32xf32>
    %667 = arith.addf %666, %665 : vector<2x32xf32>
    %668 = arith.divf %666, %667 : vector<2x32xf32>
    %669 = vector.extract_strided_slice %662 {offsets = [0, 32], sizes = [2, 32], strides = [1, 1]} : vector<2x128xf32> to vector<2x32xf32>
    %670 = arith.negf %669 : vector<2x32xf32>
    %671 = math.exp %670 : vector<2x32xf32>
    %cst_177 = arith.constant 1.000000e+00 : f32
    %672 = vector.broadcast %cst_177 : f32 to vector<2x32xf32>
    %673 = arith.addf %672, %671 : vector<2x32xf32>
    %674 = arith.divf %672, %673 : vector<2x32xf32>
    %675 = vector.extract_strided_slice %662 {offsets = [0, 64], sizes = [2, 32], strides = [1, 1]} : vector<2x128xf32> to vector<2x32xf32>
    %676 = math.tanh %675 : vector<2x32xf32>
    %677 = vector.extract_strided_slice %662 {offsets = [0, 96], sizes = [2, 32], strides = [1, 1]} : vector<2x128xf32> to vector<2x32xf32>
    %678 = arith.negf %677 : vector<2x32xf32>
    %679 = math.exp %678 : vector<2x32xf32>
    %cst_178 = arith.constant 1.000000e+00 : f32
    %680 = vector.broadcast %cst_178 : f32 to vector<2x32xf32>
    %681 = arith.addf %680, %679 : vector<2x32xf32>
    %682 = arith.divf %680, %681 : vector<2x32xf32>
    %683 = arith.mulf %674, %657 : vector<2x32xf32>
    %684 = arith.mulf %668, %676 : vector<2x32xf32>
    %685 = arith.addf %683, %684 : vector<2x32xf32>
    %686 = math.tanh %685 : vector<2x32xf32>
    %687 = arith.mulf %682, %686 : vector<2x32xf32>
    %688 = vector.extract_strided_slice %655 {offsets = [0, 1, 0], sizes = [2, 1, 128], strides = [1, 1, 1]} : vector<2x8x128xf32> to vector<2x1x128xf32>
    %689 = vector.shape_cast %688 : vector<2x1x128xf32> to vector<2x128xf32>
    %c0_179 = arith.constant 0 : index
    %c0_180 = arith.constant 0 : index
    %690 = vector.load %arg5[%c0_179, %c0_180] : memref<32x128xf32, #tpu.memory_space<vmem>>, vector<32x128xf32>
    %cst_181 = arith.constant dense<0.000000e+00> : vector<2x128xf32>
    %691 = tpu.matmul %687, %690, %cst_181 {dimension_numbers = #tpu.dot_dimension_numbers<[1], [0], [0], [1], [0, 0, 1, 1], [], []>} : vector<2x32xf32>, vector<32x128xf32>, vector<2x128xf32> -> vector<2x128xf32>
    %692 = arith.addf %689, %691 : vector<2x128xf32>
    %693 = vector.extract_strided_slice %692 {offsets = [0, 0], sizes = [2, 32], strides = [1, 1]} : vector<2x128xf32> to vector<2x32xf32>
    %694 = arith.negf %693 : vector<2x32xf32>
    %695 = math.exp %694 : vector<2x32xf32>
    %cst_182 = arith.constant 1.000000e+00 : f32
    %696 = vector.broadcast %cst_182 : f32 to vector<2x32xf32>
    %697 = arith.addf %696, %695 : vector<2x32xf32>
    %698 = arith.divf %696, %697 : vector<2x32xf32>
    %699 = vector.extract_strided_slice %692 {offsets = [0, 32], sizes = [2, 32], strides = [1, 1]} : vector<2x128xf32> to vector<2x32xf32>
    %700 = arith.negf %699 : vector<2x32xf32>
    %701 = math.exp %700 : vector<2x32xf32>
    %cst_183 = arith.constant 1.000000e+00 : f32
    %702 = vector.broadcast %cst_183 : f32 to vector<2x32xf32>
    %703 = arith.addf %702, %701 : vector<2x32xf32>
    %704 = arith.divf %702, %703 : vector<2x32xf32>
    %705 = vector.extract_strided_slice %692 {offsets = [0, 64], sizes = [2, 32], strides = [1, 1]} : vector<2x128xf32> to vector<2x32xf32>
    %706 = math.tanh %705 : vector<2x32xf32>
    %707 = vector.extract_strided_slice %692 {offsets = [0, 96], sizes = [2, 32], strides = [1, 1]} : vector<2x128xf32> to vector<2x32xf32>
    %708 = arith.negf %707 : vector<2x32xf32>
    %709 = math.exp %708 : vector<2x32xf32>
    %cst_184 = arith.constant 1.000000e+00 : f32
    %710 = vector.broadcast %cst_184 : f32 to vector<2x32xf32>
    %711 = arith.addf %710, %709 : vector<2x32xf32>
    %712 = arith.divf %710, %711 : vector<2x32xf32>
    %713 = arith.mulf %704, %685 : vector<2x32xf32>
    %714 = arith.mulf %698, %706 : vector<2x32xf32>
    %715 = arith.addf %713, %714 : vector<2x32xf32>
    %716 = math.tanh %715 : vector<2x32xf32>
    %717 = arith.mulf %712, %716 : vector<2x32xf32>
    %718 = vector.extract_strided_slice %655 {offsets = [0, 2, 0], sizes = [2, 1, 128], strides = [1, 1, 1]} : vector<2x8x128xf32> to vector<2x1x128xf32>
    %719 = vector.shape_cast %718 : vector<2x1x128xf32> to vector<2x128xf32>
    %c0_185 = arith.constant 0 : index
    %c0_186 = arith.constant 0 : index
    %720 = vector.load %arg5[%c0_185, %c0_186] : memref<32x128xf32, #tpu.memory_space<vmem>>, vector<32x128xf32>
    %cst_187 = arith.constant dense<0.000000e+00> : vector<2x128xf32>
    %721 = tpu.matmul %717, %720, %cst_187 {dimension_numbers = #tpu.dot_dimension_numbers<[1], [0], [0], [1], [0, 0, 1, 1], [], []>} : vector<2x32xf32>, vector<32x128xf32>, vector<2x128xf32> -> vector<2x128xf32>
    %722 = arith.addf %719, %721 : vector<2x128xf32>
    %723 = vector.extract_strided_slice %722 {offsets = [0, 0], sizes = [2, 32], strides = [1, 1]} : vector<2x128xf32> to vector<2x32xf32>
    %724 = arith.negf %723 : vector<2x32xf32>
    %725 = math.exp %724 : vector<2x32xf32>
    %cst_188 = arith.constant 1.000000e+00 : f32
    %726 = vector.broadcast %cst_188 : f32 to vector<2x32xf32>
    %727 = arith.addf %726, %725 : vector<2x32xf32>
    %728 = arith.divf %726, %727 : vector<2x32xf32>
    %729 = vector.extract_strided_slice %722 {offsets = [0, 32], sizes = [2, 32], strides = [1, 1]} : vector<2x128xf32> to vector<2x32xf32>
    %730 = arith.negf %729 : vector<2x32xf32>
    %731 = math.exp %730 : vector<2x32xf32>
    %cst_189 = arith.constant 1.000000e+00 : f32
    %732 = vector.broadcast %cst_189 : f32 to vector<2x32xf32>
    %733 = arith.addf %732, %731 : vector<2x32xf32>
    %734 = arith.divf %732, %733 : vector<2x32xf32>
    %735 = vector.extract_strided_slice %722 {offsets = [0, 64], sizes = [2, 32], strides = [1, 1]} : vector<2x128xf32> to vector<2x32xf32>
    %736 = math.tanh %735 : vector<2x32xf32>
    %737 = vector.extract_strided_slice %722 {offsets = [0, 96], sizes = [2, 32], strides = [1, 1]} : vector<2x128xf32> to vector<2x32xf32>
    %738 = arith.negf %737 : vector<2x32xf32>
    %739 = math.exp %738 : vector<2x32xf32>
    %cst_190 = arith.constant 1.000000e+00 : f32
    %740 = vector.broadcast %cst_190 : f32 to vector<2x32xf32>
    %741 = arith.addf %740, %739 : vector<2x32xf32>
    %742 = arith.divf %740, %741 : vector<2x32xf32>
    %743 = arith.mulf %734, %715 : vector<2x32xf32>
    %744 = arith.mulf %728, %736 : vector<2x32xf32>
    %745 = arith.addf %743, %744 : vector<2x32xf32>
    %746 = math.tanh %745 : vector<2x32xf32>
    %747 = arith.mulf %742, %746 : vector<2x32xf32>
    %748 = vector.extract_strided_slice %655 {offsets = [0, 3, 0], sizes = [2, 1, 128], strides = [1, 1, 1]} : vector<2x8x128xf32> to vector<2x1x128xf32>
    %749 = vector.shape_cast %748 : vector<2x1x128xf32> to vector<2x128xf32>
    %c0_191 = arith.constant 0 : index
    %c0_192 = arith.constant 0 : index
    %750 = vector.load %arg5[%c0_191, %c0_192] : memref<32x128xf32, #tpu.memory_space<vmem>>, vector<32x128xf32>
    %cst_193 = arith.constant dense<0.000000e+00> : vector<2x128xf32>
    %751 = tpu.matmul %747, %750, %cst_193 {dimension_numbers = #tpu.dot_dimension_numbers<[1], [0], [0], [1], [0, 0, 1, 1], [], []>} : vector<2x32xf32>, vector<32x128xf32>, vector<2x128xf32> -> vector<2x128xf32>
    %752 = arith.addf %749, %751 : vector<2x128xf32>
    %753 = vector.extract_strided_slice %752 {offsets = [0, 0], sizes = [2, 32], strides = [1, 1]} : vector<2x128xf32> to vector<2x32xf32>
    %754 = arith.negf %753 : vector<2x32xf32>
    %755 = math.exp %754 : vector<2x32xf32>
    %cst_194 = arith.constant 1.000000e+00 : f32
    %756 = vector.broadcast %cst_194 : f32 to vector<2x32xf32>
    %757 = arith.addf %756, %755 : vector<2x32xf32>
    %758 = arith.divf %756, %757 : vector<2x32xf32>
    %759 = vector.extract_strided_slice %752 {offsets = [0, 32], sizes = [2, 32], strides = [1, 1]} : vector<2x128xf32> to vector<2x32xf32>
    %760 = arith.negf %759 : vector<2x32xf32>
    %761 = math.exp %760 : vector<2x32xf32>
    %cst_195 = arith.constant 1.000000e+00 : f32
    %762 = vector.broadcast %cst_195 : f32 to vector<2x32xf32>
    %763 = arith.addf %762, %761 : vector<2x32xf32>
    %764 = arith.divf %762, %763 : vector<2x32xf32>
    %765 = vector.extract_strided_slice %752 {offsets = [0, 64], sizes = [2, 32], strides = [1, 1]} : vector<2x128xf32> to vector<2x32xf32>
    %766 = math.tanh %765 : vector<2x32xf32>
    %767 = vector.extract_strided_slice %752 {offsets = [0, 96], sizes = [2, 32], strides = [1, 1]} : vector<2x128xf32> to vector<2x32xf32>
    %768 = arith.negf %767 : vector<2x32xf32>
    %769 = math.exp %768 : vector<2x32xf32>
    %cst_196 = arith.constant 1.000000e+00 : f32
    %770 = vector.broadcast %cst_196 : f32 to vector<2x32xf32>
    %771 = arith.addf %770, %769 : vector<2x32xf32>
    %772 = arith.divf %770, %771 : vector<2x32xf32>
    %773 = arith.mulf %764, %745 : vector<2x32xf32>
    %774 = arith.mulf %758, %766 : vector<2x32xf32>
    %775 = arith.addf %773, %774 : vector<2x32xf32>
    %776 = math.tanh %775 : vector<2x32xf32>
    %777 = arith.mulf %772, %776 : vector<2x32xf32>
    %778 = vector.extract_strided_slice %655 {offsets = [0, 4, 0], sizes = [2, 1, 128], strides = [1, 1, 1]} : vector<2x8x128xf32> to vector<2x1x128xf32>
    %779 = vector.shape_cast %778 : vector<2x1x128xf32> to vector<2x128xf32>
    %c0_197 = arith.constant 0 : index
    %c0_198 = arith.constant 0 : index
    %780 = vector.load %arg5[%c0_197, %c0_198] : memref<32x128xf32, #tpu.memory_space<vmem>>, vector<32x128xf32>
    %cst_199 = arith.constant dense<0.000000e+00> : vector<2x128xf32>
    %781 = tpu.matmul %777, %780, %cst_199 {dimension_numbers = #tpu.dot_dimension_numbers<[1], [0], [0], [1], [0, 0, 1, 1], [], []>} : vector<2x32xf32>, vector<32x128xf32>, vector<2x128xf32> -> vector<2x128xf32>
    %782 = arith.addf %779, %781 : vector<2x128xf32>
    %783 = vector.extract_strided_slice %782 {offsets = [0, 0], sizes = [2, 32], strides = [1, 1]} : vector<2x128xf32> to vector<2x32xf32>
    %784 = arith.negf %783 : vector<2x32xf32>
    %785 = math.exp %784 : vector<2x32xf32>
    %cst_200 = arith.constant 1.000000e+00 : f32
    %786 = vector.broadcast %cst_200 : f32 to vector<2x32xf32>
    %787 = arith.addf %786, %785 : vector<2x32xf32>
    %788 = arith.divf %786, %787 : vector<2x32xf32>
    %789 = vector.extract_strided_slice %782 {offsets = [0, 32], sizes = [2, 32], strides = [1, 1]} : vector<2x128xf32> to vector<2x32xf32>
    %790 = arith.negf %789 : vector<2x32xf32>
    %791 = math.exp %790 : vector<2x32xf32>
    %cst_201 = arith.constant 1.000000e+00 : f32
    %792 = vector.broadcast %cst_201 : f32 to vector<2x32xf32>
    %793 = arith.addf %792, %791 : vector<2x32xf32>
    %794 = arith.divf %792, %793 : vector<2x32xf32>
    %795 = vector.extract_strided_slice %782 {offsets = [0, 64], sizes = [2, 32], strides = [1, 1]} : vector<2x128xf32> to vector<2x32xf32>
    %796 = math.tanh %795 : vector<2x32xf32>
    %797 = vector.extract_strided_slice %782 {offsets = [0, 96], sizes = [2, 32], strides = [1, 1]} : vector<2x128xf32> to vector<2x32xf32>
    %798 = arith.negf %797 : vector<2x32xf32>
    %799 = math.exp %798 : vector<2x32xf32>
    %cst_202 = arith.constant 1.000000e+00 : f32
    %800 = vector.broadcast %cst_202 : f32 to vector<2x32xf32>
    %801 = arith.addf %800, %799 : vector<2x32xf32>
    %802 = arith.divf %800, %801 : vector<2x32xf32>
    %803 = arith.mulf %794, %775 : vector<2x32xf32>
    %804 = arith.mulf %788, %796 : vector<2x32xf32>
    %805 = arith.addf %803, %804 : vector<2x32xf32>
    %806 = math.tanh %805 : vector<2x32xf32>
    %807 = arith.mulf %802, %806 : vector<2x32xf32>
    %808 = vector.extract_strided_slice %655 {offsets = [0, 5, 0], sizes = [2, 1, 128], strides = [1, 1, 1]} : vector<2x8x128xf32> to vector<2x1x128xf32>
    %809 = vector.shape_cast %808 : vector<2x1x128xf32> to vector<2x128xf32>
    %c0_203 = arith.constant 0 : index
    %c0_204 = arith.constant 0 : index
    %810 = vector.load %arg5[%c0_203, %c0_204] : memref<32x128xf32, #tpu.memory_space<vmem>>, vector<32x128xf32>
    %cst_205 = arith.constant dense<0.000000e+00> : vector<2x128xf32>
    %811 = tpu.matmul %807, %810, %cst_205 {dimension_numbers = #tpu.dot_dimension_numbers<[1], [0], [0], [1], [0, 0, 1, 1], [], []>} : vector<2x32xf32>, vector<32x128xf32>, vector<2x128xf32> -> vector<2x128xf32>
    %812 = arith.addf %809, %811 : vector<2x128xf32>
    %813 = vector.extract_strided_slice %812 {offsets = [0, 0], sizes = [2, 32], strides = [1, 1]} : vector<2x128xf32> to vector<2x32xf32>
    %814 = arith.negf %813 : vector<2x32xf32>
    %815 = math.exp %814 : vector<2x32xf32>
    %cst_206 = arith.constant 1.000000e+00 : f32
    %816 = vector.broadcast %cst_206 : f32 to vector<2x32xf32>
    %817 = arith.addf %816, %815 : vector<2x32xf32>
    %818 = arith.divf %816, %817 : vector<2x32xf32>
    %819 = vector.extract_strided_slice %812 {offsets = [0, 32], sizes = [2, 32], strides = [1, 1]} : vector<2x128xf32> to vector<2x32xf32>
    %820 = arith.negf %819 : vector<2x32xf32>
    %821 = math.exp %820 : vector<2x32xf32>
    %cst_207 = arith.constant 1.000000e+00 : f32
    %822 = vector.broadcast %cst_207 : f32 to vector<2x32xf32>
    %823 = arith.addf %822, %821 : vector<2x32xf32>
    %824 = arith.divf %822, %823 : vector<2x32xf32>
    %825 = vector.extract_strided_slice %812 {offsets = [0, 64], sizes = [2, 32], strides = [1, 1]} : vector<2x128xf32> to vector<2x32xf32>
    %826 = math.tanh %825 : vector<2x32xf32>
    %827 = vector.extract_strided_slice %812 {offsets = [0, 96], sizes = [2, 32], strides = [1, 1]} : vector<2x128xf32> to vector<2x32xf32>
    %828 = arith.negf %827 : vector<2x32xf32>
    %829 = math.exp %828 : vector<2x32xf32>
    %cst_208 = arith.constant 1.000000e+00 : f32
    %830 = vector.broadcast %cst_208 : f32 to vector<2x32xf32>
    %831 = arith.addf %830, %829 : vector<2x32xf32>
    %832 = arith.divf %830, %831 : vector<2x32xf32>
    %833 = arith.mulf %824, %805 : vector<2x32xf32>
    %834 = arith.mulf %818, %826 : vector<2x32xf32>
    %835 = arith.addf %833, %834 : vector<2x32xf32>
    %836 = math.tanh %835 : vector<2x32xf32>
    %837 = arith.mulf %832, %836 : vector<2x32xf32>
    %838 = vector.extract_strided_slice %655 {offsets = [0, 6, 0], sizes = [2, 1, 128], strides = [1, 1, 1]} : vector<2x8x128xf32> to vector<2x1x128xf32>
    %839 = vector.shape_cast %838 : vector<2x1x128xf32> to vector<2x128xf32>
    %c0_209 = arith.constant 0 : index
    %c0_210 = arith.constant 0 : index
    %840 = vector.load %arg5[%c0_209, %c0_210] : memref<32x128xf32, #tpu.memory_space<vmem>>, vector<32x128xf32>
    %cst_211 = arith.constant dense<0.000000e+00> : vector<2x128xf32>
    %841 = tpu.matmul %837, %840, %cst_211 {dimension_numbers = #tpu.dot_dimension_numbers<[1], [0], [0], [1], [0, 0, 1, 1], [], []>} : vector<2x32xf32>, vector<32x128xf32>, vector<2x128xf32> -> vector<2x128xf32>
    %842 = arith.addf %839, %841 : vector<2x128xf32>
    %843 = vector.extract_strided_slice %842 {offsets = [0, 0], sizes = [2, 32], strides = [1, 1]} : vector<2x128xf32> to vector<2x32xf32>
    %844 = arith.negf %843 : vector<2x32xf32>
    %845 = math.exp %844 : vector<2x32xf32>
    %cst_212 = arith.constant 1.000000e+00 : f32
    %846 = vector.broadcast %cst_212 : f32 to vector<2x32xf32>
    %847 = arith.addf %846, %845 : vector<2x32xf32>
    %848 = arith.divf %846, %847 : vector<2x32xf32>
    %849 = vector.extract_strided_slice %842 {offsets = [0, 32], sizes = [2, 32], strides = [1, 1]} : vector<2x128xf32> to vector<2x32xf32>
    %850 = arith.negf %849 : vector<2x32xf32>
    %851 = math.exp %850 : vector<2x32xf32>
    %cst_213 = arith.constant 1.000000e+00 : f32
    %852 = vector.broadcast %cst_213 : f32 to vector<2x32xf32>
    %853 = arith.addf %852, %851 : vector<2x32xf32>
    %854 = arith.divf %852, %853 : vector<2x32xf32>
    %855 = vector.extract_strided_slice %842 {offsets = [0, 64], sizes = [2, 32], strides = [1, 1]} : vector<2x128xf32> to vector<2x32xf32>
    %856 = math.tanh %855 : vector<2x32xf32>
    %857 = vector.extract_strided_slice %842 {offsets = [0, 96], sizes = [2, 32], strides = [1, 1]} : vector<2x128xf32> to vector<2x32xf32>
    %858 = arith.negf %857 : vector<2x32xf32>
    %859 = math.exp %858 : vector<2x32xf32>
    %cst_214 = arith.constant 1.000000e+00 : f32
    %860 = vector.broadcast %cst_214 : f32 to vector<2x32xf32>
    %861 = arith.addf %860, %859 : vector<2x32xf32>
    %862 = arith.divf %860, %861 : vector<2x32xf32>
    %863 = arith.mulf %854, %835 : vector<2x32xf32>
    %864 = arith.mulf %848, %856 : vector<2x32xf32>
    %865 = arith.addf %863, %864 : vector<2x32xf32>
    %866 = math.tanh %865 : vector<2x32xf32>
    %867 = arith.mulf %862, %866 : vector<2x32xf32>
    %868 = vector.extract_strided_slice %655 {offsets = [0, 7, 0], sizes = [2, 1, 128], strides = [1, 1, 1]} : vector<2x8x128xf32> to vector<2x1x128xf32>
    %869 = vector.shape_cast %868 : vector<2x1x128xf32> to vector<2x128xf32>
    %c0_215 = arith.constant 0 : index
    %c0_216 = arith.constant 0 : index
    %870 = vector.load %arg5[%c0_215, %c0_216] : memref<32x128xf32, #tpu.memory_space<vmem>>, vector<32x128xf32>
    %cst_217 = arith.constant dense<0.000000e+00> : vector<2x128xf32>
    %871 = tpu.matmul %867, %870, %cst_217 {dimension_numbers = #tpu.dot_dimension_numbers<[1], [0], [0], [1], [0, 0, 1, 1], [], []>} : vector<2x32xf32>, vector<32x128xf32>, vector<2x128xf32> -> vector<2x128xf32>
    %872 = arith.addf %869, %871 : vector<2x128xf32>
    %873 = vector.extract_strided_slice %872 {offsets = [0, 0], sizes = [2, 32], strides = [1, 1]} : vector<2x128xf32> to vector<2x32xf32>
    %874 = arith.negf %873 : vector<2x32xf32>
    %875 = math.exp %874 : vector<2x32xf32>
    %cst_218 = arith.constant 1.000000e+00 : f32
    %876 = vector.broadcast %cst_218 : f32 to vector<2x32xf32>
    %877 = arith.addf %876, %875 : vector<2x32xf32>
    %878 = arith.divf %876, %877 : vector<2x32xf32>
    %879 = vector.extract_strided_slice %872 {offsets = [0, 32], sizes = [2, 32], strides = [1, 1]} : vector<2x128xf32> to vector<2x32xf32>
    %880 = arith.negf %879 : vector<2x32xf32>
    %881 = math.exp %880 : vector<2x32xf32>
    %cst_219 = arith.constant 1.000000e+00 : f32
    %882 = vector.broadcast %cst_219 : f32 to vector<2x32xf32>
    %883 = arith.addf %882, %881 : vector<2x32xf32>
    %884 = arith.divf %882, %883 : vector<2x32xf32>
    %885 = vector.extract_strided_slice %872 {offsets = [0, 64], sizes = [2, 32], strides = [1, 1]} : vector<2x128xf32> to vector<2x32xf32>
    %886 = math.tanh %885 : vector<2x32xf32>
    %887 = vector.extract_strided_slice %872 {offsets = [0, 96], sizes = [2, 32], strides = [1, 1]} : vector<2x128xf32> to vector<2x32xf32>
    %888 = arith.negf %887 : vector<2x32xf32>
    %889 = math.exp %888 : vector<2x32xf32>
    %cst_220 = arith.constant 1.000000e+00 : f32
    %890 = vector.broadcast %cst_220 : f32 to vector<2x32xf32>
    %891 = arith.addf %890, %889 : vector<2x32xf32>
    %892 = arith.divf %890, %891 : vector<2x32xf32>
    %893 = arith.mulf %884, %865 : vector<2x32xf32>
    %894 = arith.mulf %878, %886 : vector<2x32xf32>
    %895 = arith.addf %893, %894 : vector<2x32xf32>
    %896 = math.tanh %895 : vector<2x32xf32>
    %897 = arith.mulf %892, %896 : vector<2x32xf32>
    %c0_221 = arith.constant 0 : index
    %c0_222 = arith.constant 0 : index
    %898 = vector.load %arg12[%c0_221, %c0_222] : memref<32x128xf32, #tpu.memory_space<vmem>>, vector<32x128xf32>
    %cst_223 = arith.constant dense<0.000000e+00> : vector<2x128xf32>
    %899 = tpu.matmul %897, %898, %cst_223 {dimension_numbers = #tpu.dot_dimension_numbers<[1], [0], [0], [1], [0, 0, 1, 1], [], []>} : vector<2x32xf32>, vector<32x128xf32>, vector<2x128xf32> -> vector<2x128xf32>
    %c0_224 = arith.constant 0 : index
    %c0_225 = arith.constant 0 : index
    %900 = vector.load %arg13[%c0_224, %c0_225] : memref<1x128xf32, #tpu.memory_space<vmem>>, vector<1x128xf32>
    %901 = vector.broadcast %900 : vector<1x128xf32> to vector<2x128xf32>
    %902 = arith.addf %899, %901 : vector<2x128xf32>
    %c0_226 = arith.constant 0 : index
    %c0_227 = arith.constant 0 : index
    %903 = vector.load %arg11[%c0_226, %c0_227] : memref<32x128xf32, #tpu.memory_space<vmem>>, vector<32x128xf32>
    %cst_228 = arith.constant dense<0.000000e+00> : vector<2x128xf32>
    %904 = tpu.matmul %687, %903, %cst_228 {dimension_numbers = #tpu.dot_dimension_numbers<[1], [0], [0], [1], [0, 0, 1, 1], [], []>} : vector<2x32xf32>, vector<32x128xf32>, vector<2x128xf32> -> vector<2x128xf32>
    %905 = arith.addf %904, %902 : vector<2x128xf32>
    %c0_229 = arith.constant 0 : index
    %c0_230 = arith.constant 0 : index
    %906 = vector.load %arg14[%c0_229, %c0_230] : memref<1x128xf32, #tpu.memory_space<vmem>>, vector<1x128xf32>
    %907 = vector.broadcast %906 : vector<1x128xf32> to vector<2x128xf32>
    %908 = arith.mulf %905, %907 : vector<2x128xf32>
    %cst_231 = arith.constant dense<0.000000e+00> : vector<2xf32>
    %909 = vector.multi_reduction <add>, %908, %cst_231 [1] : vector<2x128xf32> to vector<2xf32>
    %910 = vector.shape_cast %909 : vector<2xf32> to vector<2x1xf32>
    %c0_232 = arith.constant 0 : index
    %c0_233 = arith.constant 0 : index
    %911 = vector.load %arg15[%c0_232, %c0_233] : memref<1x1xf32, #tpu.memory_space<vmem>>, vector<1x1xf32>
    %912 = vector.broadcast %911 : vector<1x1xf32> to vector<2x1xf32>
    %913 = arith.addf %910, %912 : vector<2x1xf32>
    %c0_234 = arith.constant 0 : index
    %c0_235 = arith.constant 0 : index
    %914 = vector.load %arg11[%c0_234, %c0_235] : memref<32x128xf32, #tpu.memory_space<vmem>>, vector<32x128xf32>
    %cst_236 = arith.constant dense<0.000000e+00> : vector<2x128xf32>
    %915 = tpu.matmul %717, %914, %cst_236 {dimension_numbers = #tpu.dot_dimension_numbers<[1], [0], [0], [1], [0, 0, 1, 1], [], []>} : vector<2x32xf32>, vector<32x128xf32>, vector<2x128xf32> -> vector<2x128xf32>
    %916 = arith.addf %915, %902 : vector<2x128xf32>
    %c0_237 = arith.constant 0 : index
    %c0_238 = arith.constant 0 : index
    %917 = vector.load %arg14[%c0_237, %c0_238] : memref<1x128xf32, #tpu.memory_space<vmem>>, vector<1x128xf32>
    %918 = vector.broadcast %917 : vector<1x128xf32> to vector<2x128xf32>
    %919 = arith.mulf %916, %918 : vector<2x128xf32>
    %cst_239 = arith.constant dense<0.000000e+00> : vector<2xf32>
    %920 = vector.multi_reduction <add>, %919, %cst_239 [1] : vector<2x128xf32> to vector<2xf32>
    %921 = vector.shape_cast %920 : vector<2xf32> to vector<2x1xf32>
    %c0_240 = arith.constant 0 : index
    %c0_241 = arith.constant 0 : index
    %922 = vector.load %arg15[%c0_240, %c0_241] : memref<1x1xf32, #tpu.memory_space<vmem>>, vector<1x1xf32>
    %923 = vector.broadcast %922 : vector<1x1xf32> to vector<2x1xf32>
    %924 = arith.addf %921, %923 : vector<2x1xf32>
    %c0_242 = arith.constant 0 : index
    %c0_243 = arith.constant 0 : index
    %925 = vector.load %arg11[%c0_242, %c0_243] : memref<32x128xf32, #tpu.memory_space<vmem>>, vector<32x128xf32>
    %cst_244 = arith.constant dense<0.000000e+00> : vector<2x128xf32>
    %926 = tpu.matmul %747, %925, %cst_244 {dimension_numbers = #tpu.dot_dimension_numbers<[1], [0], [0], [1], [0, 0, 1, 1], [], []>} : vector<2x32xf32>, vector<32x128xf32>, vector<2x128xf32> -> vector<2x128xf32>
    %927 = arith.addf %926, %902 : vector<2x128xf32>
    %c0_245 = arith.constant 0 : index
    %c0_246 = arith.constant 0 : index
    %928 = vector.load %arg14[%c0_245, %c0_246] : memref<1x128xf32, #tpu.memory_space<vmem>>, vector<1x128xf32>
    %929 = vector.broadcast %928 : vector<1x128xf32> to vector<2x128xf32>
    %930 = arith.mulf %927, %929 : vector<2x128xf32>
    %cst_247 = arith.constant dense<0.000000e+00> : vector<2xf32>
    %931 = vector.multi_reduction <add>, %930, %cst_247 [1] : vector<2x128xf32> to vector<2xf32>
    %932 = vector.shape_cast %931 : vector<2xf32> to vector<2x1xf32>
    %c0_248 = arith.constant 0 : index
    %c0_249 = arith.constant 0 : index
    %933 = vector.load %arg15[%c0_248, %c0_249] : memref<1x1xf32, #tpu.memory_space<vmem>>, vector<1x1xf32>
    %934 = vector.broadcast %933 : vector<1x1xf32> to vector<2x1xf32>
    %935 = arith.addf %932, %934 : vector<2x1xf32>
    %c0_250 = arith.constant 0 : index
    %c0_251 = arith.constant 0 : index
    %936 = vector.load %arg11[%c0_250, %c0_251] : memref<32x128xf32, #tpu.memory_space<vmem>>, vector<32x128xf32>
    %cst_252 = arith.constant dense<0.000000e+00> : vector<2x128xf32>
    %937 = tpu.matmul %777, %936, %cst_252 {dimension_numbers = #tpu.dot_dimension_numbers<[1], [0], [0], [1], [0, 0, 1, 1], [], []>} : vector<2x32xf32>, vector<32x128xf32>, vector<2x128xf32> -> vector<2x128xf32>
    %938 = arith.addf %937, %902 : vector<2x128xf32>
    %c0_253 = arith.constant 0 : index
    %c0_254 = arith.constant 0 : index
    %939 = vector.load %arg14[%c0_253, %c0_254] : memref<1x128xf32, #tpu.memory_space<vmem>>, vector<1x128xf32>
    %940 = vector.broadcast %939 : vector<1x128xf32> to vector<2x128xf32>
    %941 = arith.mulf %938, %940 : vector<2x128xf32>
    %cst_255 = arith.constant dense<0.000000e+00> : vector<2xf32>
    %942 = vector.multi_reduction <add>, %941, %cst_255 [1] : vector<2x128xf32> to vector<2xf32>
    %943 = vector.shape_cast %942 : vector<2xf32> to vector<2x1xf32>
    %c0_256 = arith.constant 0 : index
    %c0_257 = arith.constant 0 : index
    %944 = vector.load %arg15[%c0_256, %c0_257] : memref<1x1xf32, #tpu.memory_space<vmem>>, vector<1x1xf32>
    %945 = vector.broadcast %944 : vector<1x1xf32> to vector<2x1xf32>
    %946 = arith.addf %943, %945 : vector<2x1xf32>
    %c0_258 = arith.constant 0 : index
    %c0_259 = arith.constant 0 : index
    %947 = vector.load %arg11[%c0_258, %c0_259] : memref<32x128xf32, #tpu.memory_space<vmem>>, vector<32x128xf32>
    %cst_260 = arith.constant dense<0.000000e+00> : vector<2x128xf32>
    %948 = tpu.matmul %807, %947, %cst_260 {dimension_numbers = #tpu.dot_dimension_numbers<[1], [0], [0], [1], [0, 0, 1, 1], [], []>} : vector<2x32xf32>, vector<32x128xf32>, vector<2x128xf32> -> vector<2x128xf32>
    %949 = arith.addf %948, %902 : vector<2x128xf32>
    %c0_261 = arith.constant 0 : index
    %c0_262 = arith.constant 0 : index
    %950 = vector.load %arg14[%c0_261, %c0_262] : memref<1x128xf32, #tpu.memory_space<vmem>>, vector<1x128xf32>
    %951 = vector.broadcast %950 : vector<1x128xf32> to vector<2x128xf32>
    %952 = arith.mulf %949, %951 : vector<2x128xf32>
    %cst_263 = arith.constant dense<0.000000e+00> : vector<2xf32>
    %953 = vector.multi_reduction <add>, %952, %cst_263 [1] : vector<2x128xf32> to vector<2xf32>
    %954 = vector.shape_cast %953 : vector<2xf32> to vector<2x1xf32>
    %c0_264 = arith.constant 0 : index
    %c0_265 = arith.constant 0 : index
    %955 = vector.load %arg15[%c0_264, %c0_265] : memref<1x1xf32, #tpu.memory_space<vmem>>, vector<1x1xf32>
    %956 = vector.broadcast %955 : vector<1x1xf32> to vector<2x1xf32>
    %957 = arith.addf %954, %956 : vector<2x1xf32>
    %c0_266 = arith.constant 0 : index
    %c0_267 = arith.constant 0 : index
    %958 = vector.load %arg11[%c0_266, %c0_267] : memref<32x128xf32, #tpu.memory_space<vmem>>, vector<32x128xf32>
    %cst_268 = arith.constant dense<0.000000e+00> : vector<2x128xf32>
    %959 = tpu.matmul %837, %958, %cst_268 {dimension_numbers = #tpu.dot_dimension_numbers<[1], [0], [0], [1], [0, 0, 1, 1], [], []>} : vector<2x32xf32>, vector<32x128xf32>, vector<2x128xf32> -> vector<2x128xf32>
    %960 = arith.addf %959, %902 : vector<2x128xf32>
    %c0_269 = arith.constant 0 : index
    %c0_270 = arith.constant 0 : index
    %961 = vector.load %arg14[%c0_269, %c0_270] : memref<1x128xf32, #tpu.memory_space<vmem>>, vector<1x128xf32>
    %962 = vector.broadcast %961 : vector<1x128xf32> to vector<2x128xf32>
    %963 = arith.mulf %960, %962 : vector<2x128xf32>
    %cst_271 = arith.constant dense<0.000000e+00> : vector<2xf32>
    %964 = vector.multi_reduction <add>, %963, %cst_271 [1] : vector<2x128xf32> to vector<2xf32>
    %965 = vector.shape_cast %964 : vector<2xf32> to vector<2x1xf32>
    %c0_272 = arith.constant 0 : index
    %c0_273 = arith.constant 0 : index
    %966 = vector.load %arg15[%c0_272, %c0_273] : memref<1x1xf32, #tpu.memory_space<vmem>>, vector<1x1xf32>
    %967 = vector.broadcast %966 : vector<1x1xf32> to vector<2x1xf32>
    %968 = arith.addf %965, %967 : vector<2x1xf32>
    %c0_274 = arith.constant 0 : index
    %c0_275 = arith.constant 0 : index
    %969 = vector.load %arg11[%c0_274, %c0_275] : memref<32x128xf32, #tpu.memory_space<vmem>>, vector<32x128xf32>
    %cst_276 = arith.constant dense<0.000000e+00> : vector<2x128xf32>
    %970 = tpu.matmul %867, %969, %cst_276 {dimension_numbers = #tpu.dot_dimension_numbers<[1], [0], [0], [1], [0, 0, 1, 1], [], []>} : vector<2x32xf32>, vector<32x128xf32>, vector<2x128xf32> -> vector<2x128xf32>
    %971 = arith.addf %970, %902 : vector<2x128xf32>
    %c0_277 = arith.constant 0 : index
    %c0_278 = arith.constant 0 : index
    %972 = vector.load %arg14[%c0_277, %c0_278] : memref<1x128xf32, #tpu.memory_space<vmem>>, vector<1x128xf32>
    %973 = vector.broadcast %972 : vector<1x128xf32> to vector<2x128xf32>
    %974 = arith.mulf %971, %973 : vector<2x128xf32>
    %cst_279 = arith.constant dense<0.000000e+00> : vector<2xf32>
    %975 = vector.multi_reduction <add>, %974, %cst_279 [1] : vector<2x128xf32> to vector<2xf32>
    %976 = vector.shape_cast %975 : vector<2xf32> to vector<2x1xf32>
    %c0_280 = arith.constant 0 : index
    %c0_281 = arith.constant 0 : index
    %977 = vector.load %arg15[%c0_280, %c0_281] : memref<1x1xf32, #tpu.memory_space<vmem>>, vector<1x1xf32>
    %978 = vector.broadcast %977 : vector<1x1xf32> to vector<2x1xf32>
    %979 = arith.addf %976, %978 : vector<2x1xf32>
    %c0_282 = arith.constant 0 : index
    %c0_283 = arith.constant 0 : index
    %980 = vector.load %arg11[%c0_282, %c0_283] : memref<32x128xf32, #tpu.memory_space<vmem>>, vector<32x128xf32>
    %cst_284 = arith.constant dense<0.000000e+00> : vector<2x128xf32>
    %981 = tpu.matmul %897, %980, %cst_284 {dimension_numbers = #tpu.dot_dimension_numbers<[1], [0], [0], [1], [0, 0, 1, 1], [], []>} : vector<2x32xf32>, vector<32x128xf32>, vector<2x128xf32> -> vector<2x128xf32>
    %982 = arith.addf %981, %902 : vector<2x128xf32>
    %c0_285 = arith.constant 0 : index
    %c0_286 = arith.constant 0 : index
    %983 = vector.load %arg14[%c0_285, %c0_286] : memref<1x128xf32, #tpu.memory_space<vmem>>, vector<1x128xf32>
    %984 = vector.broadcast %983 : vector<1x128xf32> to vector<2x128xf32>
    %985 = arith.mulf %982, %984 : vector<2x128xf32>
    %cst_287 = arith.constant dense<0.000000e+00> : vector<2xf32>
    %986 = vector.multi_reduction <add>, %985, %cst_287 [1] : vector<2x128xf32> to vector<2xf32>
    %987 = vector.shape_cast %986 : vector<2xf32> to vector<2x1xf32>
    %c0_288 = arith.constant 0 : index
    %c0_289 = arith.constant 0 : index
    %988 = vector.load %arg15[%c0_288, %c0_289] : memref<1x1xf32, #tpu.memory_space<vmem>>, vector<1x1xf32>
    %989 = vector.broadcast %988 : vector<1x1xf32> to vector<2x1xf32>
    %990 = arith.addf %987, %989 : vector<2x1xf32>
    %991 = arith.maximumf %913, %924 : vector<2x1xf32>
    %992 = arith.maximumf %991, %935 : vector<2x1xf32>
    %993 = arith.maximumf %992, %946 : vector<2x1xf32>
    %994 = arith.maximumf %993, %957 : vector<2x1xf32>
    %995 = arith.maximumf %994, %968 : vector<2x1xf32>
    %996 = arith.maximumf %995, %979 : vector<2x1xf32>
    %997 = arith.maximumf %996, %990 : vector<2x1xf32>
    %cst_290 = arith.constant 0.000000e+00 : f32
    %998 = vector.broadcast %cst_290 : f32 to vector<2x1xf32>
    %cst_291 = arith.constant 0.000000e+00 : f32
    %999 = vector.broadcast %cst_291 : f32 to vector<2x32xf32>
    %1000 = arith.subf %913, %997 : vector<2x1xf32>
    %1001 = math.exp %1000 : vector<2x1xf32>
    %1002 = arith.addf %998, %1001 : vector<2x1xf32>
    %1003 = vector.broadcast %1001 : vector<2x1xf32> to vector<2x32xf32>
    %1004 = arith.mulf %1003, %687 : vector<2x32xf32>
    %1005 = arith.addf %999, %1004 : vector<2x32xf32>
    %1006 = arith.subf %924, %997 : vector<2x1xf32>
    %1007 = math.exp %1006 : vector<2x1xf32>
    %1008 = arith.addf %1002, %1007 : vector<2x1xf32>
    %1009 = vector.broadcast %1007 : vector<2x1xf32> to vector<2x32xf32>
    %1010 = arith.mulf %1009, %717 : vector<2x32xf32>
    %1011 = arith.addf %1005, %1010 : vector<2x32xf32>
    %1012 = arith.subf %935, %997 : vector<2x1xf32>
    %1013 = math.exp %1012 : vector<2x1xf32>
    %1014 = arith.addf %1008, %1013 : vector<2x1xf32>
    %1015 = vector.broadcast %1013 : vector<2x1xf32> to vector<2x32xf32>
    %1016 = arith.mulf %1015, %747 : vector<2x32xf32>
    %1017 = arith.addf %1011, %1016 : vector<2x32xf32>
    %1018 = arith.subf %946, %997 : vector<2x1xf32>
    %1019 = math.exp %1018 : vector<2x1xf32>
    %1020 = arith.addf %1014, %1019 : vector<2x1xf32>
    %1021 = vector.broadcast %1019 : vector<2x1xf32> to vector<2x32xf32>
    %1022 = arith.mulf %1021, %777 : vector<2x32xf32>
    %1023 = arith.addf %1017, %1022 : vector<2x32xf32>
    %1024 = arith.subf %957, %997 : vector<2x1xf32>
    %1025 = math.exp %1024 : vector<2x1xf32>
    %1026 = arith.addf %1020, %1025 : vector<2x1xf32>
    %1027 = vector.broadcast %1025 : vector<2x1xf32> to vector<2x32xf32>
    %1028 = arith.mulf %1027, %807 : vector<2x32xf32>
    %1029 = arith.addf %1023, %1028 : vector<2x32xf32>
    %1030 = arith.subf %968, %997 : vector<2x1xf32>
    %1031 = math.exp %1030 : vector<2x1xf32>
    %1032 = arith.addf %1026, %1031 : vector<2x1xf32>
    %1033 = vector.broadcast %1031 : vector<2x1xf32> to vector<2x32xf32>
    %1034 = arith.mulf %1033, %837 : vector<2x32xf32>
    %1035 = arith.addf %1029, %1034 : vector<2x32xf32>
    %1036 = arith.subf %979, %997 : vector<2x1xf32>
    %1037 = math.exp %1036 : vector<2x1xf32>
    %1038 = arith.addf %1032, %1037 : vector<2x1xf32>
    %1039 = vector.broadcast %1037 : vector<2x1xf32> to vector<2x32xf32>
    %1040 = arith.mulf %1039, %867 : vector<2x32xf32>
    %1041 = arith.addf %1035, %1040 : vector<2x32xf32>
    %1042 = arith.subf %990, %997 : vector<2x1xf32>
    %1043 = math.exp %1042 : vector<2x1xf32>
    %1044 = arith.addf %1038, %1043 : vector<2x1xf32>
    %1045 = vector.broadcast %1043 : vector<2x1xf32> to vector<2x32xf32>
    %1046 = arith.mulf %1045, %897 : vector<2x32xf32>
    %1047 = arith.addf %1041, %1046 : vector<2x32xf32>
    %1048 = tpu.reciprocal %1044 {approx = true} : vector<2x1xf32> -> vector<2x1xf32>
    %1049 = vector.broadcast %1048 : vector<2x1xf32> to vector<2x32xf32>
    %1050 = arith.mulf %1047, %1049 : vector<2x32xf32>
    %c0_292 = arith.constant 0 : index
    %c0_293 = arith.constant 0 : index
    %1051 = vector.load %arg16[%c0_292, %c0_293] : memref<32x200xf32, #tpu.memory_space<vmem>>, vector<32x200xf32>
    %cst_294 = arith.constant dense<0.000000e+00> : vector<2x200xf32>
    %1052 = tpu.matmul %1050, %1051, %cst_294 {dimension_numbers = #tpu.dot_dimension_numbers<[1], [0], [0], [1], [0, 0, 1, 1], [], []>} : vector<2x32xf32>, vector<32x200xf32>, vector<2x200xf32> -> vector<2x200xf32>
    %c0_295 = arith.constant 0 : index
    %c0_296 = arith.constant 0 : index
    %1053 = vector.load %arg17[%c0_295, %c0_296] : memref<1x200xf32, #tpu.memory_space<vmem>>, vector<1x200xf32>
    %1054 = vector.broadcast %1053 : vector<1x200xf32> to vector<2x200xf32>
    %1055 = arith.addf %1052, %1054 : vector<2x200xf32>
    %c0_297 = arith.constant 0 : index
    %c0_298 = arith.constant 0 : index
    %1056 = vector.load %arg18[%c0_297, %c0_298] : memref<200x16xf32, #tpu.memory_space<vmem>>, vector<200x16xf32>
    %cst_299 = arith.constant dense<0.000000e+00> : vector<2x16xf32>
    %1057 = tpu.matmul %1055, %1056, %cst_299 {dimension_numbers = #tpu.dot_dimension_numbers<[1], [0], [0], [1], [0, 0, 1, 1], [], []>} : vector<2x200xf32>, vector<200x16xf32>, vector<2x16xf32> -> vector<2x16xf32>
    %c0_300 = arith.constant 0 : index
    %c0_301 = arith.constant 0 : index
    %1058 = vector.load %arg19[%c0_300, %c0_301] : memref<1x16xf32, #tpu.memory_space<vmem>>, vector<1x16xf32>
    %1059 = vector.broadcast %1058 : vector<1x16xf32> to vector<2x16xf32>
    %1060 = arith.addf %1057, %1059 : vector<2x16xf32>
    %c0_302 = arith.constant 0 : index
    %c0_303 = arith.constant 0 : index
    %1061 = vector.load %arg20[%c0_302, %c0_303] : memref<2x16xf32, #tpu.memory_space<vmem>>, vector<2x16xf32>
    tpu.vector_store %arg20[%c0_302, %c0_303], %1060 {strides = array<i32>} : memref<2x16xf32, #tpu.memory_space<vmem>>, vector<2x16xf32>,
    return
  }
}

</mosaic_0001>

<bundles_post_ra>
// kernel: lstm_model_forward.1
= control target key start
LH: loop header
LB: loop body
LE: loop exit
PB: predicated region body
PF: predicated region fallthrough
CT: control target
= control target key end

     0   :  { %s9054_s0 = inlined_call_operand.vmem [shape: f32[256,4], index: 0, kind: input, shape index: {}]   ;;  %s9055_s1 = inlined_call_operand.vmem [shape: f32[4,128], index: 1, kind: input, shape index: {}]   ;;  %s9056_s2 = inlined_call_operand.vmem [shape: f32[32,128], index: 2, kind: input, shape index: {}]   ;;  %s9057_s3 = inlined_call_operand.vmem [shape: f32[1,128], index: 3, kind: input, shape index: {}]   ;;  %s9058_s4 = inlined_call_operand.vmem [shape: f32[32,128], index: 4, kind: input, shape index: {}]   ;;  %s9059_s5 = inlined_call_operand.vmem [shape: f32[32,128], index: 5, kind: input, shape index: {}]   ;;  %s9060_s6 = inlined_call_operand.vmem [shape: f32[1,128], index: 6, kind: input, shape index: {}]   ;;  %s9061_s7 = inlined_call_operand.vmem [shape: f32[32,64], index: 7, kind: input, shape index: {}]   ;;  %s9062_s8 = inlined_call_operand.vmem [shape: f32[1,64], index: 8, kind: input, shape index: {}]   ;;  %s9063_s9 = inlined_call_operand.vmem [shape: f32[1,64], index: 9, kind: input, shape index: {}]   ;;  %s9064_s10 = inlined_call_operand.<no memory space> [shape: f32[1,1], index: 10, kind: input, shape index: {}]   ;;  %s9065_s11 = inlined_call_operand.vmem [shape: f32[32,128], index: 11, kind: input, shape index: {}]   ;;  %s9066_s12 = inlined_call_operand.vmem [shape: f32[32,128], index: 12, kind: input, shape index: {}]   ;;  %s9067_s13 = inlined_call_operand.vmem [shape: f32[1,128], index: 13, kind: input, shape index: {}]   ;;  %s9068_s14 = inlined_call_operand.vmem [shape: f32[1,128], index: 14, kind: input, shape index: {}]   ;;  %s9069_s16 = inlined_call_operand.vmem [shape: f32[32,200], index: 16, kind: input, shape index: {}]   ;;  %s9070_s17 = inlined_call_operand.vmem [shape: f32[1,200], index: 17, kind: input, shape index: {}]   ;;  %s9071_s18 = inlined_call_operand.vmem [shape: f32[200,16], index: 18, kind: input, shape index: {}]   ;;  %s9072_s19 = inlined_call_operand.vmem [shape: f32[1,16], index: 19, kind: input, shape index: {}]   ;;  %s9073_s20 = inlined_call_operand.hbm [shape: f32[2,16], index: 20, kind: output, shape index: {}]   ;;  %s9074_s15 = inlined_call_operand.<no memory space> [shape: f32[1,1], index: 15, kind: input, shape index: {}]  }
   0x1   :  { %9078 = sst [smem:[#allocation8_spill]] %s9054_s0  ;;  %v25_v0 = vstv %s9064_s10  ;;  %v27_v1 = vstv %s9074_s15 }
   0x2   :  { %9079 = sst [smem:[#allocation9_spill]] %s9055_s1  ;;  %26 = vst [vmem:[#allocation3] sm:$0x1] %v25_v0  ;;  %28 = vst [vmem:[#allocation4] sm:$0x1] %v27_v1 }
   0x3   :  { %9080 = sst [smem:[#allocation10_spill]] %s9056_s2 }
   0x4   :  { %9081 = sst [smem:[#allocation11_spill]] %s9057_s3 }
   0x5   :  { %9082 = sst [smem:[#allocation12_spill]] %s9058_s4 }
   0x6   :  { %s9083_s3 = sld [smem:[#allocation9_spill]]  ;;  %vm207_vm0 = vcmask 1043456   ;;  %vm110_vm1 = vcmask 31744  }
   0x7   :  { %s9084_s28 = sld [smem:[#allocation8_spill]] }
   0x8   :  { %s9085_s30 = sld [smem:[#allocation10_spill]] }
   0xc   :  { %v102_v2 = vld [vmem:[%s9083_s3] sm:$0xf] }
   0xd   :  { %v70_v3 = vld [vmem:[%s9084_s28] sm:$0xff]  ;;  %v71_v4 = vld [vmem:[%s9084_s28 + $0x8] sm:$0xff]  ;;  %6350 = vmatprep.subr.msk.mxu0 %vm207_vm0, %v102_v2  ;;  %v72_v6 = vld [vmem:[%s9084_s28 + $0x10] sm:$0xff] }
   0xe   :  { %6352 = vmatprep.mubr.msk.f32.mxu0 %vm110_vm1, %v70_v3  ;;  %v7465_v5 = vld [vmem:[%s9085_s30 + $0x18] sm:$0xff]  ;;  %6351 = vmatpush3.msk.msra.mxu0 %vm207_vm0, %v102_v2  ;;  %v7481_v8 = vld [vmem:[%s9085_s30 + $0x10] sm:$0xff]  ;;  %v74_v9 = vld [vmem:[%s9084_s28 + $0x20] sm:$0xff] }
   0xf   :  { %6433 = vmatprep.subr.mxu1 %v7465_v5  ;;  %6353 = vmatmul.mubr.msk.f32.vlgmr.msra.gmra.mxu0 %vm110_vm1, %v71_v4  ;;  %v73_v7 = vld [vmem:[%s9084_s28 + $0x18] sm:$0xff]  ;;  %v7494_v10 = vld [vmem:[%s9085_s30 + $0x8] sm:$0xff]  ;;  %v76_v12 = vld [vmem:[%s9084_s28 + $0x30] sm:$0xff] }
  0x10   :  { %6400 = vmatprep.subr.mxu0 %v7465_v5  ;;  %6355 = vmatprep.mubr.msk.f32.mxu0 %vm110_vm1, %v72_v6  ;;  %v75_v11 = vld [vmem:[%s9084_s28 + $0x28] sm:$0xff]  ;;  %v7510_v13 = vld [vmem:[%s9085_s30] sm:$0xff]  ;;  %v77_v14 = vld [vmem:[%s9084_s28 + $0x38] sm:$0xff] }
  0x11   :  { %6401 = vmatpush3.msra.mxu0 %v7465_v5  ;;  %6434 = vmatpush3.msra.mxu1 %v7465_v5 }
  0x12   :  { %6402 = vmatprep.subr.mxu0 %v7481_v8  ;;  %6435 = vmatprep.subr.mxu1 %v7481_v8 }
  0x13   :  { %6403 = vmatpush3.msra.mxu0 %v7481_v8  ;;  %6436 = vmatpush3.msra.mxu1 %v7481_v8 }
  0x14   :  { %6356 = vmatmul.mubr.msk.f32.gmra.mxu0 %vm110_vm1, %v73_v7  ;;  %6404 = vmatprep.subr.mxu0 %v7494_v10 }
  0x15   :  { %6358 = vmatprep.mubr.msk.f32.mxu0 %vm110_vm1, %v74_v9  ;;  %6405 = vmatpush3.msra.mxu0 %v7494_v10 }
  0x16   :  { %6437 = vmatprep.subr.mxu1 %v7494_v10  ;;  %6406 = vmatprep.subr.mxu0 %v7510_v13 }
  0x17   :  { %6438 = vmatpush3.msra.mxu1 %v7494_v10  ;;  %6407 = vmatpush3.msra.mxu0 %v7510_v13 }
  0x18   :  { %6359 = vmatmul.mubr.msk.f32.gmra.mxu0 %vm110_vm1, %v75_v11 }
  0x19   :  { %6361 = vmatprep.mubr.msk.f32.mxu0 %vm110_vm1, %v76_v12 }
  0x1a   :  { %29 = vsyncpa [#allocation6], 0  ;;  %v78_v15 = vld [vmem:[%s9084_s28 + $0x40] sm:$0xff]  ;;  %6411 = vmatprep.subr.mxu0 %v7465_v5  ;;  %6439 = vmatprep.subr.mxu1 %v7510_v13  ;;  %v79_v16 = vld [vmem:[%s9084_s28 + $0x48] sm:$0xff]  ;;  %v7335_v39 = vmov 0.0   ;;  %s9086_s25 = sld [smem:[#allocation11_spill]] }
  0x1b   :  { %6440 = vmatpush3.msra.mxu1 %v7510_v13  ;;  %v80_v17 = vld [vmem:[%s9084_s28 + $0x50] sm:$0xff]  ;;  %v81_v18 = vld [vmem:[%s9084_s28 + $0x58] sm:$0xff]  ;;  %v82_v19 = vld [vmem:[%s9084_s28 + $0x60] sm:$0xff]  ;;  %s7336_s3 = smov 64   ;;  %s7337_s26 = smov 32   ;;  %vm440_vm2 = vcmask 261120  }
  0x1c   :  { %6362 = vmatmul.mubr.msk.f32.gmra.mxu0 %vm110_vm1, %v77_v14  ;;  %6444 = vmatprep.subr.mxu1 %v7465_v5  ;;  %v83_v20 = vld [vmem:[%s9084_s28 + $0x68] sm:$0xff]  ;;  %v84_v21 = vld [vmem:[%s9084_s28 + $0x70] sm:$0xff]  ;;  %v85_v22 = vld [vmem:[%s9084_s28 + $0x78] sm:$0xff]  ;;  %vm3127_vm3 = vcmask 523264   ;;  %s9087_s15 = sld [smem:[#allocation12_spill]]  ;;  %vm7339_vm4 = vmmov 0  }
  0x1d   :  { %6364 = vmatprep.mubr.msk.f32.mxu0 %vm110_vm1, %v78_v15  ;;  %v86_v23 = vld [vmem:[%s9084_s28 + $0x80] sm:$0xff]  ;;  %v87_v24 = vld [vmem:[%s9084_s28 + $0x88] sm:$0xff]  ;;  %v88_v25 = vld [vmem:[%s9084_s28 + $0x90] sm:$0xff]  ;;  %vm3912_vm5 = vcmask 1041409   ;;  %vm5059_vm6 = vcmask 1041408   ;;  %vm5832_vm7 = vcmask 588800  }
  0x1e   :  { %v89_v26 = vld [vmem:[%s9084_s28 + $0x98] sm:$0xff]  ;;  %v90_v27 = vld [vmem:[%s9084_s28 + $0xa0] sm:$0xff]  ;;  %v91_v28 = vld [vmem:[%s9084_s28 + $0xa8] sm:$0xff]  ;;  %s7340_s22 = smov [#allocation5]   ;;  %vm5906_vm8 = vcmask 123904  }
  0x1f   :  { %v92_v29 = vld [vmem:[%s9084_s28 + $0xb0] sm:$0xff]  ;;  %v93_v30 = vld [vmem:[%s9084_s28 + $0xb8] sm:$0xff]  ;;  %v94_v31 = vld [vmem:[%s9084_s28 + $0xc0] sm:$0xff]  ;;  %s5914_s23 = sshll.u32 %s7340_s22, 4  ;;  %s5915_s23 = int_to_ptr.vmem [resolvable:$true] %s5914_s23 }
  0x20   :  { %6365 = vmatmul.mubr.msk.f32.gmra.mxu0 %vm110_vm1, %v79_v16  ;;  %v95_v32 = vld [vmem:[%s9084_s28 + $0xc8] sm:$0xff]  ;;  %v96_v33 = vld [vmem:[%s9084_s28 + $0xd0] sm:$0xff]  ;;  %v97_v34 = vld [vmem:[%s9084_s28 + $0xd8] sm:$0xff]  ;;  %p7318_p1 = scmp.lt.s32.totalorder %s5915_s23, %s5915_s23 }
  0x21   :  { %6367 = vmatprep.mubr.msk.f32.mxu0 %vm110_vm1, %v80_v17  ;;  %v98_v35 = vld [vmem:[%s9084_s28 + $0xe0] sm:$0xff]  ;;  %v99_v36 = vld [vmem:[%s9084_s28 + $0xe8] sm:$0xff]  ;;  %v100_v37 = vld [vmem:[%s9084_s28 + $0xf0] sm:$0xff] }
  0x22   :  { %v101_v38 = vld [vmem:[%s9084_s28 + $0xf8] sm:$0xff]  ;;  %v7638_v42 = vld [vmem:[%s9086_s25] ss:$0 sm:$0xff] }
  0x24   :  { %6368 = vmatmul.mubr.msk.f32.gmra.mxu0 %vm110_vm1, %v81_v18 }
  0x25   :  { %6370 = vmatprep.mubr.msk.f32.mxu0 %vm110_vm1, %v82_v19 }
  0x28   :  { %6371 = vmatmul.mubr.msk.f32.gmra.mxu0 %vm110_vm1, %v83_v20 }
  0x29   :  { %6373 = vmatprep.mubr.msk.f32.mxu0 %vm110_vm1, %v84_v21 }
  0x2c   :  { %6374 = vmatmul.mubr.msk.f32.gmra.mxu0 %vm110_vm1, %v85_v22 }
  0x2d   :  { %6376 = vmatprep.mubr.msk.f32.mxu0 %vm110_vm1, %v86_v23 }
  0x30   :  { %6377 = vmatmul.mubr.msk.f32.gmra.mxu0 %vm110_vm1, %v87_v24 }
  0x31   :  { %6379 = vmatprep.mubr.msk.f32.mxu0 %vm110_vm1, %v88_v25 }
  0x34   :  { %6380 = vmatmul.mubr.msk.f32.gmra.mxu0 %vm110_vm1, %v89_v26 }
  0x35   :  { %6382 = vmatprep.mubr.msk.f32.mxu0 %vm110_vm1, %v90_v27 }
  0x38   :  { %6383 = vmatmul.mubr.msk.f32.gmra.mxu0 %vm110_vm1, %v91_v28 }
  0x39   :  { %6385 = vmatprep.mubr.msk.f32.mxu0 %vm110_vm1, %v92_v29 }
  0x3c   :  { %6386 = vmatmul.mubr.msk.f32.gmra.mxu0 %vm110_vm1, %v93_v30 }
  0x3d   :  { %6388 = vmatprep.mubr.msk.f32.mxu0 %vm110_vm1, %v94_v31 }
  0x40   :  { %6389 = vmatmul.mubr.msk.f32.gmra.mxu0 %vm110_vm1, %v95_v32 }
  0x41   :  { %6391 = vmatprep.mubr.msk.f32.mxu0 %vm110_vm1, %v96_v33 }
  0x44   :  { %6392 = vmatmul.mubr.msk.f32.gmra.mxu0 %vm110_vm1, %v97_v34 }
  0x45   :  { %6394 = vmatprep.mubr.msk.f32.mxu0 %vm110_vm1, %v98_v35 }
  0x48   :  { %6395 = vmatmul.mubr.msk.f32.gmra.mxu0 %vm110_vm1, %v99_v36 }
  0x49   :  { %6397 = vmatprep.mubr.msk.f32.mxu0 %vm110_vm1, %v100_v37 }
  0x4c   :  { %6398 = vmatmul.mubr.msk.f32.gmra.mxu0 %vm110_vm1, %v101_v38 }
  0x4d   :  { %6408 = vmatprep.mubr.f32.mxu0 %v7335_v39 }
  0x50   :  { %6409 = vmatmul.mubr.f32.vlgmr.msra.gmra.mxu0 %v7335_v39 }
  0x51   :  { %6412 = vmatpush3.msra.mxu0 %v7465_v5 }
  0x52   :  { %6413 = vmatprep.subr.mxu0 %v7481_v8 }
  0x53   :  { %6414 = vmatpush3.msra.mxu0 %v7481_v8 }
  0x54   :  { %6415 = vmatprep.subr.mxu0 %v7494_v10 }
  0x55   :  { %6416 = vmatpush3.msra.mxu0 %v7494_v10 }
  0x56   :  { %6417 = vmatprep.subr.mxu0 %v7510_v13 }
  0x57   :  { %6418 = vmatpush3.msra.mxu0 %v7510_v13 }
  0x58   :  { %6422 = vmatprep.subr.mxu0 %v7465_v5 }
  0xcf   :  { %v7631_v40 = vpop.f32.mrf.mxu0 }
  0xd1   :  { %v7633_v41 = vpop.f32.mrf.mxu0 }
  0xd4   :  { %v6357_v43 = vpop.f32.mrf.mxu0 }
  0xd5   :  { %v7641_v44 = vadd.f32 %v6357_v43, %v7638_v42 }
  0xd6   :  { %v287_v45 = vpop.f32.mrf.mxu0 }
  0xd7   :  { %v7644_v46 = vadd.f32 %v7638_v42, %v287_v45 }
  0xd8   :  { %v6360_v47 = vpop.f32.mrf.mxu0 }
  0xd9   :  { %v7647_v48 = vadd.f32 %v6360_v47, %v7638_v42 }
  0xda   :  { %v297_v49 = vpop.f32.mrf.mxu0 }
  0xdb   :  { %v7650_v50 = vadd.f32 %v7638_v42, %v297_v49 }
  0xdc   :  { %v6363_v51 = vpop.f32.mrf.mxu0 }
  0xdd   :  { %v7653_v52 = vadd.f32 %v6363_v51, %v7638_v42 }
  0xde   :  { %v307_v53 = vpop.f32.mrf.mxu0 }
  0xdf   :  { %v7656_v54 = vadd.f32 %v7638_v42, %v307_v53  ;;  %v278_v53 = vadd.f32 %v7638_v42, %v7633_v41 }
  0xe0   :  { %v6366_v55 = vpop.f32.mrf.mxu0 }
  0xe1   :  { %v7659_v56 = vadd.f32 %v6366_v55, %v7638_v42 }
  0xe2   :  { %v317_v57 = vpop.f32.mrf.mxu0 }
  0xe3   :  { %v7662_v58 = vadd.f32 %v7638_v42, %v317_v57 }
  0xe4   :  { %v6369_v59 = vpop.f32.mrf.mxu0 }
  0xe5   :  { %v7665_v60 = vadd.f32 %v6369_v59, %v7638_v42  ;;  %v283_v59 = vadd.f32 %v7631_v40, %v7638_v42 }
  0xe6   :  { %v327_v61 = vpop.f32.mrf.mxu0 }
  0xe7   :  { %v7668_v62 = vadd.f32 %v7638_v42, %v327_v61 }
  0xe8   :  { %v6372_v63 = vpop.f32.mrf.mxu0 }
  0xe9   :  { %v7671_v0 = vadd.f32 %v6372_v63, %v7638_v42 }
  0xea   :  { %v337_v1 = vpop.f32.mrf.mxu0 }
  0xeb   :  { %v7674_v2 = vadd.f32 %v7638_v42, %v337_v1 }
  0xec   :  { %v6375_v3 = vpop.f32.mrf.mxu0 }
  0xed   :  { %v7677_v4 = vadd.f32 %v6375_v3, %v7638_v42 }
  0xee   :  { %v347_v6 = vpop.f32.mrf.mxu0 }
  0xef   :  { %v7680_v7 = vadd.f32 %v7638_v42, %v347_v6 }
  0xf0   :  { %v6378_v9 = vpop.f32.mrf.mxu0 }
  0xf1   :  { %v7683_v11 = vadd.f32 %v6378_v9, %v7638_v42 }
  0xf2   :  { %v357_v12 = vpop.f32.mrf.mxu0 }
  0xf3   :  { %v7686_v14 = vadd.f32 %v7638_v42, %v357_v12 }
  0xf4   :  { %v6381_v15 = vpop.f32.mrf.mxu0 }
  0xf5   :  { %v7689_v16 = vadd.f32 %v6381_v15, %v7638_v42 }
  0xf6   :  { %v367_v17 = vpop.f32.mrf.mxu0 }
  0xf7   :  { %v7692_v18 = vadd.f32 %v7638_v42, %v367_v17 }
  0xf8   :  { %v6384_v19 = vpop.f32.mrf.mxu0 }
  0xf9   :  { %v7695_v20 = vadd.f32 %v6384_v19, %v7638_v42 }
  0xfa   :  { %v377_v21 = vpop.f32.mrf.mxu0 }
  0xfb   :  { %v7698_v22 = vadd.f32 %v7638_v42, %v377_v21 }
  0xfc   :  { %v6387_v23 = vpop.f32.mrf.mxu0 }
  0xfd   :  { %v7701_v24 = vadd.f32 %v6387_v23, %v7638_v42 }
  0xfe   :  { %v387_v25 = vpop.f32.mrf.mxu0 }
  0xff   :  { %v7704_v26 = vadd.f32 %v7638_v42, %v387_v25 }
 0x100   :  { %v6390_v27 = vpop.f32.mrf.mxu0 }
 0x101   :  { %v7707_v28 = vadd.f32 %v6390_v27, %v7638_v42 }
 0x102   :  { %v397_v29 = vpop.f32.mrf.mxu0 }
 0x103   :  { %v7710_v30 = vadd.f32 %v7638_v42, %v397_v29 }
 0x104   :  { %v6393_v31 = vpop.f32.mrf.mxu0 }
 0x105   :  { %v7713_v32 = vadd.f32 %v6393_v31, %v7638_v42 }
 0x106   :  { %v407_v33 = vpop.f32.mrf.mxu0 }
 0x107   :  { %v7716_v34 = vadd.f32 %v7638_v42, %v407_v33 }
 0x108   :  { %v6396_v35 = vpop.f32.mrf.mxu0 }
 0x109   :  { %v7719_v36 = vadd.f32 %v6396_v35, %v7638_v42 }
 0x10a   :  { %v417_v37 = vpop.f32.mrf.mxu0 }
 0x10b   :  { %v7722_v38 = vadd.f32 %v7638_v42, %v417_v37 }
 0x10c   :  { %v6399_v43 = vpop.f32.mrf.mxu0 }
 0x10d   :  { %v7725_v45 = vadd.f32 %v6399_v43, %v7638_v42 }
 0x10e   :  { %v427_v47 = vpop.f32.mrf.mxu0 }
 0x10f   :  { %v7728_v49 = vadd.f32 %v7638_v42, %v427_v47 }
 0x110   :  { %v6410_v51 = vpop.f32.mrf.mxu0 }
 0x111   :  { %v520_v61 = vadd.f32 %v6410_v51, %v283_v59 }
 0x112   :  { %v510_v55 = vpop.f32.mrf.mxu0 }
 0x113   :  { %v519_v57 = vadd.f32 %v510_v55, %v278_v53  ;;  %v5957_v6 = vmul.f32 -1.442695, %v520_v61 }
 0x115   :  { %6838 = vtanh.f32 %v519_v57  ;;  %v5956_v3 = vmul.f32 -1.442695, %v519_v57 }
 0x116   :  { %6840 = vtanh.f32 %v520_v61 }
 0x117   :  { %6842 = vpow2.f32 %v5956_v3 }
 0x118   :  { %6844 = vpow2.f32 %v5957_v6 }
 0x122   :  { %v6839_v63 = vpop.eup %6838 }
 0x123   :  { %539 = vrot.lane.b32.xlu0 %v6839_v63, %s7336_s3  ;;  %v6841_v1 = vpop.eup %6840 }
 0x124   :  { %v6843_v41 = vpop.eup %6842 }
 0x125   :  { %v527_v9 = vadd.f32 1.0, %v6843_v41  ;;  %v6845_v12 = vpop.eup %6844 }
 0x126   :  { %v528_v15 = vadd.f32 1.0, %v6845_v12 }
 0x127   :  { %541 = vrot.lane.b32.xlu0 %v6841_v1, %s7336_s3  ;;  %6846 = vrcp.f32 %v527_v9 }
 0x128   :  { %6848 = vrcp.f32 %v528_v15 }
 0x134   :  { %v6847_v40 = vpop.eup %6846 }
 0x135   :  { %v6849_v19 = vpop.eup %6848  ;;  %v535_v25 = vmul.f32 0.0, %v6847_v40 }
 0x136   :  { %v536_v31 = vmul.f32 0.0, %v6849_v19 }
 0x195   :  { %v540_v42 = vpop.permute.xlu0 %539 }
 0x196   :  { %v545_v17 = vmul.f32 %v6847_v40, %v540_v42 }
 0x198   :  { %549 = vrot.lane.b32.xlu1 %v545_v17, %s7337_s26 }
 0x199   :  { %v542_v21 = vpop.permute.xlu0 %541 }
 0x19a   :  { %v546_v23 = vmul.f32 %v6849_v19, %v542_v21 }
 0x19c   :  { %551 = vrot.lane.b32.xlu1 %v546_v23, %s7337_s26 }
 0x20a   :  { %v550_v27 = vpop.permute.xlu1 %549 }
 0x20b   :  { %v555_v29 = vadd.f32 %v550_v27, %v535_v25 }
 0x20d   :  { %6850 = vtanh.f32 %v555_v29 }
 0x20e   :  { %v552_v33 = vpop.permute.xlu1 %551 }
 0x20f   :  { %v556_v35 = vadd.f32 %v552_v33, %v536_v31 }
 0x211   :  { %6852 = vtanh.f32 %v556_v35 }
 0x21a   :  { %v6851_v37 = vpop.eup %6850 }
 0x21b   :  { %561 = vrot.lane.b32.xlu0 %v6851_v37, %s7336_s3 }
 0x21e   :  { %v6853_v43 = vpop.eup %6852 }
 0x21f   :  { %563 = vrot.lane.b32.xlu1 %v6853_v43, %s7336_s3 }
 0x28d   :  { %v562_v47 = vpop.permute.xlu0 %561 }
 0x28e   :  { %v567_v51 = vmul.f32 %v6847_v40, %v562_v47 }
 0x290   :  { %571 = vrot.lane.b32.xlu0 %v567_v51, %s7337_s26 }
 0x291   :  { %v564_v53 = vpop.permute.xlu1 %563 }
 0x292   :  { %v568_v55 = vmul.f32 %v6849_v19, %v564_v53 }
 0x294   :  { %573 = vrot.lane.b32.xlu1 %v568_v55, %s7337_s26 }
 0x302   :  { %v572_v57 = vpop.permute.xlu0 %571 }
 0x303   :  { %577 = vst.msk [vmem:[#allocation2] sm:$0xff] %vm440_vm2, %v572_v57  ;;  %6419 = vmatprep.mubr.msk.f32.mxu0 %vm440_vm2, %v572_v57 }
 0x306   :  { %v574_v59 = vpop.permute.xlu1 %573 }
 0x307   :  { %578 = vst.msk [vmem:[#allocation2 + $0x8] sm:$0xff] %vm440_vm2, %v574_v59  ;;  %6420 = vmatmul.mubr.msk.f32.vlgmr.msra.gmra.mxu0 %vm440_vm2, %v574_v59 }
 0x308   :  { %6423 = vmatpush3.msra.mxu0 %v7465_v5 }
 0x309   :  { %6424 = vmatprep.subr.mxu0 %v7481_v8 }
 0x30a   :  { %6425 = vmatpush3.msra.mxu0 %v7481_v8 }
 0x30b   :  { %6426 = vmatprep.subr.mxu0 %v7494_v10 }
 0x30c   :  { %6427 = vmatpush3.msra.mxu0 %v7494_v10 }
 0x30d   :  { %6428 = vmatprep.subr.mxu0 %v7510_v13 }
 0x30e   :  { %6429 = vmatpush3.msra.mxu0 %v7510_v13 }
 0x3c7   :  { %v6421_v61 = vpop.f32.mrf.mxu0 }
 0x3c8   :  { %v663_v63 = vadd.f32 %v6421_v61, %v7641_v44 }
 0x3c9   :  { %v653_v1 = vpop.f32.mrf.mxu0 }
 0x3ca   :  { %6854 = vtanh.f32 %v663_v63  ;;  %v662_v3 = vadd.f32 %v653_v1, %v7644_v46  ;;  %v5961_v9 = vmul.f32 -1.442695, %v663_v63 }
 0x3cc   :  { %6856 = vtanh.f32 %v662_v3  ;;  %v5960_v12 = vmul.f32 -1.442695, %v662_v3 }
 0x3cd   :  { %6858 = vpow2.f32 %v5961_v9 }
 0x3ce   :  { %6860 = vpow2.f32 %v5960_v12 }
 0x3d7   :  { %v6855_v6 = vpop.eup %6854 }
 0x3d8   :  { %684 = vrot.lane.b32.xlu1 %v6855_v6, %s7336_s3 }
 0x3d9   :  { %v6857_v41 = vpop.eup %6856 }
 0x3da   :  { %682 = vrot.lane.b32.xlu0 %v6857_v41, %s7336_s3  ;;  %v6859_v15 = vpop.eup %6858 }
 0x3db   :  { %v6861_v40 = vpop.eup %6860  ;;  %v671_v42 = vadd.f32 1.0, %v6859_v15 }
 0x3dc   :  { %v670_v17 = vadd.f32 1.0, %v6861_v40 }
 0x3dd   :  { %6862 = vrcp.f32 %v671_v42 }
 0x3de   :  { %6864 = vrcp.f32 %v670_v17 }
 0x3ea   :  { %v6863_v44 = vpop.eup %6862 }
 0x3eb   :  { %v6865_v21 = vpop.eup %6864  ;;  %v679_v27 = vmul.f32 %v6863_v44, %v556_v35 }
 0x3ec   :  { %v678_v37 = vmul.f32 %v6865_v21, %v555_v29 }
 0x44a   :  { %v685_v19 = vpop.permute.xlu1 %684 }
 0x44b   :  { %v689_v46 = vmul.f32 %v6863_v44, %v685_v19 }
 0x44c   :  { %v683_v23 = vpop.permute.xlu0 %682 }
 0x44d   :  { %694 = vrot.lane.b32.xlu1 %v689_v46, %s7337_s26  ;;  %v688_v25 = vmul.f32 %v6865_v21, %v683_v23 }
 0x44f   :  { %692 = vrot.lane.b32.xlu0 %v688_v25, %s7337_s26 }
 0x4bf   :  { %v695_v31 = vpop.permute.xlu1 %694 }
 0x4c0   :  { %v699_v33 = vadd.f32 %v695_v31, %v679_v27 }
 0x4c1   :  { %v693_v43 = vpop.permute.xlu0 %692 }
 0x4c2   :  { %6866 = vtanh.f32 %v699_v33  ;;  %v698_v47 = vadd.f32 %v693_v43, %v678_v37 }
 0x4c4   :  { %6868 = vtanh.f32 %v698_v47 }
 0x4cf   :  { %v6867_v51 = vpop.eup %6866 }
 0x4d0   :  { %706 = vrot.lane.b32.xlu1 %v6867_v51, %s7336_s3 }
 0x4d1   :  { %v6869_v53 = vpop.eup %6868 }
 0x4d2   :  { %704 = vrot.lane.b32.xlu0 %v6869_v53, %s7336_s3 }
 0x542   :  { %v707_v55 = vpop.permute.xlu1 %706 }
 0x543   :  { %v711_v57 = vmul.f32 %v6863_v44, %v707_v55 }
 0x544   :  { %v705_v59 = vpop.permute.xlu0 %704 }
 0x545   :  { %716 = vrot.lane.b32.xlu1 %v711_v57, %s7337_s26  ;;  %v710_v61 = vmul.f32 %v6865_v21, %v705_v59 }
 0x547   :  { %714 = vrot.lane.b32.xlu0 %v710_v61, %s7337_s26 }
 0x5b7   :  { %v717_v35 = vpop.permute.xlu1 %716 }
 0x5b8   :  { %721 = vst.msk [vmem:[#allocation2 + $0x18] sm:$0xff] %vm440_vm2, %v717_v35 }
 0x5b9   :  { %v715_v29 = vpop.permute.xlu0 %714 }
 0x5ba   :  { %720 = vst.msk [vmem:[#allocation2 + $0x10] sm:$0xff] %vm440_vm2, %v715_v29  ;;  %6430 = vmatprep.mubr.msk.f32.mxu0 %vm440_vm2, %v715_v29 }
 0x5bb   :  { %6431 = vmatmul.mubr.msk.f32.vlgmr.msra.gmra.mxu0 %vm440_vm2, %v717_v35 }
 0x67b   :  { %v6432_v63 = vpop.f32.mrf.mxu0 }
 0x67c   :  { %v806_v1 = vadd.f32 %v6432_v63, %v7647_v48 }
 0x67d   :  { %v796_v3 = vpop.f32.mrf.mxu0 }
 0x67e   :  { %6870 = vtanh.f32 %v806_v1  ;;  %v805_v6 = vadd.f32 %v796_v3, %v7650_v50  ;;  %v5965_v12 = vmul.f32 -1.442695, %v806_v1 }
 0x680   :  { %6872 = vtanh.f32 %v805_v6  ;;  %v5964_v15 = vmul.f32 -1.442695, %v805_v6 }
 0x681   :  { %6874 = vpow2.f32 %v5965_v12 }
 0x682   :  { %6876 = vpow2.f32 %v5964_v15 }
 0x68b   :  { %v6871_v41 = vpop.eup %6870 }
 0x68c   :  { %827 = vrot.lane.b32.xlu1 %v6871_v41, %s7336_s3 }
 0x68d   :  { %v6873_v9 = vpop.eup %6872 }
 0x68e   :  { %825 = vrot.lane.b32.xlu0 %v6873_v9, %s7336_s3  ;;  %v6875_v40 = vpop.eup %6874 }
 0x68f   :  { %v6877_v42 = vpop.eup %6876  ;;  %v814_v17 = vadd.f32 1.0, %v6875_v40 }
 0x690   :  { %v813_v44 = vadd.f32 1.0, %v6877_v42 }
 0x691   :  { %6878 = vrcp.f32 %v814_v17 }
 0x692   :  { %6880 = vrcp.f32 %v813_v44 }
 0x69e   :  { %v6879_v48 = vpop.eup %6878 }
 0x69f   :  { %v6881_v46 = vpop.eup %6880  ;;  %v822_v25 = vmul.f32 %v6879_v48, %v699_v33 }
 0x6a0   :  { %v821_v37 = vmul.f32 %v6881_v46, %v698_v47 }
 0x6fe   :  { %v828_v19 = vpop.permute.xlu1 %827 }
 0x6ff   :  { %v832_v50 = vmul.f32 %v6879_v48, %v828_v19 }
 0x700   :  { %v826_v21 = vpop.permute.xlu0 %825 }
 0x701   :  { %837 = vrot.lane.b32.xlu1 %v832_v50, %s7337_s26  ;;  %v831_v23 = vmul.f32 %v6881_v46, %v826_v21 }
 0x703   :  { %835 = vrot.lane.b32.xlu0 %v831_v23, %s7337_s26 }
 0x773   :  { %v838_v27 = vpop.permute.xlu1 %837 }
 0x774   :  { %v842_v31 = vadd.f32 %v838_v27, %v822_v25 }
 0x775   :  { %v836_v43 = vpop.permute.xlu0 %835 }
 0x776   :  { %6882 = vtanh.f32 %v842_v31  ;;  %v841_v51 = vadd.f32 %v836_v43, %v821_v37 }
 0x778   :  { %6884 = vtanh.f32 %v841_v51 }
 0x783   :  { %v6883_v53 = vpop.eup %6882 }
 0x784   :  { %849 = vrot.lane.b32.xlu1 %v6883_v53, %s7336_s3 }
 0x785   :  { %v6885_v55 = vpop.eup %6884 }
 0x786   :  { %847 = vrot.lane.b32.xlu0 %v6885_v55, %s7336_s3 }
 0x7f6   :  { %v850_v57 = vpop.permute.xlu1 %849 }
 0x7f7   :  { %v854_v59 = vmul.f32 %v6879_v48, %v850_v57 }
 0x7f8   :  { %v848_v61 = vpop.permute.xlu0 %847 }
 0x7f9   :  { %859 = vrot.lane.b32.xlu1 %v854_v59, %s7337_s26  ;;  %v853_v35 = vmul.f32 %v6881_v46, %v848_v61 }
 0x7fb   :  { %857 = vrot.lane.b32.xlu0 %v853_v35, %s7337_s26 }
 0x86b   :  { %v860_v33 = vpop.permute.xlu1 %859 }
 0x86c   :  { %864 = vst.msk [vmem:[#allocation2 + $0x28] sm:$0xff] %vm440_vm2, %v860_v33 }
 0x86d   :  { %v858_v47 = vpop.permute.xlu0 %857 }
 0x86e   :  { %863 = vst.msk [vmem:[#allocation2 + $0x20] sm:$0xff] %vm440_vm2, %v858_v47  ;;  %6441 = vmatprep.mubr.msk.f32.mxu1 %vm440_vm2, %v858_v47 }
 0x86f   :  { %6442 = vmatmul.mubr.msk.f32.vlgmr.msra.gmra.mxu1 %vm440_vm2, %v860_v33 }
 0x870   :  { %6445 = vmatpush3.msra.mxu1 %v7465_v5 }
 0x871   :  { %6446 = vmatprep.subr.mxu1 %v7481_v8 }
 0x872   :  { %6447 = vmatpush3.msra.mxu1 %v7481_v8 }
 0x873   :  { %6448 = vmatprep.subr.mxu1 %v7494_v10 }
 0x874   :  { %6449 = vmatpush3.msra.mxu1 %v7494_v10 }
 0x875   :  { %6450 = vmatprep.subr.mxu1 %v7510_v13 }
 0x876   :  { %6451 = vmatpush3.msra.mxu1 %v7510_v13 }
 0x877   :  { %6455 = vmatprep.subr.mxu1 %v7465_v5 }
 0x92f   :  { %v6443_v29 = vpop.f32.mrf.mxu1 }
 0x930   :  { %v949_v63 = vadd.f32 %v6443_v29, %v7653_v52 }
 0x931   :  { %v939_v1 = vpop.f32.mrf.mxu1 }
 0x932   :  { %6886 = vtanh.f32 %v949_v63  ;;  %v948_v3 = vadd.f32 %v939_v1, %v7656_v54  ;;  %v5969_v9 = vmul.f32 -1.442695, %v949_v63 }
 0x934   :  { %6888 = vtanh.f32 %v948_v3  ;;  %v5968_v12 = vmul.f32 -1.442695, %v948_v3 }
 0x935   :  { %6890 = vpow2.f32 %v5969_v9 }
 0x936   :  { %6892 = vpow2.f32 %v5968_v12 }
 0x93f   :  { %v6887_v6 = vpop.eup %6886 }
 0x940   :  { %970 = vrot.lane.b32.xlu1 %v6887_v6, %s7336_s3 }
 0x941   :  { %v6889_v41 = vpop.eup %6888 }
 0x942   :  { %968 = vrot.lane.b32.xlu0 %v6889_v41, %s7336_s3  ;;  %v6891_v15 = vpop.eup %6890 }
 0x943   :  { %v6893_v40 = vpop.eup %6892  ;;  %v957_v42 = vadd.f32 1.0, %v6891_v15 }
 0x944   :  { %v956_v17 = vadd.f32 1.0, %v6893_v40 }
 0x945   :  { %6894 = vrcp.f32 %v957_v42 }
 0x946   :  { %6896 = vrcp.f32 %v956_v17 }
 0x952   :  { %v6895_v52 = vpop.eup %6894 }
 0x953   :  { %v6897_v48 = vpop.eup %6896  ;;  %v965_v46 = vmul.f32 %v6895_v52, %v842_v31 }
 0x954   :  { %v964_v25 = vmul.f32 %v6897_v48, %v841_v51 }
 0x9b2   :  { %v971_v44 = vpop.permute.xlu1 %970 }
 0x9b3   :  { %v975_v54 = vmul.f32 %v6895_v52, %v971_v44 }
 0x9b4   :  { %v969_v19 = vpop.permute.xlu0 %968 }
 0x9b5   :  { %980 = vrot.lane.b32.xlu1 %v975_v54, %s7337_s26  ;;  %v974_v50 = vmul.f32 %v6897_v48, %v969_v19 }
 0x9b7   :  { %978 = vrot.lane.b32.xlu0 %v974_v50, %s7337_s26 }
 0xa27   :  { %v981_v21 = vpop.permute.xlu1 %980 }
 0xa28   :  { %v985_v23 = vadd.f32 %v981_v21, %v965_v46 }
 0xa29   :  { %v979_v27 = vpop.permute.xlu0 %978 }
 0xa2a   :  { %6898 = vtanh.f32 %v985_v23  ;;  %v984_v37 = vadd.f32 %v979_v27, %v964_v25 }
 0xa2c   :  { %6900 = vtanh.f32 %v984_v37 }
 0xa37   :  { %v6899_v43 = vpop.eup %6898 }
 0xa38   :  { %992 = vrot.lane.b32.xlu1 %v6899_v43, %s7336_s3 }
 0xa39   :  { %v6901_v53 = vpop.eup %6900 }
 0xa3a   :  { %990 = vrot.lane.b32.xlu0 %v6901_v53, %s7336_s3 }
 0xaaa   :  { %v993_v55 = vpop.permute.xlu1 %992 }
 0xaab   :  { %v997_v57 = vmul.f32 %v6895_v52, %v993_v55 }
 0xaac   :  { %v991_v59 = vpop.permute.xlu0 %990 }
 0xaad   :  { %1002 = vrot.lane.b32.xlu1 %v997_v57, %s7337_s26  ;;  %v996_v61 = vmul.f32 %v6897_v48, %v991_v59 }
 0xaaf   :  { %1000 = vrot.lane.b32.xlu0 %v996_v61, %s7337_s26 }
 0xb1f   :  { %v1003_v31 = vpop.permute.xlu1 %1002 }
 0xb20   :  { %1007 = vst.msk [vmem:[#allocation2 + $0x38] sm:$0xff] %vm440_vm2, %v1003_v31 }
 0xb21   :  { %v1001_v51 = vpop.permute.xlu0 %1000 }
 0xb22   :  { %1006 = vst.msk [vmem:[#allocation2 + $0x30] sm:$0xff] %vm440_vm2, %v1001_v51  ;;  %6452 = vmatprep.mubr.msk.f32.mxu1 %vm440_vm2, %v1001_v51 }
 0xb23   :  { %6453 = vmatmul.mubr.msk.f32.vlgmr.msra.gmra.mxu1 %vm440_vm2, %v1003_v31 }
 0xb24   :  { %6456 = vmatpush3.msra.mxu1 %v7465_v5 }
 0xb25   :  { %6457 = vmatprep.subr.mxu1 %v7481_v8 }
 0xb26   :  { %6458 = vmatpush3.msra.mxu1 %v7481_v8 }
 0xb27   :  { %6459 = vmatprep.subr.mxu1 %v7494_v10 }
 0xb28   :  { %6460 = vmatpush3.msra.mxu1 %v7494_v10 }
 0xb29   :  { %6461 = vmatprep.subr.mxu1 %v7510_v13 }
 0xb2a   :  { %6462 = vmatpush3.msra.mxu1 %v7510_v13 }
 0xb2b   :  { %6466 = vmatprep.subr.mxu1 %v7465_v5 }
 0xbe3   :  { %v6454_v35 = vpop.f32.mrf.mxu1 }
 0xbe4   :  { %v1092_v33 = vadd.f32 %v6454_v35, %v7659_v56 }
 0xbe5   :  { %v1082_v47 = vpop.f32.mrf.mxu1 }
 0xbe6   :  { %6902 = vtanh.f32 %v1092_v33  ;;  %v1091_v29 = vadd.f32 %v1082_v47, %v7662_v58  ;;  %v5973_v3 = vmul.f32 -1.442695, %v1092_v33 }
 0xbe8   :  { %6904 = vtanh.f32 %v1091_v29  ;;  %v5972_v6 = vmul.f32 -1.442695, %v1091_v29 }
 0xbe9   :  { %6906 = vpow2.f32 %v5973_v3 }
 0xbea   :  { %6908 = vpow2.f32 %v5972_v6 }
 0xbf3   :  { %v6903_v63 = vpop.eup %6902 }
 0xbf4   :  { %1113 = vrot.lane.b32.xlu1 %v6903_v63, %s7336_s3 }
 0xbf5   :  { %v6905_v1 = vpop.eup %6904 }
 0xbf6   :  { %1111 = vrot.lane.b32.xlu0 %v6905_v1, %s7336_s3  ;;  %v6907_v41 = vpop.eup %6906 }
 0xbf7   :  { %v6909_v9 = vpop.eup %6908  ;;  %v1100_v12 = vadd.f32 1.0, %v6907_v41 }
 0xbf8   :  { %v1099_v15 = vadd.f32 1.0, %v6909_v9 }
 0xbf9   :  { %6910 = vrcp.f32 %v1100_v12 }
 0xbfa   :  { %6912 = vrcp.f32 %v1099_v15 }
 0xc06   :  { %v6911_v56 = vpop.eup %6910 }
 0xc07   :  { %v6913_v42 = vpop.eup %6912  ;;  %v1108_v44 = vmul.f32 %v6911_v56, %v985_v23 }
 0xc08   :  { %v1107_v19 = vmul.f32 %v6913_v42, %v984_v37 }
 0xc66   :  { %v1114_v40 = vpop.permute.xlu1 %1113 }
 0xc67   :  { %v1118_v58 = vmul.f32 %v6911_v56, %v1114_v40 }
 0xc68   :  { %v1112_v17 = vpop.permute.xlu0 %1111 }
 0xc69   :  { %1123 = vrot.lane.b32.xlu1 %v1118_v58, %s7337_s26  ;;  %v1117_v52 = vmul.f32 %v6913_v42, %v1112_v17 }
 0xc6b   :  { %1121 = vrot.lane.b32.xlu0 %v1117_v52, %s7337_s26 }
 0xcdb   :  { %v1124_v54 = vpop.permute.xlu1 %1123 }
 0xcdc   :  { %v1128_v48 = vadd.f32 %v1124_v54, %v1108_v44 }
 0xcdd   :  { %v1122_v50 = vpop.permute.xlu0 %1121 }
 0xcde   :  { %6914 = vtanh.f32 %v1128_v48  ;;  %v1127_v46 = vadd.f32 %v1122_v50, %v1107_v19 }
 0xce0   :  { %6916 = vtanh.f32 %v1127_v46 }
 0xceb   :  { %v6915_v21 = vpop.eup %6914 }
 0xcec   :  { %1135 = vrot.lane.b32.xlu1 %v6915_v21, %s7336_s3 }
 0xced   :  { %v6917_v25 = vpop.eup %6916 }
 0xcee   :  { %1133 = vrot.lane.b32.xlu0 %v6917_v25, %s7336_s3 }
 0xd5e   :  { %v1136_v27 = vpop.permute.xlu1 %1135 }
 0xd5f   :  { %v1140_v43 = vmul.f32 %v6911_v56, %v1136_v27 }
 0xd60   :  { %v1134_v53 = vpop.permute.xlu0 %1133 }
 0xd61   :  { %1145 = vrot.lane.b32.xlu1 %v1140_v43, %s7337_s26  ;;  %v1139_v55 = vmul.f32 %v6913_v42, %v1134_v53 }
 0xd63   :  { %1143 = vrot.lane.b32.xlu0 %v1139_v55, %s7337_s26 }
 0xdd3   :  { %v1146_v23 = vpop.permute.xlu1 %1145 }
 0xdd4   :  { %1150 = vst.msk [vmem:[#allocation2 + $0x48] sm:$0xff] %vm440_vm2, %v1146_v23 }
 0xdd5   :  { %v1144_v37 = vpop.permute.xlu0 %1143 }
 0xdd6   :  { %1149 = vst.msk [vmem:[#allocation2 + $0x40] sm:$0xff] %vm440_vm2, %v1144_v37  ;;  %6463 = vmatprep.mubr.msk.f32.mxu1 %vm440_vm2, %v1144_v37 }
 0xdd7   :  { %6464 = vmatmul.mubr.msk.f32.vlgmr.msra.gmra.mxu1 %vm440_vm2, %v1146_v23 }
 0xdd8   :  { %6467 = vmatpush3.msra.mxu1 %v7465_v5 }
 0xdd9   :  { %6468 = vmatprep.subr.mxu1 %v7481_v8 }
 0xdda   :  { %6469 = vmatpush3.msra.mxu1 %v7481_v8 }
 0xddb   :  { %6470 = vmatprep.subr.mxu1 %v7494_v10 }
 0xddc   :  { %6471 = vmatpush3.msra.mxu1 %v7494_v10 }
 0xddd   :  { %6472 = vmatprep.subr.mxu1 %v7510_v13 }
 0xdde   :  { %6473 = vmatpush3.msra.mxu1 %v7510_v13 }
 0xe97   :  { %v6465_v57 = vpop.f32.mrf.mxu1 }
 0xe98   :  { %v1235_v59 = vadd.f32 %v6465_v57, %v7665_v60 }
 0xe99   :  { %v1225_v61 = vpop.f32.mrf.mxu1 }
 0xe9a   :  { %6918 = vtanh.f32 %v1235_v59  ;;  %v1234_v31 = vadd.f32 %v1225_v61, %v7668_v62  ;;  %v5977_v51 = vmul.f32 -1.442695, %v1235_v59 }
 0xe9c   :  { %6920 = vtanh.f32 %v1234_v31  ;;  %v5976_v10 = vmul.f32 -1.442695, %v1234_v31 }
 0xe9d   :  { %6922 = vpow2.f32 %v5977_v51 }
 0xe9e   :  { %6924 = vpow2.f32 %v5976_v10 }
 0xea7   :  { %v6919_v5 = vpop.eup %6918 }
 0xea8   :  { %1256 = vrot.lane.b32.xlu1 %v6919_v5, %s7336_s3 }
 0xea9   :  { %v6921_v8 = vpop.eup %6920 }
 0xeaa   :  { %1254 = vrot.lane.b32.xlu0 %v6921_v8, %s7336_s3  ;;  %v6923_v35 = vpop.eup %6922 }
 0xeab   :  { %v6925_v13 = vpop.eup %6924  ;;  %v1243_v33 = vadd.f32 1.0, %v6923_v35 }
 0xeac   :  { %v1242_v47 = vadd.f32 1.0, %v6925_v13 }
 0xead   :  { %6926 = vrcp.f32 %v1243_v33 }
 0xeae   :  { %6928 = vrcp.f32 %v1242_v47  ;;  %v7861_v47 = vld [vmem:[%s9085_s30 + $0x18] sm:$0xff] }
 0xeaf   :  { %6477 = vmatprep.subr.mxu1 %v7861_v47  ;;  %6488 = vmatprep.subr.mxu0 %v7861_v47 }
 0xeb0   :  { %6489 = vmatpush3.msra.mxu0 %v7861_v47 }
 0xeba   :  { %v6927_v60 = vpop.eup %6926 }
 0xebb   :  { %v6929_v63 = vpop.eup %6928  ;;  %v1251_v6 = vmul.f32 %v6927_v60, %v1128_v48 }
 0xebc   :  { %v1250_v12 = vmul.f32 %v6929_v63, %v1127_v46 }
 0xf1a   :  { %v1257_v29 = vpop.permute.xlu1 %1256 }
 0xf1b   :  { %v1261_v62 = vmul.f32 %v6927_v60, %v1257_v29  ;;  %v7309_v29 = vld [vmem:[%s9085_s30 + $0x8] sm:$0xff] }
 0xf1c   :  { %v1255_v1 = vpop.permute.xlu0 %1254 }
 0xf1d   :  { %1266 = vrot.lane.b32.xlu1 %v1261_v62, %s7337_s26  ;;  %v1260_v3 = vmul.f32 %v6929_v63, %v1255_v1 }
 0xf1f   :  { %1264 = vrot.lane.b32.xlu0 %v1260_v3, %s7337_s26 }
 0xf8f   :  { %v1267_v41 = vpop.permute.xlu1 %1266 }
 0xf90   :  { %v1271_v9 = vadd.f32 %v1267_v41, %v1251_v6 }
 0xf91   :  { %v1265_v15 = vpop.permute.xlu0 %1264 }
 0xf92   :  { %6930 = vtanh.f32 %v1271_v9  ;;  %v1270_v56 = vadd.f32 %v1265_v15, %v1250_v12 }
 0xf94   :  { %6932 = vtanh.f32 %v1270_v56 }
 0xf9f   :  { %v6931_v40 = vpop.eup %6930 }
 0xfa0   :  { %1278 = vrot.lane.b32.xlu1 %v6931_v40, %s7336_s3 }
 0xfa1   :  { %v6933_v58 = vpop.eup %6932 }
 0xfa2   :  { %1276 = vrot.lane.b32.xlu0 %v6933_v58, %s7336_s3 }
0x1012   :  { %v1279_v42 = vpop.permute.xlu1 %1278 }
0x1013   :  { %v1283_v17 = vmul.f32 %v6927_v60, %v1279_v42  ;;  %v7308_v60 = vld [vmem:[%s9085_s30 + $0x10] sm:$0xff] }
0x1014   :  { %v1277_v52 = vpop.permute.xlu0 %1276 }
0x1015   :  { %1288 = vrot.lane.b32.xlu1 %v1283_v17, %s7337_s26  ;;  %v1282_v44 = vmul.f32 %v6929_v63, %v1277_v52  ;;  %v7310_v63 = vld [vmem:[%s9085_s30] sm:$0xff] }
0x1017   :  { %1286 = vrot.lane.b32.xlu0 %v1282_v44, %s7337_s26 }
0x1087   :  { %v1289_v54 = vpop.permute.xlu1 %1288 }
0x1088   :  { %1293 = vst.msk [vmem:[#allocation2 + $0x58] sm:$0xff] %vm440_vm2, %v1289_v54 }
0x1089   :  { %v1287_v48 = vpop.permute.xlu0 %1286 }
0x108a   :  { %1292 = vst.msk [vmem:[#allocation2 + $0x50] sm:$0xff] %vm440_vm2, %v1287_v48  ;;  %6474 = vmatprep.mubr.msk.f32.mxu1 %vm440_vm2, %v1287_v48 }
0x108b   :  { %6475 = vmatmul.mubr.msk.f32.vlgmr.msra.gmra.mxu1 %vm440_vm2, %v1289_v54 }
0x108c   :  { %6478 = vmatpush3.msra.mxu1 %v7861_v47 }
0x108d   :  { %6479 = vmatprep.subr.mxu1 %v7308_v60 }
0x108e   :  { %6480 = vmatpush3.msra.mxu1 %v7308_v60 }
0x108f   :  { %6481 = vmatprep.subr.mxu1 %v7309_v29 }
0x1090   :  { %6482 = vmatpush3.msra.mxu1 %v7309_v29 }
0x1091   :  { %6483 = vmatprep.subr.mxu1 %v7310_v63 }
0x1092   :  { %6484 = vmatpush3.msra.mxu1 %v7310_v63 }
0x1093   :  { %6499 = vmatprep.subr.mxu1 %v7861_v47 }
0x114b   :  { %v6476_v19 = vpop.f32.mrf.mxu1 }
0x114c   :  { %v1378_v50 = vadd.f32 %v6476_v19, %v7671_v0 }
0x114d   :  { %v1368_v46 = vpop.f32.mrf.mxu1 }
0x114e   :  { %6934 = vtanh.f32 %v1378_v50  ;;  %v1377_v21 = vadd.f32 %v1368_v46, %v7674_v2  ;;  %v5981_v43 = vmul.f32 -1.442695, %v1378_v50 }
0x1150   :  { %6936 = vtanh.f32 %v1377_v21  ;;  %v5980_v53 = vmul.f32 -1.442695, %v1377_v21 }
0x1151   :  { %6938 = vpow2.f32 %v5981_v43 }
0x1152   :  { %6940 = vpow2.f32 %v5980_v53 }
0x115b   :  { %v6935_v25 = vpop.eup %6934 }
0x115c   :  { %1399 = vrot.lane.b32.xlu1 %v6935_v25, %s7336_s3 }
0x115d   :  { %v6937_v27 = vpop.eup %6936 }
0x115e   :  { %1397 = vrot.lane.b32.xlu0 %v6937_v27, %s7336_s3  ;;  %v6939_v55 = vpop.eup %6938 }
0x115f   :  { %v6941_v23 = vpop.eup %6940  ;;  %v1386_v37 = vadd.f32 1.0, %v6939_v55 }
0x1160   :  { %v1385_v57 = vadd.f32 1.0, %v6941_v23 }
0x1161   :  { %6942 = vrcp.f32 %v1386_v37 }
0x1162   :  { %6944 = vrcp.f32 %v1385_v57 }
0x116e   :  { %v6943_v0 = vpop.eup %6942 }
0x116f   :  { %v6945_v61 = vpop.eup %6944  ;;  %v1394_v8 = vmul.f32 %v6943_v0, %v1271_v9 }
0x1170   :  { %v1393_v35 = vmul.f32 %v6945_v61, %v1270_v56 }
0x11ce   :  { %v1400_v59 = vpop.permute.xlu1 %1399 }
0x11cf   :  { %v1404_v2 = vmul.f32 %v6943_v0, %v1400_v59  ;;  %v7903_v59 = vld [vmem:[%s9085_s30 + $0x10] sm:$0xff] }
0x11d0   :  { %v1398_v31 = vpop.permute.xlu0 %1397  ;;  %6490 = vmatprep.subr.mxu0 %v7903_v59 }
0x11d1   :  { %1409 = vrot.lane.b32.xlu1 %v1404_v2, %s7337_s26  ;;  %v1403_v5 = vmul.f32 %v6945_v61, %v1398_v31  ;;  %v7908_v2 = vld [vmem:[%s9085_s30 + $0x8] sm:$0xff]  ;;  %6491 = vmatpush3.msra.mxu0 %v7903_v59 }
0x11d2   :  { %6492 = vmatprep.subr.mxu0 %v7908_v2 }
0x11d3   :  { %1407 = vrot.lane.b32.xlu0 %v1403_v5, %s7337_s26  ;;  %6493 = vmatpush3.msra.mxu0 %v7908_v2  ;;  %v7923_v5 = vld [vmem:[%s9085_s30] sm:$0xff] }
0x11d4   :  { %6494 = vmatprep.subr.mxu0 %v7923_v5 }
0x11d5   :  { %6495 = vmatpush3.msra.mxu0 %v7923_v5 }
0x11d6   :  { %6510 = vmatprep.subr.mxu0 %v7861_v47 }
0x1243   :  { %v1410_v51 = vpop.permute.xlu1 %1409 }
0x1244   :  { %v7852_v10 = vadd.f32 %v1410_v51, %v1394_v8 }
0x1245   :  { %v1408_v13 = vpop.permute.xlu0 %1407 }
0x1246   :  { %6946 = vtanh.f32 %v7852_v10  ;;  %v7855_v33 = vadd.f32 %v1408_v13, %v1393_v35 }
0x1248   :  { %6948 = vtanh.f32 %v7855_v33 }
0x1253   :  { %v6947_v62 = vpop.eup %6946 }
0x1254   :  { %1421 = vrot.lane.b32.xlu1 %v6947_v62, %s7336_s3 }
0x1255   :  { %v6949_v1 = vpop.eup %6948 }
0x1256   :  { %1419 = vrot.lane.b32.xlu0 %v6949_v1, %s7336_s3 }
0x12c6   :  { %v1422_v3 = vpop.permute.xlu1 %1421 }
0x12c7   :  { %v1426_v6 = vmul.f32 %v6943_v0, %v1422_v3 }
0x12c8   :  { %v1420_v41 = vpop.permute.xlu0 %1419 }
0x12c9   :  { %1431 = vrot.lane.b32.xlu1 %v1426_v6, %s7337_s26  ;;  %v1425_v9 = vmul.f32 %v6945_v61, %v1420_v41 }
0x12cb   :  { %1429 = vrot.lane.b32.xlu0 %v1425_v9, %s7337_s26 }
0x133b   :  { %v1432_v12 = vpop.permute.xlu1 %1431 }
0x133c   :  { %1436 = vst.msk [vmem:[#allocation2 + $0x68] sm:$0xff] %vm440_vm2, %v1432_v12 }
0x133d   :  { %v1430_v15 = vpop.permute.xlu0 %1429 }
0x133e   :  { %1435 = vst.msk [vmem:[#allocation2 + $0x60] sm:$0xff] %vm440_vm2, %v1430_v15  ;;  %6485 = vmatprep.mubr.msk.f32.mxu1 %vm440_vm2, %v1430_v15 }
0x133f   :  { %6486 = vmatmul.mubr.msk.f32.vlgmr.msra.gmra.mxu1 %vm440_vm2, %v1432_v12 }
0x1340   :  { %6500 = vmatpush3.msra.mxu1 %v7861_v47 }
0x1341   :  { %6501 = vmatprep.subr.mxu1 %v7903_v59 }
0x1342   :  { %6502 = vmatpush3.msra.mxu1 %v7903_v59 }
0x1343   :  { %6503 = vmatprep.subr.mxu1 %v7908_v2 }
0x1344   :  { %6504 = vmatpush3.msra.mxu1 %v7908_v2 }
0x1345   :  { %6505 = vmatprep.subr.mxu1 %v7923_v5 }
0x1346   :  { %6506 = vmatpush3.msra.mxu1 %v7923_v5 }
0x1347   :  { %6521 = vmatprep.subr.mxu1 %v7861_v47 }
0x13ff   :  { %v6487_v56 = vpop.f32.mrf.mxu1 }
0x1400   :  { %v1521_v40 = vadd.f32 %v6487_v56, %v7677_v4 }
0x1401   :  { %v1511_v58 = vpop.f32.mrf.mxu1 }
0x1402   :  { %6950 = vtanh.f32 %v1521_v40  ;;  %v1520_v42 = vadd.f32 %v1511_v58, %v7680_v7  ;;  %v5985_v44 = vmul.f32 -1.442695, %v1521_v40 }
0x1404   :  { %6952 = vtanh.f32 %v1520_v42  ;;  %v5984_v54 = vmul.f32 -1.442695, %v1520_v42 }
0x1405   :  { %6954 = vpow2.f32 %v5985_v44 }
0x1406   :  { %6956 = vpow2.f32 %v5984_v54 }
0x140f   :  { %v6951_v17 = vpop.eup %6950 }
0x1410   :  { %1542 = vrot.lane.b32.xlu1 %v6951_v17, %s7336_s3 }
0x1411   :  { %v6953_v52 = vpop.eup %6952 }
0x1412   :  { %1540 = vrot.lane.b32.xlu0 %v6953_v52, %s7336_s3  ;;  %v6955_v48 = vpop.eup %6954 }
0x1413   :  { %v6957_v19 = vpop.eup %6956  ;;  %v1529_v50 = vadd.f32 1.0, %v6955_v48 }
0x1414   :  { %v1528_v46 = vadd.f32 1.0, %v6957_v19 }
0x1415   :  { %6958 = vrcp.f32 %v1529_v50 }
0x1416   :  { %6960 = vrcp.f32 %v1528_v46 }
0x1422   :  { %v6959_v4 = vpop.eup %6958 }
0x1423   :  { %v6961_v25 = vpop.eup %6960  ;;  %v1537_v53 = vmul.f32 %v6959_v4, %v7852_v10 }
0x1424   :  { %v1536_v37 = vmul.f32 %v6961_v25, %v7855_v33 }
0x1482   :  { %v1543_v21 = vpop.permute.xlu1 %1542 }
0x1483   :  { %v1547_v7 = vmul.f32 %v6959_v4, %v1543_v21 }
0x1484   :  { %v1541_v27 = vpop.permute.xlu0 %1540 }
0x1485   :  { %1552 = vrot.lane.b32.xlu1 %v1547_v7, %s7337_s26  ;;  %v1546_v43 = vmul.f32 %v6961_v25, %v1541_v27 }
0x1487   :  { %1550 = vrot.lane.b32.xlu0 %v1546_v43, %s7337_s26 }
0x14f7   :  { %v1553_v55 = vpop.permute.xlu1 %1552 }
0x14f8   :  { %v7893_v23 = vadd.f32 %v1553_v55, %v1537_v53 }
0x14f9   :  { %v1551_v57 = vpop.permute.xlu0 %1550 }
0x14fa   :  { %6962 = vtanh.f32 %v7893_v23  ;;  %v7897_v0 = vadd.f32 %v1551_v57, %v1536_v37 }
0x14fc   :  { %6964 = vtanh.f32 %v7897_v0 }
0x1507   :  { %v6963_v61 = vpop.eup %6962 }
0x1508   :  { %1564 = vrot.lane.b32.xlu1 %v6963_v61, %s7336_s3 }
0x1509   :  { %v6965_v31 = vpop.eup %6964 }
0x150a   :  { %1562 = vrot.lane.b32.xlu0 %v6965_v31, %s7336_s3 }
0x157a   :  { %v1565_v8 = vpop.permute.xlu1 %1564 }
0x157b   :  { %v1569_v51 = vmul.f32 %v6959_v4, %v1565_v8 }
0x157c   :  { %v1563_v10 = vpop.permute.xlu0 %1562 }
0x157d   :  { %1574 = vrot.lane.b32.xlu1 %v1569_v51, %s7337_s26  ;;  %v1568_v35 = vmul.f32 %v6961_v25, %v1563_v10 }
0x157f   :  { %1572 = vrot.lane.b32.xlu0 %v1568_v35, %s7337_s26 }
0x15ef   :  { %v1575_v13 = vpop.permute.xlu1 %1574 }
0x15f0   :  { %1579 = vst.msk [vmem:[#allocation2 + $0x78] sm:$0xff] %vm440_vm2, %v1575_v13 }
0x15f1   :  { %v1573_v33 = vpop.permute.xlu0 %1572 }
0x15f2   :  { %1578 = vst.msk [vmem:[#allocation2 + $0x70] sm:$0xff] %vm440_vm2, %v1573_v33  ;;  %6496 = vmatprep.mubr.msk.f32.mxu0 %vm440_vm2, %v1573_v33 }
0x15f3   :  { %6497 = vmatmul.mubr.msk.f32.vlgmr.msra.gmra.mxu0 %vm440_vm2, %v1575_v13 }
0x15f4   :  { %6511 = vmatpush3.msra.mxu0 %v7861_v47 }
0x15f5   :  { %6512 = vmatprep.subr.mxu0 %v7903_v59 }
0x15f6   :  { %6513 = vmatpush3.msra.mxu0 %v7903_v59 }
0x15f7   :  { %6514 = vmatprep.subr.mxu0 %v7908_v2 }
0x15f8   :  { %6515 = vmatpush3.msra.mxu0 %v7908_v2 }
0x15f9   :  { %6516 = vmatprep.subr.mxu0 %v7923_v5 }
0x15fa   :  { %6517 = vmatpush3.msra.mxu0 %v7923_v5 }
0x15fb   :  { %6532 = vmatprep.subr.mxu0 %v7861_v47 }
0x16b3   :  { %v6498_v60 = vpop.f32.mrf.mxu0 }
0x16b4   :  { %v1664_v29 = vadd.f32 %v6498_v60, %v7683_v11 }
0x16b5   :  { %v1654_v62 = vpop.f32.mrf.mxu0 }
0x16b6   :  { %6966 = vtanh.f32 %v1664_v29  ;;  %v1663_v63 = vadd.f32 %v1654_v62, %v7686_v14  ;;  %v5989_v6 = vmul.f32 -1.442695, %v1664_v29 }
0x16b8   :  { %6968 = vtanh.f32 %v1663_v63  ;;  %v5988_v41 = vmul.f32 -1.442695, %v1663_v63 }
0x16b9   :  { %6970 = vpow2.f32 %v5989_v6 }
0x16ba   :  { %6972 = vpow2.f32 %v5988_v41 }
0x16c3   :  { %v6967_v1 = vpop.eup %6966 }
0x16c4   :  { %1685 = vrot.lane.b32.xlu1 %v6967_v1, %s7336_s3 }
0x16c5   :  { %v6969_v3 = vpop.eup %6968 }
0x16c6   :  { %1683 = vrot.lane.b32.xlu0 %v6969_v3, %s7336_s3  ;;  %v6971_v9 = vpop.eup %6970 }
0x16c7   :  { %v6973_v12 = vpop.eup %6972  ;;  %v1672_v15 = vadd.f32 1.0, %v6971_v9 }
0x16c8   :  { %v1671_v56 = vadd.f32 1.0, %v6973_v12 }
0x16c9   :  { %6974 = vrcp.f32 %v1672_v15 }
0x16ca   :  { %6976 = vrcp.f32 %v1671_v56 }
0x16d6   :  { %v6975_v11 = vpop.eup %6974 }
0x16d7   :  { %v6977_v58 = vpop.eup %6976  ;;  %v1680_v52 = vmul.f32 %v6975_v11, %v7893_v23 }
0x16d8   :  { %v1679_v48 = vmul.f32 %v6977_v58, %v7897_v0 }
0x1736   :  { %v1686_v40 = vpop.permute.xlu1 %1685 }
0x1737   :  { %v1690_v14 = vmul.f32 %v6975_v11, %v1686_v40 }
0x1738   :  { %v1684_v42 = vpop.permute.xlu0 %1683 }
0x1739   :  { %1695 = vrot.lane.b32.xlu1 %v1690_v14, %s7337_s26  ;;  %v1689_v17 = vmul.f32 %v6977_v58, %v1684_v42 }
0x173b   :  { %1693 = vrot.lane.b32.xlu0 %v1689_v17, %s7337_s26 }
0x17ab   :  { %v1696_v44 = vpop.permute.xlu1 %1695 }
0x17ac   :  { %v1700_v54 = vadd.f32 %v1696_v44, %v1680_v52 }
0x17ad   :  { %v1694_v19 = vpop.permute.xlu0 %1693 }
0x17ae   :  { %6978 = vtanh.f32 %v1700_v54  ;;  %v1699_v50 = vadd.f32 %v1694_v19, %v1679_v48 }
0x17b0   :  { %6980 = vtanh.f32 %v1699_v50 }
0x17bb   :  { %v6979_v46 = vpop.eup %6978 }
0x17bc   :  { %1707 = vrot.lane.b32.xlu1 %v6979_v46, %s7336_s3 }
0x17bd   :  { %v6981_v4 = vpop.eup %6980 }
0x17be   :  { %1705 = vrot.lane.b32.xlu0 %v6981_v4, %s7336_s3 }
0x182e   :  { %v1708_v21 = vpop.permute.xlu1 %1707 }
0x182f   :  { %v1712_v7 = vmul.f32 %v6975_v11, %v1708_v21 }
0x1830   :  { %v1706_v25 = vpop.permute.xlu0 %1705 }
0x1831   :  { %1717 = vrot.lane.b32.xlu1 %v1712_v7, %s7337_s26  ;;  %v1711_v27 = vmul.f32 %v6977_v58, %v1706_v25 }
0x1833   :  { %1715 = vrot.lane.b32.xlu0 %v1711_v27, %s7337_s26 }
0x18a3   :  { %v1718_v43 = vpop.permute.xlu1 %1717 }
0x18a4   :  { %1722 = vst.msk [vmem:[#allocation2 + $0x88] sm:$0xff] %vm440_vm2, %v1718_v43 }
0x18a5   :  { %v1716_v53 = vpop.permute.xlu0 %1715 }
0x18a6   :  { %1721 = vst.msk [vmem:[#allocation2 + $0x80] sm:$0xff] %vm440_vm2, %v1716_v53  ;;  %6507 = vmatprep.mubr.msk.f32.mxu1 %vm440_vm2, %v1716_v53 }
0x18a7   :  { %6508 = vmatmul.mubr.msk.f32.vlgmr.msra.gmra.mxu1 %vm440_vm2, %v1718_v43 }
0x18a8   :  { %6522 = vmatpush3.msra.mxu1 %v7861_v47 }
0x18a9   :  { %6523 = vmatprep.subr.mxu1 %v7903_v59 }
0x18aa   :  { %6524 = vmatpush3.msra.mxu1 %v7903_v59 }
0x18ab   :  { %6525 = vmatprep.subr.mxu1 %v7908_v2 }
0x18ac   :  { %6526 = vmatpush3.msra.mxu1 %v7908_v2 }
0x18ad   :  { %6527 = vmatprep.subr.mxu1 %v7923_v5 }
0x18ae   :  { %6528 = vmatpush3.msra.mxu1 %v7923_v5 }
0x18af   :  { %6543 = vmatprep.subr.mxu1 %v7861_v47 }
0x1967   :  { %v6509_v55 = vpop.f32.mrf.mxu1 }
0x1968   :  { %v1807_v23 = vadd.f32 %v6509_v55, %v7689_v16 }
0x1969   :  { %v1797_v37 = vpop.f32.mrf.mxu1 }
0x196a   :  { %6982 = vtanh.f32 %v1807_v23  ;;  %v1806_v57 = vadd.f32 %v1797_v37, %v7692_v18  ;;  %v5993_v31 = vmul.f32 -1.442695, %v1807_v23 }
0x196c   :  { %6984 = vtanh.f32 %v1806_v57  ;;  %v5992_v8 = vmul.f32 -1.442695, %v1806_v57 }
0x196d   :  { %6986 = vpow2.f32 %v5993_v31 }
0x196e   :  { %6988 = vpow2.f32 %v5992_v8 }
0x1977   :  { %v6983_v0 = vpop.eup %6982 }
0x1978   :  { %1828 = vrot.lane.b32.xlu1 %v6983_v0, %s7336_s3 }
0x1979   :  { %v6985_v61 = vpop.eup %6984 }
0x197a   :  { %1826 = vrot.lane.b32.xlu0 %v6985_v61, %s7336_s3  ;;  %v6987_v51 = vpop.eup %6986 }
0x197b   :  { %v6989_v10 = vpop.eup %6988  ;;  %v1815_v35 = vadd.f32 1.0, %v6987_v51 }
0x197c   :  { %v1814_v13 = vadd.f32 1.0, %v6989_v10 }
0x197d   :  { %6990 = vrcp.f32 %v1815_v35 }
0x197e   :  { %6992 = vrcp.f32 %v1814_v13 }
0x198a   :  { %v6991_v16 = vpop.eup %6990 }
0x198b   :  { %v6993_v60 = vpop.eup %6992  ;;  %v1823_v63 = vmul.f32 %v6991_v16, %v1700_v54 }
0x198c   :  { %v1822_v6 = vmul.f32 %v6993_v60, %v1699_v50 }
0x19ea   :  { %v1829_v33 = vpop.permute.xlu1 %1828 }
0x19eb   :  { %v1833_v18 = vmul.f32 %v6991_v16, %v1829_v33 }
0x19ec   :  { %v1827_v29 = vpop.permute.xlu0 %1826 }
0x19ed   :  { %1838 = vrot.lane.b32.xlu1 %v1833_v18, %s7337_s26  ;;  %v1832_v62 = vmul.f32 %v6993_v60, %v1827_v29 }
0x19ef   :  { %1836 = vrot.lane.b32.xlu0 %v1832_v62, %s7337_s26 }
0x1a5f   :  { %v1839_v1 = vpop.permute.xlu1 %1838 }
0x1a60   :  { %v1843_v3 = vadd.f32 %v1839_v1, %v1823_v63 }
0x1a61   :  { %v1837_v41 = vpop.permute.xlu0 %1836 }
0x1a62   :  { %6994 = vtanh.f32 %v1843_v3  ;;  %v1842_v9 = vadd.f32 %v1837_v41, %v1822_v6 }
0x1a64   :  { %6996 = vtanh.f32 %v1842_v9 }
0x1a6f   :  { %v6995_v12 = vpop.eup %6994 }
0x1a70   :  { %1850 = vrot.lane.b32.xlu1 %v6995_v12, %s7336_s3 }
0x1a71   :  { %v6997_v15 = vpop.eup %6996 }
0x1a72   :  { %1848 = vrot.lane.b32.xlu0 %v6997_v15, %s7336_s3 }
0x1ae2   :  { %v1851_v56 = vpop.permute.xlu1 %1850 }
0x1ae3   :  { %v1855_v11 = vmul.f32 %v6991_v16, %v1851_v56 }
0x1ae4   :  { %v1849_v40 = vpop.permute.xlu0 %1848 }
0x1ae5   :  { %1860 = vrot.lane.b32.xlu1 %v1855_v11, %s7337_s26  ;;  %v1854_v14 = vmul.f32 %v6993_v60, %v1849_v40 }
0x1ae7   :  { %1858 = vrot.lane.b32.xlu0 %v1854_v14, %s7337_s26 }
0x1b57   :  { %v1861_v58 = vpop.permute.xlu1 %1860 }
0x1b58   :  { %1865 = vst.msk [vmem:[#allocation2 + $0x98] sm:$0xff] %vm440_vm2, %v1861_v58 }
0x1b59   :  { %v1859_v42 = vpop.permute.xlu0 %1858 }
0x1b5a   :  { %1864 = vst.msk [vmem:[#allocation2 + $0x90] sm:$0xff] %vm440_vm2, %v1859_v42  ;;  %6518 = vmatprep.mubr.msk.f32.mxu0 %vm440_vm2, %v1859_v42 }
0x1b5b   :  { %6519 = vmatmul.mubr.msk.f32.vlgmr.msra.gmra.mxu0 %vm440_vm2, %v1861_v58 }
0x1b5c   :  { %6533 = vmatpush3.msra.mxu0 %v7861_v47 }
0x1b5d   :  { %6534 = vmatprep.subr.mxu0 %v7903_v59 }
0x1b5e   :  { %6535 = vmatpush3.msra.mxu0 %v7903_v59 }
0x1b5f   :  { %6536 = vmatprep.subr.mxu0 %v7908_v2 }
0x1b60   :  { %6537 = vmatpush3.msra.mxu0 %v7908_v2 }
0x1b61   :  { %6538 = vmatprep.subr.mxu0 %v7923_v5 }
0x1b62   :  { %6539 = vmatpush3.msra.mxu0 %v7923_v5 }
0x1b63   :  { %6554 = vmatprep.subr.mxu0 %v7861_v47 }
0x1c1b   :  { %v6520_v17 = vpop.f32.mrf.mxu0 }
0x1c1c   :  { %v1950_v52 = vadd.f32 %v6520_v17, %v7695_v20 }
0x1c1d   :  { %v1940_v44 = vpop.f32.mrf.mxu0 }
0x1c1e   :  { %6998 = vtanh.f32 %v1950_v52  ;;  %v1949_v54 = vadd.f32 %v1940_v44, %v7698_v22  ;;  %v5997_v50 = vmul.f32 -1.442695, %v1950_v52 }
0x1c20   :  { %7000 = vtanh.f32 %v1949_v54  ;;  %v5996_v46 = vmul.f32 -1.442695, %v1949_v54 }
0x1c21   :  { %7002 = vpow2.f32 %v5997_v50 }
0x1c22   :  { %7004 = vpow2.f32 %v5996_v46 }
0x1c2b   :  { %v6999_v48 = vpop.eup %6998 }
0x1c2c   :  { %1971 = vrot.lane.b32.xlu1 %v6999_v48, %s7336_s3 }
0x1c2d   :  { %v7001_v19 = vpop.eup %7000 }
0x1c2e   :  { %1969 = vrot.lane.b32.xlu0 %v7001_v19, %s7336_s3  ;;  %v7003_v4 = vpop.eup %7002 }
0x1c2f   :  { %v7005_v21 = vpop.eup %7004  ;;  %v1958_v7 = vadd.f32 1.0, %v7003_v4 }
0x1c30   :  { %v1957_v25 = vadd.f32 1.0, %v7005_v21 }
0x1c31   :  { %7006 = vrcp.f32 %v1958_v7 }
0x1c32   :  { %7008 = vrcp.f32 %v1957_v25 }
0x1c3e   :  { %v7007_v20 = vpop.eup %7006 }
0x1c3f   :  { %v7009_v43 = vpop.eup %7008  ;;  %v1966_v23 = vmul.f32 %v7007_v20, %v1843_v3 }
0x1c40   :  { %v1965_v0 = vmul.f32 %v7009_v43, %v1842_v9 }
0x1c9e   :  { %v1972_v27 = vpop.permute.xlu1 %1971 }
0x1c9f   :  { %v1976_v22 = vmul.f32 %v7007_v20, %v1972_v27 }
0x1ca0   :  { %v1970_v53 = vpop.permute.xlu0 %1969 }
0x1ca1   :  { %1981 = vrot.lane.b32.xlu1 %v1976_v22, %s7337_s26  ;;  %v1975_v55 = vmul.f32 %v7009_v43, %v1970_v53 }
0x1ca3   :  { %1979 = vrot.lane.b32.xlu0 %v1975_v55, %s7337_s26 }
0x1d13   :  { %v1982_v37 = vpop.permute.xlu1 %1981 }
0x1d14   :  { %v1986_v57 = vadd.f32 %v1982_v37, %v1966_v23 }
0x1d15   :  { %v1980_v61 = vpop.permute.xlu0 %1979 }
0x1d16   :  { %7010 = vtanh.f32 %v1986_v57  ;;  %v1985_v31 = vadd.f32 %v1980_v61, %v1965_v0 }
0x1d18   :  { %7012 = vtanh.f32 %v1985_v31 }
0x1d23   :  { %v7011_v8 = vpop.eup %7010 }
0x1d24   :  { %1993 = vrot.lane.b32.xlu1 %v7011_v8, %s7336_s3 }
0x1d25   :  { %v7013_v51 = vpop.eup %7012 }
0x1d26   :  { %1991 = vrot.lane.b32.xlu0 %v7013_v51, %s7336_s3 }
0x1d96   :  { %v1994_v10 = vpop.permute.xlu1 %1993 }
0x1d97   :  { %v1998_v35 = vmul.f32 %v7007_v20, %v1994_v10 }
0x1d98   :  { %v1992_v13 = vpop.permute.xlu0 %1991 }
0x1d99   :  { %2003 = vrot.lane.b32.xlu1 %v1998_v35, %s7337_s26  ;;  %v1997_v16 = vmul.f32 %v7009_v43, %v1992_v13 }
0x1d9b   :  { %2001 = vrot.lane.b32.xlu0 %v1997_v16, %s7337_s26 }
0x1e0b   :  { %v2004_v33 = vpop.permute.xlu1 %2003 }
0x1e0c   :  { %2008 = vst.msk [vmem:[#allocation2 + $0xa8] sm:$0xff] %vm440_vm2, %v2004_v33 }
0x1e0d   :  { %v2002_v18 = vpop.permute.xlu0 %2001 }
0x1e0e   :  { %2007 = vst.msk [vmem:[#allocation2 + $0xa0] sm:$0xff] %vm440_vm2, %v2002_v18  ;;  %6529 = vmatprep.mubr.msk.f32.mxu1 %vm440_vm2, %v2002_v18 }
0x1e0f   :  { %6530 = vmatmul.mubr.msk.f32.vlgmr.msra.gmra.mxu1 %vm440_vm2, %v2004_v33 }
0x1e10   :  { %6544 = vmatpush3.msra.mxu1 %v7861_v47 }
0x1e11   :  { %6545 = vmatprep.subr.mxu1 %v7903_v59 }
0x1e12   :  { %6546 = vmatpush3.msra.mxu1 %v7903_v59 }
0x1e13   :  { %6547 = vmatprep.subr.mxu1 %v7908_v2 }
0x1e14   :  { %6548 = vmatpush3.msra.mxu1 %v7908_v2 }
0x1e15   :  { %6549 = vmatprep.subr.mxu1 %v7923_v5 }
0x1e16   :  { %6550 = vmatpush3.msra.mxu1 %v7923_v5 }
0x1ecf   :  { %v6531_v60 = vpop.f32.mrf.mxu1 }
0x1ed0   :  { %v2093_v29 = vadd.f32 %v6531_v60, %v7701_v24 }
0x1ed1   :  { %v2083_v62 = vpop.f32.mrf.mxu1 }
0x1ed2   :  { %7014 = vtanh.f32 %v2093_v29  ;;  %v2092_v63 = vadd.f32 %v2083_v62, %v7704_v26  ;;  %v6001_v6 = vmul.f32 -1.442695, %v2093_v29 }
0x1ed4   :  { %7016 = vtanh.f32 %v2092_v63  ;;  %v6000_v41 = vmul.f32 -1.442695, %v2092_v63 }
0x1ed5   :  { %7018 = vpow2.f32 %v6001_v6 }
0x1ed6   :  { %7020 = vpow2.f32 %v6000_v41 }
0x1edf   :  { %v7015_v1 = vpop.eup %7014 }
0x1ee0   :  { %2114 = vrot.lane.b32.xlu1 %v7015_v1, %s7336_s3 }
0x1ee1   :  { %v7017_v3 = vpop.eup %7016 }
0x1ee2   :  { %2112 = vrot.lane.b32.xlu0 %v7017_v3, %s7336_s3  ;;  %v7019_v9 = vpop.eup %7018 }
0x1ee3   :  { %v7021_v12 = vpop.eup %7020  ;;  %v2101_v15 = vadd.f32 1.0, %v7019_v9 }
0x1ee4   :  { %v2100_v56 = vadd.f32 1.0, %v7021_v12 }
0x1ee5   :  { %7022 = vrcp.f32 %v2101_v15 }
0x1ee6   :  { %7024 = vrcp.f32 %v2100_v56 }
0x1ef2   :  { %v7023_v24 = vpop.eup %7022 }
0x1ef3   :  { %v7025_v40 = vpop.eup %7024  ;;  %v2109_v42 = vmul.f32 %v7023_v24, %v1986_v57 }
0x1ef4   :  { %v2108_v44 = vmul.f32 %v7025_v40, %v1985_v31 }
0x1f52   :  { %v2115_v11 = vpop.permute.xlu1 %2114 }
0x1f53   :  { %v2119_v26 = vmul.f32 %v7023_v24, %v2115_v11 }
0x1f54   :  { %v2113_v14 = vpop.permute.xlu0 %2112 }
0x1f55   :  { %2124 = vrot.lane.b32.xlu1 %v2119_v26, %s7337_s26  ;;  %v2118_v58 = vmul.f32 %v7025_v40, %v2113_v14 }
0x1f57   :  { %2122 = vrot.lane.b32.xlu0 %v2118_v58, %s7337_s26 }
0x1fc7   :  { %v2125_v17 = vpop.permute.xlu1 %2124 }
0x1fc8   :  { %v2129_v52 = vadd.f32 %v2125_v17, %v2109_v42 }
0x1fc9   :  { %v2123_v54 = vpop.permute.xlu0 %2122 }
0x1fca   :  { %7026 = vtanh.f32 %v2129_v52  ;;  %v2128_v48 = vadd.f32 %v2123_v54, %v2108_v44 }
0x1fcc   :  { %7028 = vtanh.f32 %v2128_v48 }
0x1fd7   :  { %v7027_v19 = vpop.eup %7026 }
0x1fd8   :  { %2136 = vrot.lane.b32.xlu1 %v7027_v19, %s7336_s3 }
0x1fd9   :  { %v7029_v50 = vpop.eup %7028 }
0x1fda   :  { %2134 = vrot.lane.b32.xlu0 %v7029_v50, %s7336_s3 }
0x204a   :  { %v2137_v46 = vpop.permute.xlu1 %2136 }
0x204b   :  { %v2141_v4 = vmul.f32 %v7023_v24, %v2137_v46 }
0x204c   :  { %v2135_v21 = vpop.permute.xlu0 %2134 }
0x204d   :  { %2146 = vrot.lane.b32.xlu1 %v2141_v4, %s7337_s26  ;;  %v2140_v7 = vmul.f32 %v7025_v40, %v2135_v21 }
0x204f   :  { %2144 = vrot.lane.b32.xlu0 %v2140_v7, %s7337_s26 }
0x20bf   :  { %v2147_v25 = vpop.permute.xlu1 %2146 }
0x20c0   :  { %2151 = vst.msk [vmem:[#allocation2 + $0xb8] sm:$0xff] %vm440_vm2, %v2147_v25 }
0x20c1   :  { %v2145_v20 = vpop.permute.xlu0 %2144 }
0x20c2   :  { %2150 = vst.msk [vmem:[#allocation2 + $0xb0] sm:$0xff] %vm440_vm2, %v2145_v20  ;;  %6540 = vmatprep.mubr.msk.f32.mxu0 %vm440_vm2, %v2145_v20  ;;  %v2759_v20 = vld [vmem:[%s9061_s7 + $0x18] sm:$0xff] }
0x20c3   :  { %6541 = vmatmul.mubr.msk.f32.vlgmr.msra.gmra.mxu0 %vm440_vm2, %v2147_v25 }
0x20c4   :  { %6555 = vmatpush3.msra.mxu0 %v7861_v47 }
0x20c5   :  { %6556 = vmatprep.subr.mxu0 %v7903_v59 }
0x20c6   :  { %6557 = vmatpush3.msra.mxu0 %v7903_v59 }
0x20c7   :  { %6558 = vmatprep.subr.mxu0 %v7908_v2 }
0x20c8   :  { %6559 = vmatpush3.msra.mxu0 %v7908_v2 }
0x20c9   :  { %6560 = vmatprep.subr.mxu0 %v7923_v5 }
0x20ca   :  { %6561 = vmatpush3.msra.mxu0 %v7923_v5 }
0x20cb   :  { %6576 = vmatprep.subr.mxu0 %v2759_v20 }
0x2183   :  { %v6542_v27 = vpop.f32.mrf.mxu0 }
0x2184   :  { %v2236_v22 = vadd.f32 %v6542_v27, %v7707_v28 }
0x2185   :  { %v2226_v43 = vpop.f32.mrf.mxu0 }
0x2186   :  { %7030 = vtanh.f32 %v2236_v22  ;;  %v2235_v53 = vadd.f32 %v2226_v43, %v7710_v30  ;;  %v6005_v55 = vmul.f32 -1.442695, %v2236_v22 }
0x2188   :  { %7032 = vtanh.f32 %v2235_v53  ;;  %v6004_v2 = vmul.f32 -1.442695, %v2235_v53 }
0x2189   :  { %7034 = vpow2.f32 %v6005_v55  ;;  %v2758_v55 = vld [vmem:[%s9061_s7 + $0x10] sm:$0xff] }
0x218a   :  { %7036 = vpow2.f32 %v6004_v2  ;;  %v2724_v2 = vld [vmem:[#allocation2] sm:$0xff] }
0x2193   :  { %v7031_v47 = vpop.eup %7030 }
0x2194   :  { %2257 = vrot.lane.b32.xlu1 %v7031_v47, %s7336_s3 }
0x2195   :  { %v7033_v59 = vpop.eup %7032 }
0x2196   :  { %2255 = vrot.lane.b32.xlu0 %v7033_v59, %s7336_s3  ;;  %v7035_v23 = vpop.eup %7034 }
0x2197   :  { %v7037_v5 = vpop.eup %7036  ;;  %v2244_v37 = vadd.f32 1.0, %v7035_v23  ;;  %v2757_v23 = vld [vmem:[%s9061_s7 + $0x8] sm:$0xff] }
0x2198   :  { %v2243_v57 = vadd.f32 1.0, %v7037_v5  ;;  %v2756_v5 = vld [vmem:[%s9061_s7] sm:$0xff] }
0x2199   :  { %7038 = vrcp.f32 %v2244_v37  ;;  %v2725_v37 = vld [vmem:[#allocation2 + $0x8] sm:$0xff] }
0x219a   :  { %7040 = vrcp.f32 %v2243_v57  ;;  %v2726_v57 = vld [vmem:[#allocation2 + $0x10] sm:$0xff] }
0x21a6   :  { %v7039_v28 = vpop.eup %7038 }
0x21a7   :  { %v7041_v61 = vpop.eup %7040  ;;  %v2252_v51 = vmul.f32 %v7039_v28, %v2129_v52 }
0x21a8   :  { %v2251_v13 = vmul.f32 %v7041_v61, %v2128_v48 }
0x2206   :  { %v2258_v0 = vpop.permute.xlu1 %2257 }
0x2207   :  { %v2262_v30 = vmul.f32 %v7039_v28, %v2258_v0  ;;  %v2728_v0 = vld [vmem:[#allocation2 + $0x20] sm:$0xff] }
0x2208   :  { %v2256_v31 = vpop.permute.xlu0 %2255 }
0x2209   :  { %2267 = vrot.lane.b32.xlu1 %v2262_v30, %s7337_s26  ;;  %v2261_v8 = vmul.f32 %v7041_v61, %v2256_v31  ;;  %v2729_v30 = vld [vmem:[#allocation2 + $0x28] sm:$0xff]  ;;  %v2731_v31 = vld [vmem:[#allocation2 + $0x38] sm:$0xff] }
0x220b   :  { %2265 = vrot.lane.b32.xlu0 %v2261_v8, %s7337_s26  ;;  %v2732_v8 = vld [vmem:[#allocation2 + $0x40] sm:$0xff] }
0x227b   :  { %v2268_v10 = vpop.permute.xlu1 %2267 }
0x227c   :  { %v2272_v35 = vadd.f32 %v2268_v10, %v2252_v51  ;;  %v2733_v51 = vld [vmem:[#allocation2 + $0x48] sm:$0xff]  ;;  %v2734_v10 = vld [vmem:[#allocation2 + $0x50] sm:$0xff] }
0x227d   :  { %v2266_v16 = vpop.permute.xlu0 %2265 }
0x227e   :  { %7042 = vtanh.f32 %v2272_v35  ;;  %v2271_v33 = vadd.f32 %v2266_v16, %v2251_v13  ;;  %v2736_v13 = vld [vmem:[#allocation2 + $0x60] sm:$0xff]  ;;  %v2737_v16 = vld [vmem:[#allocation2 + $0x68] sm:$0xff] }
0x2280   :  { %7044 = vtanh.f32 %v2271_v33 }
0x228b   :  { %v7043_v18 = vpop.eup %7042 }
0x228c   :  { %2279 = vrot.lane.b32.xlu1 %v7043_v18, %s7336_s3  ;;  %v2739_v18 = vld [vmem:[#allocation2 + $0x78] sm:$0xff] }
0x228d   :  { %v7045_v60 = vpop.eup %7044 }
0x228e   :  { %2277 = vrot.lane.b32.xlu0 %v7045_v60, %s7336_s3  ;;  %v2740_v60 = vld [vmem:[#allocation2 + $0x80] sm:$0xff] }
0x22fe   :  { %v2280_v29 = vpop.permute.xlu1 %2279 }
0x22ff   :  { %v2284_v62 = vmul.f32 %v7039_v28, %v2280_v29  ;;  %v2727_v28 = vld [vmem:[#allocation2 + $0x18] sm:$0xff]  ;;  %v2741_v29 = vld [vmem:[#allocation2 + $0x88] sm:$0xff] }
0x2300   :  { %v2278_v63 = vpop.permute.xlu0 %2277 }
0x2301   :  { %2289 = vrot.lane.b32.xlu1 %v2284_v62, %s7337_s26  ;;  %v2283_v1 = vmul.f32 %v7041_v61, %v2278_v63  ;;  %v2730_v61 = vld [vmem:[#allocation2 + $0x30] sm:$0xff]  ;;  %v2743_v63 = vld [vmem:[#allocation2 + $0x98] sm:$0xff] }
0x2302   :  { %v2742_v62 = vld [vmem:[#allocation2 + $0x90] sm:$0xff] }
0x2303   :  { %2287 = vrot.lane.b32.xlu0 %v2283_v1, %s7337_s26  ;;  %v2744_v1 = vld [vmem:[#allocation2 + $0xa0] sm:$0xff] }
0x2373   :  { %v2290_v3 = vpop.permute.xlu1 %2289 }
0x2374   :  { %2294 = vst.msk [vmem:[#allocation2 + $0xc8] sm:$0xff] %vm440_vm2, %v2290_v3 }
0x2375   :  { %v2288_v6 = vpop.permute.xlu0 %2287 }
0x2376   :  { %2293 = vst.msk [vmem:[#allocation2 + $0xc0] sm:$0xff] %vm440_vm2, %v2288_v6  ;;  %6551 = vmatprep.mubr.msk.f32.mxu1 %vm440_vm2, %v2288_v6  ;;  %v2746_v6 = vld [vmem:[#allocation2 + $0xb0] sm:$0xff] }
0x2377   :  { %6552 = vmatmul.mubr.msk.f32.vlgmr.msra.gmra.mxu1 %vm440_vm2, %v2290_v3  ;;  %v2745_v3 = vld [vmem:[#allocation2 + $0xa8] sm:$0xff] }
0x2437   :  { %v6553_v41 = vpop.f32.mrf.mxu1 }
0x2438   :  { %v2379_v9 = vadd.f32 %v6553_v41, %v7713_v32  ;;  %v2747_v41 = vld [vmem:[#allocation2 + $0xb8] sm:$0xff] }
0x2439   :  { %v2369_v12 = vpop.f32.mrf.mxu1 }
0x243a   :  { %7046 = vtanh.f32 %v2379_v9  ;;  %v2378_v15 = vadd.f32 %v2369_v12, %v7716_v34  ;;  %v6009_v11 = vmul.f32 -1.442695, %v2379_v9  ;;  %v2748_v9 = vld [vmem:[#allocation2 + $0xc0] sm:$0xff]  ;;  %v2749_v12 = vld [vmem:[#allocation2 + $0xc8] sm:$0xff] }
0x243c   :  { %7048 = vtanh.f32 %v2378_v15  ;;  %v6008_v26 = vmul.f32 -1.442695, %v2378_v15 }
0x243d   :  { %7050 = vpow2.f32 %v6009_v11 }
0x243e   :  { %7052 = vpow2.f32 %v6008_v26 }
0x2447   :  { %v7047_v56 = vpop.eup %7046 }
0x2448   :  { %2400 = vrot.lane.b32.xlu1 %v7047_v56, %s7336_s3 }
0x2449   :  { %v7049_v24 = vpop.eup %7048 }
0x244a   :  { %2398 = vrot.lane.b32.xlu0 %v7049_v24, %s7336_s3  ;;  %v7051_v40 = vpop.eup %7050 }
0x244b   :  { %v7053_v14 = vpop.eup %7052  ;;  %v2387_v58 = vadd.f32 1.0, %v7051_v40 }
0x244c   :  { %v2386_v42 = vadd.f32 1.0, %v7053_v14 }
0x244d   :  { %7054 = vrcp.f32 %v2387_v58 }
0x244e   :  { %7056 = vrcp.f32 %v2386_v42 }
0x245a   :  { %v7055_v32 = vpop.eup %7054 }
0x245b   :  { %v7057_v52 = vpop.eup %7056  ;;  %v2395_v48 = vmul.f32 %v7055_v32, %v2272_v35  ;;  %v2735_v35 = vld [vmem:[#allocation2 + $0x58] sm:$0xff] }
0x245c   :  { %v2394_v46 = vmul.f32 %v7057_v52, %v2271_v33  ;;  %v2738_v33 = vld [vmem:[#allocation2 + $0x70] sm:$0xff] }
0x24ba   :  { %v2401_v17 = vpop.permute.xlu1 %2400 }
0x24bb   :  { %v2405_v34 = vmul.f32 %v7055_v32, %v2401_v17 }
0x24bc   :  { %v2399_v44 = vpop.permute.xlu0 %2398 }
0x24bd   :  { %2410 = vrot.lane.b32.xlu1 %v2405_v34, %s7337_s26  ;;  %v2404_v54 = vmul.f32 %v7057_v52, %v2399_v44 }
0x24bf   :  { %2408 = vrot.lane.b32.xlu0 %v2404_v54, %s7337_s26 }
0x252f   :  { %v2411_v19 = vpop.permute.xlu1 %2410 }
0x2530   :  { %v8053_v50 = vadd.f32 %v2411_v19, %v2395_v48 }
0x2531   :  { %v2409_v4 = vpop.permute.xlu0 %2408 }
0x2532   :  { %7058 = vtanh.f32 %v8053_v50  ;;  %v8056_v21 = vadd.f32 %v2409_v4, %v2394_v46 }
0x2534   :  { %7060 = vtanh.f32 %v8056_v21 }
0x253f   :  { %v7059_v7 = vpop.eup %7058 }
0x2540   :  { %2422 = vrot.lane.b32.xlu1 %v7059_v7, %s7336_s3 }
0x2541   :  { %v7061_v25 = vpop.eup %7060 }
0x2542   :  { %2420 = vrot.lane.b32.xlu0 %v7061_v25, %s7336_s3 }
0x25b2   :  { %v2423_v27 = vpop.permute.xlu1 %2422 }
0x25b3   :  { %v2427_v22 = vmul.f32 %v7055_v32, %v2423_v27 }
0x25b4   :  { %v2421_v43 = vpop.permute.xlu0 %2420 }
0x25b5   :  { %2432 = vrot.lane.b32.xlu1 %v2427_v22, %s7337_s26  ;;  %v2426_v53 = vmul.f32 %v7057_v52, %v2421_v43  ;;  %v2584_v43 = vld [vmem:[%s9085_s30 + $0x18] sm:$0xff] }
0x25b6   :  { %6565 = vmatprep.subr.mxu1 %v2584_v43 }
0x25b7   :  { %2430 = vrot.lane.b32.xlu0 %v2426_v53, %s7337_s26  ;;  %6566 = vmatpush3.msra.mxu1 %v2584_v43 }
0x2627   :  { %v2433_v47 = vpop.permute.xlu1 %2432 }
0x2628   :  { %2437 = vst.msk [vmem:[#allocation2 + $0xd8] sm:$0xff] %vm440_vm2, %v2433_v47 }
0x2629   :  { %v2431_v59 = vpop.permute.xlu0 %2430 }
0x262a   :  { %2436 = vst.msk [vmem:[#allocation2 + $0xd0] sm:$0xff] %vm440_vm2, %v2431_v59  ;;  %6562 = vmatprep.mubr.msk.f32.mxu0 %vm440_vm2, %v2431_v59  ;;  %v2581_v59 = vld [vmem:[%s9085_s30] sm:$0xff] }
0x262b   :  { %6563 = vmatmul.mubr.msk.f32.vlgmr.msra.gmra.mxu0 %vm440_vm2, %v2433_v47 }
0x262c   :  { %6577 = vmatpush3.msra.mxu0 %v2759_v20  ;;  %6584 = vmatprep.mubr.msk.f32.mxu0 %vm440_vm2, %v2724_v2 }
0x262d   :  { %6578 = vmatprep.subr.mxu0 %v2758_v55 }
0x262e   :  { %6579 = vmatpush3.msra.mxu0 %v2758_v55 }
0x262f   :  { %6580 = vmatprep.subr.mxu0 %v2757_v23  ;;  %v2751_v56 = vld [vmem:[#allocation2 + $0xd8] sm:$0xff] }
0x2630   :  { %6581 = vmatpush3.msra.mxu0 %v2757_v23 }
0x2631   :  { %6582 = vmatprep.subr.mxu0 %v2756_v5  ;;  %v2750_v15 = vld [vmem:[#allocation2 + $0xd0] sm:$0xff] }
0x2632   :  { %6583 = vmatpush3.msra.mxu0 %v2756_v5 }
0x2633   :  { %6585 = vmatmul.mubr.msk.f32.vlgmr.msra.gmra.mxu0 %vm440_vm2, %v2725_v37  ;;  %6720 = vmatprep.subr.mxu0 %v7335_v39 }
0x2634   :  { %6587 = vmatprep.mubr.msk.f32.mxu0 %vm440_vm2, %v2726_v57 }
0x2637   :  { %6588 = vmatmul.mubr.msk.f32.gmra.mxu0 %vm440_vm2, %v2727_v28 }
0x2638   :  { %6590 = vmatprep.mubr.msk.f32.mxu0 %vm440_vm2, %v2728_v0 }
0x263b   :  { %6591 = vmatmul.mubr.msk.f32.gmra.mxu0 %vm440_vm2, %v2729_v30 }
0x263c   :  { %6593 = vmatprep.mubr.msk.f32.mxu0 %vm440_vm2, %v2730_v61 }
0x263f   :  { %6594 = vmatmul.mubr.msk.f32.gmra.mxu0 %vm440_vm2, %v2731_v31 }
0x2640   :  { %6596 = vmatprep.mubr.msk.f32.mxu0 %vm440_vm2, %v2732_v8 }
0x2643   :  { %6597 = vmatmul.mubr.msk.f32.gmra.mxu0 %vm440_vm2, %v2733_v51 }
0x2644   :  { %6599 = vmatprep.mubr.msk.f32.mxu0 %vm440_vm2, %v2734_v10 }
0x2647   :  { %6600 = vmatmul.mubr.msk.f32.gmra.mxu0 %vm440_vm2, %v2735_v35 }
0x2648   :  { %6602 = vmatprep.mubr.msk.f32.mxu0 %vm440_vm2, %v2736_v13 }
0x264b   :  { %6603 = vmatmul.mubr.msk.f32.gmra.mxu0 %vm440_vm2, %v2737_v16 }
0x264c   :  { %6605 = vmatprep.mubr.msk.f32.mxu0 %vm440_vm2, %v2738_v33 }
0x264f   :  { %6606 = vmatmul.mubr.msk.f32.gmra.mxu0 %vm440_vm2, %v2739_v18 }
0x2650   :  { %6608 = vmatprep.mubr.msk.f32.mxu0 %vm440_vm2, %v2740_v60 }
0x2653   :  { %6609 = vmatmul.mubr.msk.f32.gmra.mxu0 %vm440_vm2, %v2741_v29 }
0x2654   :  { %6611 = vmatprep.mubr.msk.f32.mxu0 %vm440_vm2, %v2742_v62 }
0x2657   :  { %6612 = vmatmul.mubr.msk.f32.gmra.mxu0 %vm440_vm2, %v2743_v63 }
0x2658   :  { %6614 = vmatprep.mubr.msk.f32.mxu0 %vm440_vm2, %v2744_v1 }
0x265b   :  { %6615 = vmatmul.mubr.msk.f32.gmra.mxu0 %vm440_vm2, %v2745_v3 }
0x265c   :  { %6617 = vmatprep.mubr.msk.f32.mxu0 %vm440_vm2, %v2746_v6 }
0x265f   :  { %6618 = vmatmul.mubr.msk.f32.gmra.mxu0 %vm440_vm2, %v2747_v41 }
0x2660   :  { %6620 = vmatprep.mubr.msk.f32.mxu0 %vm440_vm2, %v2748_v9 }
0x2663   :  { %6621 = vmatmul.mubr.msk.f32.gmra.mxu0 %vm440_vm2, %v2749_v12 }
0x2664   :  { %6623 = vmatprep.mubr.msk.f32.mxu0 %vm440_vm2, %v2750_v15 }
0x2667   :  { %6624 = vmatmul.mubr.msk.f32.gmra.mxu0 %vm440_vm2, %v2751_v56 }
0x26eb   :  { %v6564_v24 = vpop.f32.mrf.mxu0 }
0x26ec   :  { %v2522_v11 = vadd.f32 %v6564_v24, %v7719_v36 }
0x26ed   :  { %v2512_v26 = vpop.f32.mrf.mxu0 }
0x26ee   :  { %7062 = vtanh.f32 %v2522_v11  ;;  %v2521_v40 = vadd.f32 %v2512_v26, %v7722_v38  ;;  %v6013_v42 = vmul.f32 -1.442695, %v2522_v11 }
0x26f0   :  { %7064 = vtanh.f32 %v2521_v40  ;;  %v6012_v32 = vmul.f32 -1.442695, %v2521_v40 }
0x26f1   :  { %7066 = vpow2.f32 %v6013_v42 }
0x26f2   :  { %7068 = vpow2.f32 %v6012_v32 }
0x26f3   :  { %v6586_v11 = vpop.f32.mrf.mxu0 }
0x26f5   :  { %v2929_v26 = vpop.f32.mrf.mxu0 }
0x26f7   :  { %v6589_v40 = vpop.f32.mrf.mxu0 }
0x26fb   :  { %v7063_v14 = vpop.eup %7062 }
0x26fc   :  { %2543 = vrot.lane.b32.xlu1 %v7063_v14, %s7336_s3  ;;  %v2939_v14 = vpop.f32.mrf.mxu0 }
0x26fd   :  { %v7065_v58 = vpop.eup %7064 }
0x26fe   :  { %2541 = vrot.lane.b32.xlu0 %v7065_v58, %s7336_s3  ;;  %v7067_v17 = vpop.eup %7066  ;;  %v6592_v58 = vpop.f32.mrf.mxu0 }
0x26ff   :  { %v7069_v34 = vpop.eup %7068  ;;  %v2530_v52 = vadd.f32 1.0, %v7067_v17 }
0x2700   :  { %v2529_v44 = vadd.f32 1.0, %v7069_v34  ;;  %v2949_v42 = vpop.f32.mrf.mxu0 }
0x2701   :  { %7070 = vrcp.f32 %v2530_v52 }
0x2702   :  { %7072 = vrcp.f32 %v2529_v44  ;;  %v6595_v32 = vpop.f32.mrf.mxu0 }
0x2704   :  { %v2959_v17 = vpop.f32.mrf.mxu0 }
0x2706   :  { %v6598_v34 = vpop.f32.mrf.mxu0 }
0x2708   :  { %v2969_v44 = vpop.f32.mrf.mxu0 }
0x270e   :  { %v7071_v36 = vpop.eup %7070 }
0x270f   :  { %v7073_v48 = vpop.eup %7072  ;;  %v2538_v4 = vmul.f32 %v7071_v36, %v8053_v50  ;;  %v2583_v50 = vld [vmem:[%s9085_s30 + $0x10] sm:$0xff] }
0x2710   :  { %v2537_v20 = vmul.f32 %v7073_v48, %v8056_v21  ;;  %v2582_v21 = vld [vmem:[%s9085_s30 + $0x8] sm:$0xff]  ;;  %6567 = vmatprep.subr.mxu1 %v2583_v50 }
0x2711   :  { %6568 = vmatpush3.msra.mxu1 %v2583_v50  ;;  %v8170_v50 = vld [vmem:[%s9063_s9] ss:$0 sm:$0xff] }
0x2712   :  { %6569 = vmatprep.subr.mxu1 %v2582_v21 }
0x2713   :  { %6570 = vmatpush3.msra.mxu1 %v2582_v21 }
0x2714   :  { %6571 = vmatprep.subr.mxu1 %v2581_v59 }
0x2715   :  { %6572 = vmatpush3.msra.mxu1 %v2581_v59 }
0x276e   :  { %v2544_v54 = vpop.permute.xlu1 %2543 }
0x276f   :  { %v2548_v38 = vmul.f32 %v7071_v36, %v2544_v54 }
0x2770   :  { %v2542_v19 = vpop.permute.xlu0 %2541 }
0x2771   :  { %2553 = vrot.lane.b32.xlu1 %v2548_v38, %s7337_s26  ;;  %v2547_v46 = vmul.f32 %v7073_v48, %v2542_v19 }
0x2773   :  { %2551 = vrot.lane.b32.xlu0 %v2547_v46, %s7337_s26 }
0x27e3   :  { %v2554_v7 = vpop.permute.xlu1 %2553 }
0x27e4   :  { %v8115_v25 = vadd.f32 %v2554_v7, %v2538_v4 }
0x27e5   :  { %v2552_v27 = vpop.permute.xlu0 %2551 }
0x27e6   :  { %7074 = vtanh.f32 %v8115_v25  ;;  %v8119_v22 = vadd.f32 %v2552_v27, %v2537_v20  ;;  %v8161_v20 = vld [vmem:[%s9062_s8] ss:$0 sm:$0xff] }
0x27e7   :  { %v2930_v27 = vadd.f32 %v8161_v20, %v2929_v26  ;;  %v2940_v43 = vadd.f32 %v8161_v20, %v2939_v14  ;;  %v2935_v21 = vadd.f32 %v6586_v11, %v8161_v20 }
0x27e8   :  { %7076 = vtanh.f32 %v8119_v22 }
0x27e9   :  { %v3097_v59 = vmul.f32 %v8170_v50, %v2940_v43 }
0x27f3   :  { %v7075_v53 = vpop.eup %7074 }
0x27f4   :  { %2565 = vrot.lane.b32.xlu1 %v7075_v53, %s7336_s3  ;;  %v3095_v53 = vmul.f32 %v8170_v50, %v2930_v27 }
0x27f5   :  { %v7077_v47 = vpop.eup %7076 }
0x27f6   :  { %2563 = vrot.lane.b32.xlu0 %v7077_v47, %s7336_s3 }
0x2866   :  { %v2566_v55 = vpop.permute.xlu1 %2565 }
0x2867   :  { %v2570_v2 = vmul.f32 %v7071_v36, %v2566_v55  ;;  %v2950_v55 = vadd.f32 %v8161_v20, %v2949_v42 }
0x2868   :  { %v2564_v23 = vpop.permute.xlu0 %2563 }
0x2869   :  { %2575 = vrot.lane.b32.xlu1 %v2570_v2, %s7337_s26  ;;  %v2569_v5 = vmul.f32 %v7073_v48, %v2564_v23  ;;  %v6601_v48 = vpop.f32.mrf.mxu0  ;;  %v3096_v2 = vmul.f32 %v8170_v50, %v2935_v21  ;;  %v2945_v23 = vadd.f32 %v6589_v40, %v8161_v20 }
0x286b   :  { %2573 = vrot.lane.b32.xlu0 %v2569_v5, %s7337_s26  ;;  %v2979_v19 = vpop.f32.mrf.mxu0  ;;  %v3128_v5 = vsel %vm3127_vm3, %v3095_v53, 0.0 }
0x286d   :  { %v6604_v46 = vpop.f32.mrf.mxu0 }
0x286e   :  { %v2995_v14 = vadd.f32 %v6604_v46, %v8161_v20 }
0x286f   :  { %v2989_v4 = vpop.f32.mrf.mxu0 }
0x2871   :  { %v8156_v7 = vpop.f32.mrf.mxu0 }
0x28db   :  { %v2576_v37 = vpop.permute.xlu1 %2575 }
0x28dc   :  { %2580 = vst.msk [vmem:[#allocation2 + $0xe8] sm:$0xff] %vm440_vm2, %v2576_v37 }
0x28dd   :  { %v2574_v57 = vpop.permute.xlu0 %2573 }
0x28de   :  { %2579 = vst.msk [vmem:[#allocation2 + $0xe0] sm:$0xff] %vm440_vm2, %v2574_v57  ;;  %6573 = vmatprep.mubr.msk.f32.mxu1 %vm440_vm2, %v2574_v57  ;;  %v3099_v57 = vmul.f32 %v8170_v50, %v2950_v55 }
0x28df   :  { %6574 = vmatmul.mubr.msk.f32.vlgmr.msra.gmra.mxu1 %vm440_vm2, %v2576_v37 }
0x28e3   :  { %v2753_v0 = vld [vmem:[#allocation2 + $0xe8] sm:$0xff] }
0x28e5   :  { %v2752_v28 = vld [vmem:[#allocation2 + $0xe0] sm:$0xff] }
0x28e6   :  { %6626 = vmatprep.mubr.msk.f32.mxu0 %vm440_vm2, %v2752_v28  ;;  %v2960_v28 = vadd.f32 %v8161_v20, %v2959_v17 }
0x28e7   :  { %6627 = vmatmul.mubr.msk.f32.gmra.mxu0 %vm440_vm2, %v2753_v0  ;;  %v3134_v0 = vsel %vm3127_vm3, %v3097_v59, 0.0 }
0x299f   :  { %v6575_v30 = vpop.f32.mrf.mxu1 }
0x29a0   :  { %v2665_v61 = vadd.f32 %v6575_v30, %v7725_v45  ;;  %v3098_v30 = vmul.f32 %v8170_v50, %v2945_v23 }
0x29a1   :  { %v2655_v31 = vpop.f32.mrf.mxu1 }
0x29a2   :  { %7078 = vtanh.f32 %v2665_v61  ;;  %v2664_v8 = vadd.f32 %v2655_v31, %v7728_v49  ;;  %v6017_v35 = vmul.f32 -1.442695, %v2665_v61  ;;  %v2955_v61 = vadd.f32 %v6592_v58, %v8161_v20 }
0x29a3   :  { %v3131_v31 = vsel %vm3127_vm3, %v3096_v2, 0.0 }
0x29a4   :  { %7080 = vtanh.f32 %v2664_v8  ;;  %v6016_v13 = vmul.f32 -1.442695, %v2664_v8 }
0x29a5   :  { %7082 = vpow2.f32 %v6017_v35  ;;  %v3140_v35 = vsel %vm3127_vm3, %v3099_v57, 0.0 }
0x29a6   :  { %7084 = vpow2.f32 %v6016_v13  ;;  %v3100_v13 = vmul.f32 %v8170_v50, %v2955_v61 }
0x29af   :  { %v7079_v51 = vpop.eup %7078 }
0x29b0   :  { %2686 = vrot.lane.b32.xlu1 %v7079_v51, %s7336_s3  ;;  %v3101_v51 = vmul.f32 %v8170_v50, %v2960_v28 }
0x29b1   :  { %v7081_v10 = vpop.eup %7080 }
0x29b2   :  { %2684 = vrot.lane.b32.xlu0 %v7081_v10, %s7336_s3  ;;  %v7083_v16 = vpop.eup %7082  ;;  %v2970_v10 = vadd.f32 %v8161_v20, %v2969_v44  ;;  %v3005_v44 = vadd.f32 %v8156_v7, %v8161_v20 }
0x29b3   :  { %v7085_v33 = vpop.eup %7084  ;;  %v2673_v18 = vadd.f32 1.0, %v7083_v16  ;;  %v2965_v16 = vadd.f32 %v6595_v32, %v8161_v20 }
0x29b4   :  { %v2672_v60 = vadd.f32 1.0, %v7085_v33  ;;  %v3137_v33 = vsel %vm3127_vm3, %v3098_v30, 0.0  ;;  %v3110_v46 = vmul.f32 %v8170_v50, %v3005_v44 }
0x29b5   :  { %7086 = vrcp.f32 %v2673_v18 }
0x29b6   :  { %7088 = vrcp.f32 %v2672_v60  ;;  %v3103_v60 = vmul.f32 %v8170_v50, %v2970_v10  ;;  %v3173_v59 = vsel %vm3127_vm3, %v3110_v46, 0.0 }
0x29c2   :  { %v7087_v45 = vpop.eup %7086 }
0x29c3   :  { %v7089_v62 = vpop.eup %7088  ;;  %v2681_v3 = vmul.f32 %v7087_v45, %v8115_v25  ;;  %v2999_v25 = vpop.f32.mrf.mxu0 }
0x29c4   :  { %v2680_v9 = vmul.f32 %v7089_v62, %v8119_v22  ;;  %v3000_v11 = vadd.f32 %v8161_v20, %v2999_v25 }
0x29c5   :  { %v8164_v22 = vpop.f32.mrf.mxu0 }
0x29c6   :  { %v3109_v32 = vmul.f32 %v8170_v50, %v3000_v11 }
0x29c7   :  { %v3009_v47 = vpop.f32.mrf.mxu0 }
0x29c8   :  { %v3010_v17 = vadd.f32 %v8161_v20, %v3009_v47 }
0x29c9   :  { %v8179_v37 = vpop.f32.mrf.mxu0 }
0x29ca   :  { %v3025_v47 = vadd.f32 %v8179_v37, %v8161_v20 }
0x29cb   :  { %v3019_v8 = vpop.f32.mrf.mxu0 }
0x29cd   :  { %v6616_v18 = vpop.f32.mrf.mxu0 }
0x29ce   :  { %v3035_v57 = vadd.f32 %v6616_v18, %v8161_v20 }
0x2a22   :  { %v2687_v29 = vpop.permute.xlu1 %2686 }
0x2a23   :  { %v2691_v49 = vmul.f32 %v7087_v45, %v2687_v29  ;;  %v3146_v29 = vsel %vm3127_vm3, %v3101_v51, 0.0 }
0x2a24   :  { %v2685_v63 = vpop.permute.xlu0 %2684 }
0x2a25   :  { %2696 = vrot.lane.b32.xlu1 %v2691_v49, %s7337_s26  ;;  %v2690_v1 = vmul.f32 %v7089_v62, %v2685_v63  ;;  %v3102_v49 = vmul.f32 %v8170_v50, %v2965_v16  ;;  %v3143_v63 = vsel %vm3127_vm3, %v3100_v13, 0.0 }
0x2a27   :  { %2694 = vrot.lane.b32.xlu0 %v2690_v1, %s7337_s26  ;;  %v3029_v1 = vpop.f32.mrf.mxu0 }
0x2a28   :  { %v3030_v43 = vadd.f32 %v8161_v20, %v3029_v1 }
0x2a97   :  { %v2697_v6 = vpop.permute.xlu1 %2696 }
0x2a98   :  { %v2701_v41 = vadd.f32 %v2697_v6, %v2681_v3  ;;  %v2990_v6 = vadd.f32 %v8161_v20, %v2989_v4  ;;  %v3015_v4 = vadd.f32 %v8164_v22, %v8161_v20  ;;  %v3115_v22 = vmul.f32 %v8170_v50, %v3030_v43 }
0x2a99   :  { %v2695_v12 = vpop.permute.xlu0 %2694 }
0x2a9a   :  { %7090 = vtanh.f32 %v2701_v41  ;;  %v2700_v15 = vadd.f32 %v2695_v12, %v2680_v9  ;;  %v3152_v41 = vsel %vm3127_vm3, %v3103_v60, 0.0  ;;  %v2985_v12 = vadd.f32 %v6601_v48, %v8161_v20 }
0x2a9b   :  { %v3020_v48 = vadd.f32 %v8161_v20, %v3019_v8  ;;  %v3112_v53 = vmul.f32 %v8170_v50, %v3015_v4  ;;  %v3188_v61 = vsel %vm3127_vm3, %v3115_v22, 0.0  ;;  %v3116_v8 = vmul.f32 %v8170_v50, %v3035_v57 }
0x2a9c   :  { %7092 = vtanh.f32 %v2700_v15  ;;  %v3149_v15 = vsel %vm3127_vm3, %v3102_v49, 0.0  ;;  %v3106_v40 = vmul.f32 %v8170_v50, %v2985_v12 }
0x2a9d   :  { %v3113_v7 = vmul.f32 %v8170_v50, %v3020_v48  ;;  %v3179_v28 = vsel %vm3127_vm3, %v3112_v53, 0.0 }
0x2a9f   :  { %v3182_v23 = vsel %vm3127_vm3, %v3113_v7, 0.0 }
0x2aa7   :  { %v7091_v56 = vpop.eup %7090 }
0x2aa8   :  { %2708 = vrot.lane.b32.xlu1 %v7091_v56, %s7336_s3  ;;  %v6619_v56 = vpop.f32.mrf.mxu0 }
0x2aa9   :  { %v7093_v24 = vpop.eup %7092  ;;  %v3045_v51 = vadd.f32 %v6619_v56, %v8161_v20 }
0x2aaa   :  { %2706 = vrot.lane.b32.xlu0 %v7093_v24, %s7336_s3  ;;  %v3107_v24 = vmul.f32 %v8170_v50, %v2990_v6  ;;  %v3039_v42 = vpop.f32.mrf.mxu0 }
0x2aab   :  { %v3040_v2 = vadd.f32 %v8161_v20, %v3039_v42  ;;  %v3118_v18 = vmul.f32 %v8170_v50, %v3045_v51 }
0x2aad   :  { %v3117_v37 = vmul.f32 %v8170_v50, %v3040_v2 }
0x2aaf   :  { %v3194_v16 = vsel %vm3127_vm3, %v3117_v37, 0.0 }
0x2b1a   :  { %v2709_v52 = vpop.permute.xlu1 %2708 }
0x2b1b   :  { %v2713_v36 = vmul.f32 %v7087_v45, %v2709_v52  ;;  %v2980_v45 = vadd.f32 %v8161_v20, %v2979_v19  ;;  %v3108_v52 = vmul.f32 %v8170_v50, %v2995_v14  ;;  %v3170_v19 = vsel %vm3127_vm3, %v3109_v32, 0.0 }
0x2b1c   :  { %v2707_v54 = vpop.permute.xlu0 %2706 }
0x2b1d   :  { %2718 = vrot.lane.b32.xlu1 %v2713_v36, %s7337_s26  ;;  %v2712_v38 = vmul.f32 %v7089_v62, %v2707_v54  ;;  %v2975_v62 = vadd.f32 %v6598_v34, %v8161_v20  ;;  %v3105_v3 = vmul.f32 %v8170_v50, %v2980_v45  ;;  %v3164_v34 = vsel %vm3127_vm3, %v3107_v24, 0.0  ;;  %v6622_v54 = vpop.f32.mrf.mxu0 }
0x2b1e   :  { %v3161_v36 = vsel %vm3127_vm3, %v3106_v40, 0.0  ;;  %v3167_v25 = vsel %vm3127_vm3, %v3108_v52, 0.0  ;;  %v3055_v60 = vadd.f32 %v6622_v54, %v8161_v20  ;;  %v3191_v45 = vsel %vm3127_vm3, %v3116_v8, 0.0 }
0x2b1f   :  { %2716 = vrot.lane.b32.xlu0 %v2712_v38, %s7337_s26  ;;  %v3104_v9 = vmul.f32 %v8170_v50, %v2975_v62  ;;  %v3158_v26 = vsel %vm3127_vm3, %v3105_v3, 0.0  ;;  %v3111_v38 = vmul.f32 %v8170_v50, %v3010_v17  ;;  %v3049_v27 = vpop.f32.mrf.mxu0  ;;  %v3197_v3 = vsel %vm3127_vm3, %v3118_v18, 0.0 }
0x2b20   :  { %v3050_v30 = vadd.f32 %v8161_v20, %v3049_v27 }
0x2b21   :  { %v3155_v58 = vsel %vm3127_vm3, %v3104_v9, 0.0  ;;  %v3176_v21 = vsel %vm3127_vm3, %v3111_v38, 0.0  ;;  %v6625_v55 = vpop.f32.mrf.mxu0 }
0x2b22   :  { %v3065_v1 = vadd.f32 %v6625_v55, %v8161_v20 }
0x2b24   :  { %v3122_v9 = vmul.f32 %v8170_v50, %v3065_v1 }
0x2b26   :  { %v3209_v11 = vsel %vm3127_vm3, %v3122_v9, 0.0 }
0x2b3e   :  { %3129 = vadd.xlane.f32.xlu0 %v3128_v5  ;;  %v3114_v5 = vmul.f32 %v8170_v50, %v3025_v47 }
0x2b40   :  { %v3185_v10 = vsel %vm3127_vm3, %v3114_v5, 0.0 }
0x2b41   :  { %3135 = vadd.xlane.f32.xlu1 %v3134_v0  ;;  %v3059_v0 = vpop.f32.mrf.mxu0 }
0x2b42   :  { %3132 = vadd.xlane.f32.xlu0 %v3131_v31  ;;  %v3060_v13 = vadd.f32 %v8161_v20, %v3059_v0 }
0x2b43   :  { %v6628_v31 = vpop.f32.mrf.mxu0 }
0x2b44   :  { %v3075_v12 = vadd.f32 %v6628_v31, %v8161_v20 }
0x2b45   :  { %3141 = vadd.xlane.f32.xlu1 %v3140_v35  ;;  %v3119_v35 = vmul.f32 %v8170_v50, %v3050_v30 }
0x2b46   :  { %3138 = vadd.xlane.f32.xlu0 %v3137_v33  ;;  %v3069_v33 = vpop.f32.mrf.mxu0  ;;  %v3124_v24 = vmul.f32 %v8170_v50, %v3075_v12 }
0x2b47   :  { %v3070_v49 = vadd.f32 %v8161_v20, %v3069_v33  ;;  %v3200_v62 = vsel %vm3127_vm3, %v3119_v35, 0.0 }
0x2b49   :  { %3147 = vadd.xlane.f32.xlu1 %v3146_v29  ;;  %v3121_v29 = vmul.f32 %v8170_v50, %v3060_v13  ;;  %v3123_v6 = vmul.f32 %v8170_v50, %v3070_v49 }
0x2b4a   :  { %3144 = vadd.xlane.f32.xlu0 %v3143_v63  ;;  %v3120_v63 = vmul.f32 %v8170_v50, %v3055_v60 }
0x2b4b   :  { %v3212_v56 = vsel %vm3127_vm3, %v3123_v6, 0.0 }
0x2b4d   :  { %3153 = vadd.xlane.f32.xlu1 %v3152_v41  ;;  %v3206_v41 = vsel %vm3127_vm3, %v3121_v29, 0.0 }
0x2b4e   :  { %3150 = vadd.xlane.f32.xlu0 %v3149_v15  ;;  %v3203_v15 = vsel %vm3127_vm3, %v3120_v63, 0.0 }
0x2b51   :  { %3159 = vadd.xlane.f32.xlu1 %v3158_v26  ;;  %v3215_v26 = vsel %vm3127_vm3, %v3124_v24, 0.0 }
0x2b52   :  { %3156 = vadd.xlane.f32.xlu0 %v3155_v58 }
0x2b55   :  { %3165 = vadd.xlane.f32.xlu1 %v3164_v34 }
0x2b56   :  { %3162 = vadd.xlane.f32.xlu0 %v3161_v36 }
0x2b59   :  { %3171 = vadd.xlane.f32.xlu1 %v3170_v19 }
0x2b5a   :  { %3168 = vadd.xlane.f32.xlu0 %v3167_v25  ;;  %v7338_v25 = vmov 0  }
0x2b5b   :  { %6836 = vset.pattern.permute.xlu1 %v7338_v25  ;;  %6837 = vset.pattern.permute.xlu0 %v7338_v25 }
0x2b5d   :  { %3177 = vadd.xlane.f32.xlu1 %v3176_v21 }
0x2b5e   :  { %3174 = vadd.xlane.f32.xlu0 %v3173_v59 }
0x2b61   :  { %3183 = vadd.xlane.f32.xlu1 %v3182_v23 }
0x2b62   :  { %3180 = vadd.xlane.f32.xlu0 %v3179_v28  ;;  %v8281_v28 = vld [vmem:[#allocation3] ss:$0 sm:$0xff] }
0x2b65   :  { %3189 = vadd.xlane.f32.xlu1 %v3188_v61 }
0x2b66   :  { %3186 = vadd.xlane.f32.xlu0 %v3185_v10 }
0x2b69   :  { %3195 = vadd.xlane.f32.xlu1 %v3194_v16 }
0x2b6a   :  { %3192 = vadd.xlane.f32.xlu0 %v3191_v45 }
0x2b6d   :  { %3201 = vadd.xlane.f32.xlu1 %v3200_v62 }
0x2b6e   :  { %3198 = vadd.xlane.f32.xlu0 %v3197_v3 }
0x2b71   :  { %3207 = vadd.xlane.f32.xlu1 %v3206_v41 }
0x2b72   :  { %3204 = vadd.xlane.f32.xlu0 %v3203_v15 }
0x2b75   :  { %3213 = vadd.xlane.f32.xlu1 %v3212_v56 }
0x2b76   :  { %3210 = vadd.xlane.f32.xlu0 %v3209_v11 }
0x2b7a   :  { %3216 = vadd.xlane.f32.xlu0 %v3215_v26 }
0x2b8f   :  { %v2719_v40 = vpop.permute.xlu1 %2718 }
0x2b90   :  { %2723 = vst.msk [vmem:[#allocation2 + $0xf8] sm:$0xff] %vm440_vm2, %v2719_v40 }
0x2b91   :  { %v2717_v14 = vpop.permute.xlu0 %2716 }
0x2b92   :  { %2722 = vst.msk [vmem:[#allocation2 + $0xf0] sm:$0xff] %vm440_vm2, %v2717_v14 }
0x2b97   :  { %v8271_v42 = vld [vmem:[#allocation2 + $0xf8] sm:$0xff] }
0x2b99   :  { %v8267_v58 = vld [vmem:[#allocation2 + $0xf0] sm:$0xff] }
0x2b9a   :  { %6629 = vmatprep.mubr.msk.f32.mxu0 %vm440_vm2, %v8267_v58 }
0x2b9b   :  { %6630 = vmatmul.mubr.msk.f32.gmra.mxu0 %vm440_vm2, %v8271_v42 }
0x2b9c   :  { %6728 = vmatprep.mubr.msk.f32.mxu0 %vm7339_vm4, %v7335_v39 }
0x2bc7   :  { %v3130_v48 = vpop.xlane.xlu0 %3129 }
0x2bc8   :  { %v8317_v1 = vadd.f32 %v8281_v28, %v3130_v48 }
0x2bca   :  { %v3136_v27 = vpop.xlane.xlu1 %3135 }
0x2bcb   :  { %v3133_v19 = vpop.xlane.xlu0 %3132  ;;  %v8310_v29 = vadd.f32 %v8281_v28, %v3136_v27 }
0x2bcc   :  { %v8287_v30 = vadd.f32 %v8281_v28, %v3133_v19 }
0x2bcd   :  { %v3263_v12 = vmax.f32 %v8317_v1, %v8310_v29 }
0x2bce   :  { %v3142_v43 = vpop.xlane.xlu1 %3141 }
0x2bcf   :  { %v3139_v46 = vpop.xlane.xlu0 %3138  ;;  %v8320_v3 = vadd.f32 %v8281_v28, %v3142_v43 }
0x2bd0   :  { %v8284_v37 = vadd.f32 %v8281_v28, %v3139_v46 }
0x2bd1   :  { %v3265_v11 = vmax.f32 %v3263_v12, %v8320_v3 }
0x2bd2   :  { %v3264_v8 = vmax.f32 %v8287_v30, %v8284_v37 }
0x2bd3   :  { %v3145_v4 = vpop.xlane.xlu0 %3144 }
0x2bd4   :  { %v8290_v61 = vadd.f32 %v8281_v28, %v3145_v4 }
0x2bd6   :  { %v3266_v35 = vmax.f32 %v3264_v8, %v8290_v61 }
0x2bd7   :  { %v3151_v7 = vpop.xlane.xlu0 %3150 }
0x2bd8   :  { %v8295_v51 = vadd.f32 %v8281_v28, %v3151_v7 }
0x2bda   :  { %v3268_v16 = vmax.f32 %v3266_v35, %v8295_v51 }
0x2bdb   :  { %v3157_v21 = vpop.xlane.xlu0 %3156 }
0x2bdc   :  { %v8299_v13 = vadd.f32 %v8281_v28, %v3157_v21 }
0x2bde   :  { %v3270_v60 = vmax.f32 %v3268_v16, %v8299_v13 }
0x2bdf   :  { %v3163_v53 = vpop.xlane.xlu0 %3162 }
0x2be0   :  { %v8303_v33 = vadd.f32 %v8281_v28, %v3163_v53 }
0x2be2   :  { %v3272_v62 = vmax.f32 %v3270_v60, %v8303_v33 }
0x2be3   :  { %v3169_v47 = vpop.xlane.xlu0 %3168 }
0x2be4   :  { %v8307_v45 = vadd.f32 %v8281_v28, %v3169_v47 }
0x2be6   :  { %v3274_v6 = vmax.f32 %v3272_v62, %v8307_v45 }
0x2be7   :  { %v3175_v55 = vpop.xlane.xlu0 %3174 }
0x2be8   :  { %v8314_v63 = vadd.f32 %v8281_v28, %v3175_v55 }
0x2bea   :  { %v3276_v56 = vmax.f32 %v3274_v6, %v8314_v63 }
0x2beb   :  { %v3181_v2 = vpop.xlane.xlu0 %3180 }
0x2bec   :  { %v8324_v41 = vadd.f32 %v8281_v28, %v3181_v2 }
0x2bee   :  { %v3278_v14 = vmax.f32 %v3276_v56, %v8324_v41 }
0x2bef   :  { %v3187_v5 = vpop.xlane.xlu0 %3186 }
0x2bf0   :  { %v8333_v24 = vadd.f32 %v8281_v28, %v3187_v5 }
0x2bf3   :  { %v3193_v0 = vpop.xlane.xlu0 %3192 }
0x2bf7   :  { %v3199_v10 = vpop.xlane.xlu0 %3198 }
0x2bfb   :  { %v3205_v49 = vpop.xlane.xlu0 %3204 }
0x2bfc   :  { %v8357_v19 = vadd.f32 %v8281_v28, %v3205_v49 }
0x2bff   :  { %v3211_v40 = vpop.xlane.xlu0 %3210 }
0x2c00   :  { %v8365_v7 = vadd.f32 %v8281_v28, %v3211_v40 }
0x2c03   :  { %v3217_v25 = vpop.xlane.xlu0 %3216 }
0x2c5b   :  { %v6631_v32 = vpop.f32.mrf.mxu0 }
0x2c5c   :  { %v3085_v17 = vadd.f32 %v6631_v32, %v8161_v20  ;;  %v8341_v32 = vadd.f32 %v8281_v28, %v3193_v0 }
0x2c5d   :  { %v3079_v34 = vpop.f32.mrf.mxu0 }
0x2c5e   :  { %v3126_v52 = vmul.f32 %v8170_v50, %v3085_v17  ;;  %v3080_v44 = vadd.f32 %v8161_v20, %v3079_v34  ;;  %v3148_v20 = vpop.xlane.xlu1 %3147 }
0x2c5f   :  { %v8329_v15 = vadd.f32 %v8281_v28, %v3148_v20 }
0x2c60   :  { %v3125_v36 = vmul.f32 %v8170_v50, %v3080_v44  ;;  %v3221_v54 = vsel %vm3127_vm3, %v3126_v52, 0.0  ;;  %v3280_v52 = vmax.f32 %v3278_v14, %v8333_v24 }
0x2c61   :  { %3222 = vadd.xlane.f32.xlu0 %v3221_v54  ;;  %v3267_v17 = vmax.f32 %v3265_v11, %v8329_v15 }
0x2c62   :  { %v3218_v38 = vsel %vm3127_vm3, %v3125_v36, 0.0  ;;  %v3154_v50 = vpop.xlane.xlu1 %3153  ;;  %v8349_v36 = vadd.f32 %v8281_v28, %v3199_v10  ;;  %v3282_v48 = vmax.f32 %v3280_v52, %v8341_v32 }
0x2c63   :  { %3219 = vadd.xlane.f32.xlu1 %v3218_v38  ;;  %v8337_v26 = vadd.f32 %v8281_v28, %v3154_v50  ;;  %v8373_v50 = vadd.f32 %v8281_v28, %v3217_v25 }
0x2c64   :  { %v3284_v27 = vmax.f32 %v3282_v48, %v8349_v36 }
0x2c65   :  { %v3269_v54 = vmax.f32 %v3267_v17, %v8337_v26 }
0x2c66   :  { %v3160_v59 = vpop.xlane.xlu1 %3159  ;;  %v3286_v53 = vmax.f32 %v3284_v27, %v8357_v19 }
0x2c67   :  { %v8345_v34 = vadd.f32 %v8281_v28, %v3160_v59 }
0x2c68   :  { %v3288_v55 = vmax.f32 %v3286_v53, %v8365_v7 }
0x2c69   :  { %v3271_v46 = vmax.f32 %v3269_v54, %v8345_v34 }
0x2c6a   :  { %v3166_v22 = vpop.xlane.xlu1 %3165  ;;  %v3290_v5 = vmax.f32 %v3288_v55, %v8373_v50 }
0x2c6b   :  { %v8353_v38 = vadd.f32 %v8281_v28, %v3166_v22 }
0x2c6d   :  { %v3273_v43 = vmax.f32 %v3271_v46, %v8353_v38 }
0x2c6e   :  { %v3172_v23 = vpop.xlane.xlu1 %3171 }
0x2c6f   :  { %v8361_v4 = vadd.f32 %v8281_v28, %v3172_v23 }
0x2c71   :  { %v3275_v47 = vmax.f32 %v3273_v43, %v8361_v4 }
0x2c72   :  { %v3178_v57 = vpop.xlane.xlu1 %3177 }
0x2c73   :  { %v8369_v21 = vadd.f32 %v8281_v28, %v3178_v57 }
0x2c75   :  { %v3277_v22 = vmax.f32 %v3275_v47, %v8369_v21 }
0x2c76   :  { %v3184_v31 = vpop.xlane.xlu1 %3183 }
0x2c77   :  { %v8377_v59 = vadd.f32 %v8281_v28, %v3184_v31 }
0x2c79   :  { %v3279_v0 = vmax.f32 %v3277_v22, %v8377_v59 }
0x2c7a   :  { %v3190_v18 = vpop.xlane.xlu1 %3189 }
0x2c7b   :  { %v8382_v2 = vadd.f32 %v8281_v28, %v3190_v18 }
0x2c7d   :  { %v3281_v35 = vmax.f32 %v3279_v0, %v8382_v2 }
0x2c7e   :  { %v3196_v9 = vpop.xlane.xlu1 %3195 }
0x2c7f   :  { %v8390_v8 = vadd.f32 %v8281_v28, %v3196_v9 }
0x2c81   :  { %v3283_v49 = vmax.f32 %v3281_v35, %v8390_v8 }
0x2c82   :  { %v3202_v44 = vpop.xlane.xlu1 %3201 }
0x2c83   :  { %v8397_v16 = vadd.f32 %v8281_v28, %v3202_v44 }
0x2c85   :  { %v3285_v12 = vmax.f32 %v3283_v49, %v8397_v16 }
0x2c86   :  { %v3208_v20 = vpop.xlane.xlu1 %3207 }
0x2c87   :  { %v8405_v62 = vadd.f32 %v8281_v28, %v3208_v20 }
0x2c89   :  { %v3287_v40 = vmax.f32 %v3285_v12, %v8405_v62 }
0x2c8a   :  { %v3214_v31 = vpop.xlane.xlu1 %3213 }
0x2c8b   :  { %v8409_v56 = vadd.f32 %v8281_v28, %v3214_v31 }
0x2c8d   :  { %v3289_v14 = vmax.f32 %v3287_v40, %v8409_v56 }
0x2cea   :  { %v3223_v23 = vpop.xlane.xlu0 %3222 }
0x2ceb   :  { %v8386_v57 = vadd.f32 %v8281_v28, %v3223_v23 }
0x2cec   :  { %v3220_v9 = vpop.xlane.xlu1 %3219 }
0x2ced   :  { %v8393_v10 = vmax.f32 %v3290_v5, %v8386_v57 }
0x2cef   :  { %v3294_v18 = vsub.f32 %v8287_v30, %v8393_v10  ;;  %v3318_v60 = vsub.f32 %v8284_v37, %v8393_v10  ;;  %v3342_v30 = vsub.f32 %v8290_v61, %v8393_v10  ;;  %v8415_v37 = vadd.f32 %v8281_v28, %v3220_v9 }
0x2cf0   :  { %v3654_v17 = vsub.f32 %v8386_v57, %v8393_v10  ;;  %v3366_v44 = vsub.f32 %v8295_v51, %v8393_v10  ;;  %v3390_v61 = vsub.f32 %v8299_v13, %v8393_v10  ;;  %v3414_v25 = vsub.f32 %v8303_v33, %v8393_v10 }
0x2cf1   :  { %v3297_v6 = vmul.f32 1.442695, %v3294_v18  ;;  %v3321_v11 = vmul.f32 1.442695, %v3318_v60  ;;  %v3345_v52 = vmul.f32 1.442695, %v3342_v30  ;;  %v8423_v54 = vmax.f32 %v3289_v14, %v8415_v37 }
0x2cf2   :  { %v3369_v48 = vmul.f32 1.442695, %v3366_v44  ;;  %v3393_v27 = vmul.f32 1.442695, %v3390_v61  ;;  %v3417_v47 = vmul.f32 1.442695, %v3414_v25  ;;  %v3486_v49 = vsub.f32 %v8324_v41, %v8393_v10 }
0x2cf3   :  { %7094 = vpow2.f32 %v3297_v6  ;;  %v3293_v28 = vsub.f32 %v8317_v1, %v8423_v54  ;;  %v3317_v46 = vsub.f32 %v8310_v29, %v8423_v54  ;;  %v3341_v51 = vsub.f32 %v8320_v3, %v8423_v54 }
0x2cf4   :  { %7096 = vpow2.f32 %v3321_v11  ;;  %v3365_v13 = vsub.f32 %v8329_v15, %v8423_v54  ;;  %v3413_v1 = vsub.f32 %v8345_v34, %v8423_v54  ;;  %v3389_v33 = vsub.f32 %v8337_v26, %v8423_v54 }
0x2cf5   :  { %7098 = vpow2.f32 %v3345_v52  ;;  %v3295_v43 = vmul.f32 1.442695, %v3293_v28  ;;  %v3319_v53 = vmul.f32 1.442695, %v3317_v46  ;;  %v3343_v29 = vmul.f32 1.442695, %v3341_v51 }
0x2cf6   :  { %7100 = vpow2.f32 %v3369_v48  ;;  %v3438_v3 = vsub.f32 %v8307_v45, %v8393_v10  ;;  %v3367_v55 = vmul.f32 1.442695, %v3365_v13  ;;  %v3415_v15 = vmul.f32 1.442695, %v3413_v1 }
0x2cf7   :  { %7102 = vpow2.f32 %v3393_v27  ;;  %v3437_v23 = vsub.f32 %v8353_v38, %v8423_v54  ;;  %v3391_v34 = vmul.f32 1.442695, %v3389_v33  ;;  %v3462_v26 = vsub.f32 %v8314_v63, %v8393_v10 }
0x2cf8   :  { %7104 = vpow2.f32 %v3295_v43  ;;  %v3441_v0 = vmul.f32 1.442695, %v3438_v3  ;;  %v3461_v35 = vsub.f32 %v8361_v4, %v8423_v54  ;;  %v3485_v38 = vsub.f32 %v8369_v21, %v8423_v54 }
0x2cf9   :  { %7106 = vpow2.f32 %v3319_v53  ;;  %v3439_v45 = vmul.f32 1.442695, %v3437_v23  ;;  %v3465_v60 = vmul.f32 1.442695, %v3462_v26  ;;  %v3509_v9 = vsub.f32 %v8377_v59, %v8423_v54 }
0x2cfa   :  { %7108 = vpow2.f32 %v3417_v47  ;;  %v3463_v63 = vmul.f32 1.442695, %v3461_v35  ;;  %v3487_v12 = vmul.f32 1.442695, %v3485_v38  ;;  %v3533_v4 = vsub.f32 %v8382_v2, %v8423_v54 }
0x2cfb   :  { %7110 = vpow2.f32 %v3343_v29  ;;  %v3489_v21 = vmul.f32 1.442695, %v3486_v49  ;;  %v3510_v40 = vsub.f32 %v8333_v24, %v8393_v10  ;;  %v3511_v41 = vmul.f32 1.442695, %v3509_v9 }
0x2cfc   :  { %7112 = vpow2.f32 %v3367_v55  ;;  %v3557_v52 = vsub.f32 %v8390_v8, %v8423_v54  ;;  %v3535_v2 = vmul.f32 1.442695, %v3533_v4  ;;  %v3581_v48 = vsub.f32 %v8397_v16, %v8423_v54 }
0x2cfd   :  { %7114 = vpow2.f32 %v3415_v15  ;;  %v3513_v46 = vmul.f32 1.442695, %v3510_v40  ;;  %v3605_v51 = vsub.f32 %v8405_v62, %v8423_v54  ;;  %v3534_v13 = vsub.f32 %v8341_v32, %v8393_v10 }
0x2cfe   :  { %7116 = vpow2.f32 %v3391_v34  ;;  %v3559_v27 = vmul.f32 1.442695, %v3557_v52  ;;  %v3629_v53 = vsub.f32 %v8409_v56, %v8423_v54  ;;  %v3558_v55 = vsub.f32 %v8349_v36, %v8393_v10 }
0x2cff   :  { %7118 = vpow2.f32 %v3441_v0  ;;  %v3607_v33 = vmul.f32 1.442695, %v3605_v51  ;;  %v3537_v32 = vmul.f32 1.442695, %v3534_v13  ;;  %v3653_v56 = vsub.f32 %v8415_v37, %v8423_v54 }
0x2d00   :  { %v7095_v20 = vpop.eup %7094  ;;  %7120 = vpow2.f32 %v3439_v45  ;;  %v3631_v15 = vmul.f32 1.442695, %v3629_v53  ;;  %v3561_v26 = vmul.f32 1.442695, %v3558_v55  ;;  %v3606_v49 = vsub.f32 %v8365_v7, %v8393_v10  ;;  %v3691_v53 = vld [vmem:[%s9087_s15 + $0x10] sm:$0xff] }
0x2d01   :  { %3310 = vperm.xlu1 %6836, %v7095_v20   ;;  %v7097_v22 = vpop.eup %7096  ;;  %7122 = vpow2.f32 %v3465_v60  ;;  %v3655_v45 = vmul.f32 1.442695, %v3653_v56 }
0x2d02   :  { %v3324_v5 = vadd.f32 %v7097_v22, %v7095_v20  ;;  %v7099_v31 = vpop.eup %7098  ;;  %7124 = vpow2.f32 %v3463_v63  ;;  %v3583_v20 = vmul.f32 1.442695, %v3581_v48 }
0x2d03   :  { %v7101_v6 = vpop.eup %7100  ;;  %7126 = vpow2.f32 %v3487_v12 }
0x2d04   :  { %v3348_v18 = vadd.f32 %v7099_v31, %v3324_v5  ;;  %v7103_v11 = vpop.eup %7102  ;;  %7128 = vpow2.f32 %v3489_v21 }
0x2d05   :  { %3334 = vperm.xlu1 %6836, %v7097_v22   ;;  %v8459_v14 = vpop.eup %7104  ;;  %7130 = vpow2.f32 %v3511_v41 }
0x2d06   :  { %v3372_v30 = vadd.f32 %v7101_v6, %v3348_v18  ;;  %v7107_v59 = vpop.eup %7106  ;;  %7132 = vpow2.f32 %v3535_v2 }
0x2d07   :  { %v7109_v44 = vpop.eup %7108  ;;  %v3323_v61 = vadd.f32 %v7107_v59, %v8459_v14  ;;  %3329 = vperm.xlu0 %6837, %v7107_v59   ;;  %7134 = vpow2.f32 %v3513_v46 }
0x2d08   :  { %v8466_v28 = vpop.eup %7110  ;;  %v3396_v24 = vadd.f32 %v7103_v11, %v3372_v30  ;;  %7136 = vpow2.f32 %v3559_v27  ;;  %v3630_v30 = vsub.f32 %v8373_v50, %v8393_v10  ;;  %v3657_v50 = vmul.f32 1.442695, %v3654_v17 }
0x2d09   :  { %3358 = vperm.xlu1 %6836, %v7099_v31   ;;  %v8468_v25 = vpop.eup %7112  ;;  %v3347_v8 = vadd.f32 %v8466_v28, %v3323_v61  ;;  %7138 = vpow2.f32 %v3583_v20  ;;  %v3582_v31 = vsub.f32 %v8357_v19, %v8393_v10 }
0x2d0a   :  { %v7115_v43 = vpop.eup %7114  ;;  %v3420_v47 = vadd.f32 %v7109_v44, %v3396_v24  ;;  %7140 = vpow2.f32 %v3607_v33  ;;  %v3633_v59 = vmul.f32 1.442695, %v3630_v30  ;;  %v8520_v33 = vld [vmem:[%s9059_s5 + $0x10] sm:$0xff] }
0x2d0b   :  { %v3371_v16 = vadd.f32 %v8468_v25, %v3347_v8  ;;  %3425 = vperm.xlu0 %6837, %v7115_v43   ;;  %v8478_v1 = vpop.eup %7116  ;;  %7142 = vpow2.f32 %v3537_v32  ;;  %v3585_v60 = vmul.f32 1.442695, %v3582_v31  ;;  %v8534_v32 = vld [vmem:[%s9059_s5] sm:$0xff] }
0x2d0c   :  { %v7119_v29 = vpop.eup %7118  ;;  %7144 = vpow2.f32 %v3631_v15 }
0x2d0d   :  { %3382 = vperm.xlu1 %6836, %v7101_v6   ;;  %v3395_v62 = vadd.f32 %v8478_v1, %v3371_v16  ;;  %v7121_v3 = vpop.eup %7120  ;;  %v3444_v23 = vadd.f32 %v7119_v29, %v3420_v47  ;;  %7146 = vpow2.f32 %v3561_v26  ;;  %v3689_v47 = vld [vmem:[%s9087_s15] sm:$0xff] }
0x2d0e   :  { %v7123_v34 = vpop.eup %7122  ;;  %7148 = vpow2.f32 %v3655_v45 }
0x2d0f   :  { %v3419_v22 = vadd.f32 %v7115_v43, %v3395_v62  ;;  %3449 = vperm.xlu0 %6837, %v7121_v3   ;;  %v7125_v0 = vpop.eup %7124  ;;  %v3468_v38 = vadd.f32 %v7123_v34, %v3444_v23  ;;  %7150 = vpow2.f32 %v3585_v60 }
0x2d10   :  { %v7127_v35 = vpop.eup %7126 }
0x2d11   :  { %3406 = vperm.xlu1 %6836, %v7103_v11   ;;  %v3443_v5 = vadd.f32 %v7121_v3, %v3419_v22  ;;  %v7129_v18 = vpop.eup %7128  ;;  %v3609_v11 = vmul.f32 1.442695, %v3606_v49  ;;  %v8527_v3 = vld [vmem:[%s9059_s5 + $0x8] sm:$0xff]  ;;  %v3301_v49 = vld [vmem:[#allocation2] sm:$0xff] }
0x2d12   :  { %v7131_v54 = vpop.eup %7130  ;;  %v3492_v63 = vadd.f32 %v7129_v18, %v3468_v38 }
0x2d13   :  { %v3467_v36 = vadd.f32 %v7125_v0, %v3443_v5  ;;  %3473 = vperm.xlu0 %6837, %v7125_v0   ;;  %v7133_v19 = vpop.eup %7132  ;;  %7152 = vpow2.f32 %v3609_v11 }
0x2d14   :  { %v7135_v9 = vpop.eup %7134  ;;  %7154 = vpow2.f32 %v3633_v59 }
0x2d15   :  { %3430 = vperm.xlu1 %6836, %v7109_v44   ;;  %v3491_v37 = vadd.f32 %v7127_v35, %v3467_v36  ;;  %v7137_v4 = vpop.eup %7136  ;;  %v3516_v41 = vadd.f32 %v7135_v9, %v3492_v63  ;;  %7156 = vpow2.f32 %v3657_v50  ;;  %v3325_v63 = vld [vmem:[#allocation2 + $0x10] sm:$0xff] }
0x2d16   :  { %v7139_v40 = vpop.eup %7138 }
0x2d17   :  { %v3515_v6 = vadd.f32 %v7131_v54, %v3491_v37  ;;  %3497 = vperm.xlu0 %6837, %v7127_v35   ;;  %v7141_v52 = vpop.eup %7140 }
0x2d18   :  { %v7143_v44 = vpop.eup %7142 }
0x2d19   :  { %3454 = vperm.xlu1 %6836, %v7119_v29   ;;  %v3539_v12 = vadd.f32 %v7133_v19, %v3515_v6  ;;  %v7145_v2 = vpop.eup %7144  ;;  %v3540_v48 = vadd.f32 %v7143_v44, %v3516_v41  ;;  %v8513_v29 = vld [vmem:[%s9059_s5 + $0x18] sm:$0xff] }
0x2d1a   :  { %v7147_v46 = vpop.eup %7146  ;;  %6721 = vmatpush3.msra.mxu0 %v8513_v29 }
0x2d1b   :  { %v3563_v21 = vadd.f32 %v7137_v4, %v3539_v12  ;;  %3521 = vperm.xlu0 %6837, %v7131_v54   ;;  %v7149_v8 = vpop.eup %7148  ;;  %v3564_v27 = vadd.f32 %v7147_v46, %v3540_v48  ;;  %6722 = vmatprep.subr.mxu0 %v7335_v39  ;;  %v3349_v12 = vld [vmem:[#allocation2 + $0x20] sm:$0xff]  ;;  %v3374_v48 = vld [vmem:[#allocation2 + $0x38] sm:$0xff] }
0x2d1c   :  { %6723 = vmatpush3.msra.mxu0 %v8520_v33 }
0x2d1d   :  { %3478 = vperm.xlu1 %6836, %v7123_v34   ;;  %v3587_v7 = vadd.f32 %v7139_v40, %v3563_v21  ;;  %6724 = vmatprep.subr.mxu0 %v7335_v39  ;;  %v3302_v21 = vld [vmem:[#allocation2 + $0x8] sm:$0xff] }
0x2d1e   :  { %6725 = vmatpush3.msra.mxu0 %v8527_v3 }
0x2d1f   :  { %v3611_v61 = vadd.f32 %v7141_v52, %v3587_v7  ;;  %3545 = vperm.xlu0 %6837, %v7133_v19   ;;  %6726 = vmatprep.subr.mxu0 %v7335_v39  ;;  %v3373_v7 = vld [vmem:[#allocation2 + $0x30] sm:$0xff] }
0x2d20   :  { %6727 = vmatpush3.msra.mxu0 %v8534_v32 }
0x2d21   :  { %3502 = vperm.xlu1 %6836, %v7129_v18   ;;  %v3635_v24 = vadd.f32 %v7145_v2, %v3611_v61  ;;  %6742 = vmatprep.subr.mxu0 %v7335_v39 }
0x2d23   :  { %3569 = vperm.xlu0 %6837, %v7137_v4   ;;  %v3659_v51 = vadd.f32 %v7149_v8, %v3635_v24 }
0x2d25   :  { %3526 = vperm.xlu1 %6836, %v7135_v9   ;;  %7158 = vrcp.f32 %v3659_v51  ;;  %v3326_v9 = vld [vmem:[#allocation2 + $0x18] sm:$0xff] }
0x2d27   :  { %3593 = vperm.xlu0 %6837, %v7139_v40   ;;  %v3350_v40 = vld [vmem:[#allocation2 + $0x28] sm:$0xff] }
0x2d29   :  { %3305 = vperm.xlu1 %6836, %v8459_v14   ;;  %v7151_v14 = vpop.eup %7150 }
0x2d2a   :  { %v3588_v43 = vadd.f32 %v7151_v14, %v3564_v27  ;;  %v7153_v13 = vpop.eup %7152  ;;  %v3397_v27 = vld [vmem:[#allocation2 + $0x40] sm:$0xff] }
0x2d2b   :  { %3617 = vperm.xlu0 %6837, %v7141_v52   ;;  %v7155_v10 = vpop.eup %7154 }
0x2d2c   :  { %v3612_v57 = vadd.f32 %v7153_v13, %v3588_v43 }
0x2d2d   :  { %3353 = vperm.xlu1 %6836, %v8466_v28   ;;  %v7157_v28 = vpop.eup %7156 }
0x2d2e   :  { %v3636_v17 = vadd.f32 %v7155_v10, %v3612_v57 }
0x2d2f   :  { %3641 = vperm.xlu0 %6837, %v7145_v2  }
0x2d30   :  { %v3660_v16 = vadd.f32 %v7157_v28, %v3636_v17  ;;  %v3422_v17 = vld [vmem:[#allocation2 + $0x58] sm:$0xff] }
0x2d31   :  { %3377 = vperm.xlu1 %6836, %v8468_v25   ;;  %v3692_v25 = vld [vmem:[%s9087_s15 + $0x18] sm:$0xff] }
0x2d32   :  { %v7159_v20 = vpop.eup %7158  ;;  %7160 = vrcp.f32 %v3660_v16  ;;  %6632 = vmatprep.subr.mxu1 %v3692_v25 }
0x2d33   :  { %3663 = vperm.xlu0 %6837, %v7149_v8   ;;  %6633 = vmatpush3.msra.mxu1 %v3692_v25  ;;  %v3398_v8 = vld [vmem:[#allocation2 + $0x48] sm:$0xff] }
0x2d34   :  { %6634 = vmatprep.subr.mxu1 %v3691_v53 }
0x2d35   :  { %3401 = vperm.xlu1 %6836, %v8478_v1   ;;  %v3690_v1 = vld [vmem:[%s9087_s15 + $0x8] sm:$0xff]  ;;  %6635 = vmatpush3.msra.mxu1 %v3691_v53 }
0x2d36   :  { %6636 = vmatprep.subr.mxu1 %v3690_v1 }
0x2d37   :  { %3679 = vperm.xlu0 %6837, %v7159_v20   ;;  %6637 = vmatpush3.msra.mxu1 %v3690_v1  ;;  %v3445_v1 = vld [vmem:[#allocation2 + $0x60] sm:$0xff] }
0x2d38   :  { %6638 = vmatprep.subr.mxu1 %v3689_v47 }
0x2d39   :  { %3550 = vperm.xlu1 %6836, %v7143_v44   ;;  %6639 = vmatpush3.msra.mxu1 %v3689_v47  ;;  %v3446_v47 = vld [vmem:[#allocation2 + $0x68] sm:$0xff] }
0x2d3a   :  { %6643 = vmatprep.subr.mxu1 %v7335_v39 }
0x2d3d   :  { %3574 = vperm.xlu1 %6836, %v7147_v46  }
0x2d3f   :  { %v7161_v62 = vpop.eup %7160 }
0x2d41   :  { %3598 = vperm.xlu1 %6836, %v7151_v14  }
0x2d45   :  { %3622 = vperm.xlu1 %6836, %v7153_v13  }
0x2d49   :  { %3646 = vperm.xlu1 %6836, %v7155_v10   ;;  %v3421_v10 = vld [vmem:[#allocation2 + $0x50] sm:$0xff] }
0x2d4d   :  { %3668 = vperm.xlu1 %6836, %v7157_v28  }
0x2d51   :  { %3684 = vperm.xlu1 %6836, %v7161_v62  }
0x2d7c   :  { %v3311_v55 = vpop.permute.xlu1 %3310 }
0x2d7d   :  { %v3314_v59 = vmul.f32 %v3311_v55, %v3302_v21  ;;  %v3517_v21 = vld [vmem:[#allocation2 + $0x90] sm:$0xff] }
0x2d80   :  { %v3335_v22 = vpop.permute.xlu1 %3334 }
0x2d81   :  { %v3338_v11 = vmul.f32 %v3335_v22, %v3326_v9  ;;  %v3494_v9 = vld [vmem:[#allocation2 + $0x88] sm:$0xff] }
0x2d82   :  { %v3330_v34 = vpop.permute.xlu0 %3329 }
0x2d83   :  { %v3337_v4 = vmul.f32 %v3330_v34, %v3325_v63  ;;  %v3340_v24 = vadd.f32 %v3338_v11, %v3314_v59  ;;  %v3469_v34 = vld [vmem:[#allocation2 + $0x70] sm:$0xff]  ;;  %v3493_v63 = vld [vmem:[#allocation2 + $0x80] sm:$0xff] }
0x2d84   :  { %v3359_v15 = vpop.permute.xlu1 %3358  ;;  %v3541_v59 = vld [vmem:[#allocation2 + $0xa0] sm:$0xff] }
0x2d85   :  { %v3362_v44 = vmul.f32 %v3359_v15, %v3350_v40  ;;  %v3518_v40 = vld [vmem:[#allocation2 + $0x98] sm:$0xff] }
0x2d86   :  { %v3426_v0 = vpop.permute.xlu0 %3425 }
0x2d87   :  { %v3364_v14 = vadd.f32 %v3362_v44, %v3340_v24  ;;  %v3433_v16 = vmul.f32 %v3426_v0, %v3421_v10  ;;  %v3565_v24 = vld [vmem:[#allocation2 + $0xb0] sm:$0xff] }
0x2d88   :  { %v3383_v56 = vpop.permute.xlu1 %3382  ;;  %v3613_v10 = vld [vmem:[#allocation2 + $0xd0] sm:$0xff] }
0x2d89   :  { %v3386_v50 = vmul.f32 %v3383_v56, %v3374_v48 }
0x2d8a   :  { %v3450_v31 = vpop.permute.xlu0 %3449 }
0x2d8b   :  { %v3388_v20 = vadd.f32 %v3386_v50, %v3364_v14  ;;  %v3457_v55 = vmul.f32 %v3450_v31, %v3445_v1  ;;  %v3566_v50 = vld [vmem:[#allocation2 + $0xb8] sm:$0xff] }
0x2d8c   :  { %v3407_v23 = vpop.permute.xlu1 %3406 }
0x2d8d   :  { %v3410_v43 = vmul.f32 %v3407_v23, %v3398_v8 }
0x2d8e   :  { %v3474_v45 = vpop.permute.xlu0 %3473 }
0x2d8f   :  { %v3412_v22 = vadd.f32 %v3410_v43, %v3388_v20 }
0x2d90   :  { %v3431_v5 = vpop.permute.xlu1 %3430 }
0x2d91   :  { %v3434_v25 = vmul.f32 %v3431_v5, %v3422_v17  ;;  %v3614_v17 = vld [vmem:[#allocation2 + $0xd8] sm:$0xff] }
0x2d92   :  { %v3498_v38 = vpop.permute.xlu0 %3497 }
0x2d93   :  { %v3436_v23 = vadd.f32 %v3434_v25, %v3412_v22 }
0x2d94   :  { %v3455_v26 = vpop.permute.xlu1 %3454 }
0x2d95   :  { %v3458_v15 = vmul.f32 %v3455_v26, %v3446_v47  ;;  %v7311_v47 = vld [vmem:[#allocation2 + $0xe0] sm:$0xff] }
0x2d96   :  { %v3522_v37 = vpop.permute.xlu0 %3521 }
0x2d97   :  { %v3460_v5 = vadd.f32 %v3458_v15, %v3436_v23  ;;  %v3529_v31 = vmul.f32 %v3522_v37, %v3517_v21  ;;  %v3589_v37 = vld [vmem:[#allocation2 + $0xc0] sm:$0xff] }
0x2d98   :  { %v3479_v36 = vpop.permute.xlu1 %3478 }
0x2d9a   :  { %v8543_v60 = vpop.permute.xlu0 %3545 }
0x2d9c   :  { %v3503_v35 = vpop.permute.xlu1 %3502 }
0x2d9d   :  { %v3506_v11 = vmul.f32 %v3503_v35, %v3494_v9 }
0x2d9e   :  { %v3570_v41 = vpop.permute.xlu0 %3569 }
0x2d9f   :  { %v3577_v35 = vmul.f32 %v3570_v41, %v3565_v24 }
0x2da0   :  { %v8541_v18 = vpop.permute.xlu1 %3526 }
0x2da1   :  { %v3530_v26 = vmul.f32 %v8541_v18, %v3518_v40 }
0x2da2   :  { %v3594_v28 = vpop.permute.xlu0 %3593 }
0x2da3   :  { %v3601_v18 = vmul.f32 %v3594_v28, %v3589_v37 }
0x2da4   :  { %v3306_v54 = vpop.permute.xlu1 %3305 }
0x2da5   :  { %v3313_v19 = vmul.f32 %v3306_v54, %v3301_v49  ;;  %v3470_v54 = vld [vmem:[#allocation2 + $0x78] sm:$0xff]  ;;  %v3481_v49 = vmul.f32 %v3474_v45, %v3469_v34  ;;  %v3542_v45 = vld [vmem:[#allocation2 + $0xa8] sm:$0xff] }
0x2da7   :  { %v3339_v61 = vadd.f32 %v3337_v4, %v3313_v19  ;;  %v3505_v4 = vmul.f32 %v3498_v38, %v3493_v63 }
0x2da8   :  { %v3354_v6 = vpop.permute.xlu1 %3353 }
0x2da9   :  { %v3361_v30 = vmul.f32 %v3354_v6, %v3349_v12  ;;  %v3482_v6 = vmul.f32 %v3479_v36, %v3470_v54  ;;  %v3618_v12 = vpop.permute.xlu0 %3617  ;;  %v3553_v36 = vmul.f32 %v8543_v60, %v3541_v59 }
0x2daa   :  { %v3625_v60 = vmul.f32 %v3618_v12, %v3613_v10 }
0x2dab   :  { %v3363_v46 = vadd.f32 %v3361_v30, %v3339_v61 }
0x2dac   :  { %v3378_v52 = vpop.permute.xlu1 %3377 }
0x2dad   :  { %v3385_v2 = vmul.f32 %v3378_v52, %v3373_v7  ;;  %v3484_v7 = vadd.f32 %v3482_v6, %v3460_v5  ;;  %v3642_v38 = vpop.permute.xlu0 %3641 }
0x2dae   :  { %v3649_v41 = vmul.f32 %v7311_v47, %v3642_v38 }
0x2daf   :  { %v3387_v13 = vadd.f32 %v3385_v2, %v3363_v46  ;;  %v3508_v61 = vadd.f32 %v3506_v11, %v3484_v7 }
0x2db0   :  { %v3402_v51 = vpop.permute.xlu1 %3401 }
0x2db1   :  { %v3409_v57 = vmul.f32 %v3402_v51, %v3397_v27  ;;  %v3532_v46 = vadd.f32 %v3530_v26, %v3508_v61  ;;  %v3590_v51 = vld [vmem:[#allocation2 + $0xc8] sm:$0xff] }
0x2db3   :  { %v3411_v53 = vadd.f32 %v3409_v57, %v3387_v13 }
0x2db4   :  { %v3551_v62 = vpop.permute.xlu1 %3550 }
0x2db5   :  { %v3435_v56 = vadd.f32 %v3433_v16, %v3411_v53  ;;  %v3554_v48 = vmul.f32 %v3551_v62, %v3542_v45  ;;  %v3664_v53 = vpop.permute.xlu0 %3663 }
0x2db7   :  { %v3459_v19 = vadd.f32 %v3457_v55, %v3435_v56  ;;  %v3556_v13 = vadd.f32 %v3554_v48, %v3532_v46  ;;  %v7312_v55 = vld [vmem:[#allocation2 + $0xe8] sm:$0xff]  ;;  %v3671_v56 = vmul.f32 %v3664_v53, %v8267_v58 }
0x2db8   :  { %v3575_v0 = vpop.permute.xlu1 %3574 }
0x2db9   :  { %v3483_v30 = vadd.f32 %v3481_v49, %v3459_v19  ;;  %v3578_v27 = vmul.f32 %v3575_v0, %v3566_v50  ;;  %v3680_v19 = vpop.permute.xlu0 %3679 }
0x2dbb   :  { %v3507_v52 = vadd.f32 %v3505_v4, %v3483_v30  ;;  %v3580_v16 = vadd.f32 %v3578_v27, %v3556_v13  ;;  %v6053_v4 = vld [vmem:[%s9060_s6] ss:$0 sm:$0xff] }
0x2dbc   :  { %v3599_v44 = vpop.permute.xlu1 %3598 }
0x2dbd   :  { %v3531_v2 = vadd.f32 %v3529_v31, %v3507_v52  ;;  %v3602_v57 = vmul.f32 %v3599_v44, %v3590_v51 }
0x2dbf   :  { %v3555_v8 = vadd.f32 %v3553_v36, %v3531_v2  ;;  %v3604_v62 = vadd.f32 %v3602_v57, %v3580_v16 }
0x2dc0   :  { %v3623_v14 = vpop.permute.xlu1 %3622 }
0x2dc1   :  { %v3579_v43 = vadd.f32 %v3577_v35, %v3555_v8  ;;  %v3626_v20 = vmul.f32 %v3623_v14, %v3614_v17 }
0x2dc3   :  { %v3603_v25 = vadd.f32 %v3601_v18, %v3579_v43  ;;  %v3628_v28 = vadd.f32 %v3626_v20, %v3604_v62 }
0x2dc4   :  { %v3647_v1 = vpop.permute.xlu1 %3646 }
0x2dc5   :  { %v3650_v22 = vmul.f32 %v7312_v55, %v3647_v1  ;;  %v3627_v15 = vadd.f32 %v3625_v60, %v3603_v25 }
0x2dc7   :  { %v3651_v34 = vadd.f32 %v3649_v41, %v3627_v15  ;;  %v3652_v49 = vadd.f32 %v3650_v22, %v3628_v28 }
0x2dc8   :  { %v3669_v54 = vpop.permute.xlu1 %3668 }
0x2dc9   :  { %v3672_v23 = vmul.f32 %v3669_v54, %v8271_v42  ;;  %v3673_v6 = vadd.f32 %v3671_v56, %v3651_v34 }
0x2dcb   :  { %v3674_v63 = vadd.f32 %v3672_v23, %v3652_v49  ;;  %v3687_v9 = vmul.f32 %v3680_v19, %v3673_v6 }
0x2dcc   :  { %v3685_v12 = vpop.permute.xlu1 %3684 }
0x2dcd   :  { %v3688_v0 = vmul.f32 %v3685_v12, %v3674_v63  ;;  %6640 = vmatprep.mubr.msk.f32.mxu1 %vm440_vm2, %v3687_v9 }
0x2dcf   :  { %6641 = vmatmul.mubr.msk.f32.vlgmr.msra.gmra.mxu1 %vm440_vm2, %v3688_v0 }
0x2dd0   :  { %6644 = vmatpush3.msra.mxu1 %v8513_v29  ;;  %6651 = vmatprep.mubr.msk.f32.mxu1 %vm7339_vm4, %v7335_v39 }
0x2dd1   :  { %6645 = vmatprep.subr.mxu1 %v7335_v39 }
0x2dd2   :  { %6646 = vmatpush3.msra.mxu1 %v8520_v33 }
0x2dd3   :  { %6647 = vmatprep.subr.mxu1 %v7335_v39 }
0x2dd4   :  { %6648 = vmatpush3.msra.mxu1 %v8527_v3 }
0x2dd5   :  { %6649 = vmatprep.subr.mxu1 %v7335_v39 }
0x2dd6   :  { %6650 = vmatpush3.msra.mxu1 %v8534_v32 }
0x2dd7   :  { %6652 = vmatmul.mubr.f32.vlgmr.msra.gmra.mxu1 %v7335_v39  ;;  %6654 = vmatprep.subr.mxu1 %v7335_v39 }
0x2dd8   :  { %6655 = vmatpush3.msra.mxu1 %v8513_v29  ;;  %6662 = vmatprep.mubr.msk.f32.mxu1 %vm7339_vm4, %v7335_v39 }
0x2dd9   :  { %6656 = vmatprep.subr.mxu1 %v7335_v39 }
0x2dda   :  { %6657 = vmatpush3.msra.mxu1 %v8520_v33 }
0x2ddb   :  { %6658 = vmatprep.subr.mxu1 %v7335_v39 }
0x2ddc   :  { %6659 = vmatpush3.msra.mxu1 %v8527_v3 }
0x2ddd   :  { %6660 = vmatprep.subr.mxu1 %v7335_v39 }
0x2dde   :  { %6661 = vmatpush3.msra.mxu1 %v8534_v32 }
0x2ddf   :  { %6665 = vmatprep.subr.mxu1 %v7335_v39 }
0x2e8f   :  { %v6642_v58 = vpop.f32.mrf.mxu1 }
0x2e90   :  { %v8577_v30 = vadd.f32 %v6642_v58, %v6053_v4 }
0x2e91   :  { %v3772_v42 = vpop.f32.mrf.mxu1 }
0x2e92   :  { %v8575_v5 = vadd.f32 %v6053_v4, %v3772_v42 }
0x2e97   :  { %v3851_v11 = vpop.f32.mrf.mxu1 }
0x2e98   :  { %v3856_v21 = vrot.slane %v3851_v11, 1  ;;  %v3859_v40 = vadd.f32 %v3851_v11, %v8575_v5 }
0x2e99   :  { %v6653_v31 = vpop.f32.mrf.mxu1 }
0x2e9a   :  { %v3860_v7 = vadd.f32 %v3856_v21, %v8577_v30  ;;  %7162 = vtanh.f32 %v3859_v40  ;;  %v6056_v59 = vmul.f32 -1.442695, %v3859_v40 }
0x2e9c   :  { %7164 = vtanh.f32 %v3860_v7  ;;  %v6057_v45 = vmul.f32 -1.442695, %v3860_v7 }
0x2e9d   :  { %7166 = vpow2.f32 %v6056_v59 }
0x2e9e   :  { %7168 = vpow2.f32 %v6057_v45 }
0x2ea7   :  { %v7163_v26 = vpop.eup %7162 }
0x2ea8   :  { %3879 = vrot.lane.b32.xlu1 %v7163_v26, %s7336_s3 }
0x2ea9   :  { %v7165_v52 = vpop.eup %7164 }
0x2eaa   :  { %3881 = vrot.lane.b32.xlu0 %v7165_v52, %s7336_s3  ;;  %v7167_v44 = vpop.eup %7166 }
0x2eab   :  { %v7169_v36 = vpop.eup %7168  ;;  %v3867_v61 = vadd.f32 1.0, %v7167_v44 }
0x2eac   :  { %v3868_v2 = vadd.f32 1.0, %v7169_v36 }
0x2ead   :  { %7170 = vrcp.f32 %v3867_v61 }
0x2eae   :  { %7172 = vrcp.f32 %v3868_v2 }
0x2eba   :  { %v7171_v48 = vpop.eup %7170 }
0x2ebb   :  { %v7173_v50 = vpop.eup %7172  ;;  %v3875_v8 = vmul.f32 0.0, %v7171_v48 }
0x2ebc   :  { %v3876_v51 = vmul.f32 0.0, %v7173_v50 }
0x2f1a   :  { %v3880_v24 = vpop.permute.xlu1 %3879 }
0x2f1b   :  { %v3885_v38 = vmul.f32 %v7171_v48, %v3880_v24 }
0x2f1c   :  { %v3882_v35 = vpop.permute.xlu0 %3881 }
0x2f1d   :  { %3889 = vrot.lane.b32.xlu1 %v3885_v38, %s7337_s26  ;;  %v3886_v46 = vmul.f32 %v7173_v50, %v3882_v35 }
0x2f1f   :  { %3891 = vrot.lane.b32.xlu0 %v3886_v46, %s7337_s26 }
0x2f8f   :  { %v3890_v27 = vpop.permute.xlu1 %3889 }
0x2f90   :  { %v8585_v37 = vadd.f32 %v3890_v27, %v3875_v8 }
0x2f91   :  { %v3892_v14 = vpop.permute.xlu0 %3891 }
0x2f92   :  { %7174 = vtanh.f32 %v8585_v37  ;;  %v3896_v18 = vadd.f32 %v3892_v14, %v3876_v51  ;;  %v4010_v42 = vrot.slane %v8585_v37, 7 }
0x2f94   :  { %7176 = vtanh.f32 %v3896_v18  ;;  %v4011_v0 = vrot.slane %v3896_v18, 7 }
0x2f9f   :  { %v7175_v43 = vpop.eup %7174 }
0x2fa0   :  { %3901 = vrot.lane.b32.xlu1 %v7175_v43, %s7336_s3 }
0x2fa1   :  { %v7177_v13 = vpop.eup %7176 }
0x2fa2   :  { %3903 = vrot.lane.b32.xlu0 %v7177_v13, %s7336_s3 }
0x3012   :  { %v3902_v57 = vpop.permute.xlu1 %3901 }
0x3013   :  { %v3907_v60 = vmul.f32 %v7171_v48, %v3902_v57 }
0x3014   :  { %v3904_v10 = vpop.permute.xlu0 %3903 }
0x3015   :  { %v3908_v17 = vmul.f32 %v7173_v50, %v3904_v10 }
0x3017   :  { %v3911_v16 = vrot.slane %v3908_v17, 7 }
0x3019   :  { %v3913_v20 = vsel %vm3912_vm5, %v3911_v16, %v3907_v60 }
0x301a   :  { %3914 = vrot.lane.b32.xlu0 %v3913_v20, %s7337_s26 }
0x308c   :  { %v8592_v25 = vpop.permute.xlu0 %3914 }
0x308d   :  { %6663 = vmatmul.mubr.msk.f32.vlgmr.msra.gmra.mxu1 %vm440_vm2, %v8592_v25 }
0x308e   :  { %6666 = vmatpush3.msra.mxu1 %v8513_v29  ;;  %6673 = vmatprep.mubr.msk.f32.mxu1 %vm7339_vm4, %v7335_v39 }
0x308f   :  { %6667 = vmatprep.subr.mxu1 %v7335_v39 }
0x3090   :  { %6668 = vmatpush3.msra.mxu1 %v8520_v33 }
0x3091   :  { %6669 = vmatprep.subr.mxu1 %v7335_v39 }
0x3092   :  { %6670 = vmatpush3.msra.mxu1 %v8527_v3 }
0x3093   :  { %6671 = vmatprep.subr.mxu1 %v7335_v39 }
0x3094   :  { %6672 = vmatpush3.msra.mxu1 %v8534_v32 }
0x3095   :  { %6676 = vmatprep.subr.mxu1 %v7335_v39 }
0x314d   :  { %v3984_v53 = vpop.f32.mrf.mxu1 }
0x314e   :  { %v3989_v1 = vrot.slane %v3984_v53, 7  ;;  %v3993_v47 = vadd.f32 %v3984_v53, %v8577_v30 }
0x314f   :  { %v6664_v41 = vpop.f32.mrf.mxu1 }
0x3150   :  { %v3992_v62 = vadd.f32 %v3989_v1, %v8575_v5  ;;  %7178 = vtanh.f32 %v3993_v47  ;;  %v6060_v15 = vmul.f32 -1.442695, %v3993_v47 }
0x3152   :  { %7180 = vtanh.f32 %v3992_v62  ;;  %v6059_v56 = vmul.f32 -1.442695, %v3992_v62 }
0x3153   :  { %7182 = vpow2.f32 %v6060_v15 }
0x3154   :  { %7184 = vpow2.f32 %v6059_v56 }
0x315d   :  { %v7179_v55 = vpop.eup %7178 }
0x315e   :  { %4020 = vrot.lane.b32.xlu0 %v7179_v55, %s7336_s3 }
0x315f   :  { %v7181_v22 = vpop.eup %7180 }
0x3160   :  { %4018 = vrot.lane.b32.xlu1 %v7181_v22, %s7336_s3  ;;  %v7183_v28 = vpop.eup %7182 }
0x3161   :  { %v7185_v34 = vpop.eup %7184  ;;  %v4001_v54 = vadd.f32 1.0, %v7183_v28 }
0x3162   :  { %v4000_v49 = vadd.f32 1.0, %v7185_v34 }
0x3163   :  { %7186 = vrcp.f32 %v4001_v54 }
0x3164   :  { %7188 = vrcp.f32 %v4000_v49 }
0x3170   :  { %v7187_v23 = vpop.eup %7186 }
0x3171   :  { %v7189_v63 = vpop.eup %7188  ;;  %v4015_v58 = vmul.f32 %v7187_v23, %v4011_v0 }
0x3172   :  { %v4014_v21 = vmul.f32 %v7189_v63, %v4010_v42 }
0x31d0   :  { %v4021_v6 = vpop.permute.xlu0 %4020 }
0x31d1   :  { %v4025_v19 = vmul.f32 %v7187_v23, %v4021_v6 }
0x31d2   :  { %v4019_v9 = vpop.permute.xlu1 %4018 }
0x31d3   :  { %4030 = vrot.lane.b32.xlu0 %v4025_v19, %s7337_s26  ;;  %v4024_v12 = vmul.f32 %v7189_v63, %v4019_v9 }
0x31d5   :  { %4028 = vrot.lane.b32.xlu1 %v4024_v12, %s7337_s26 }
0x3245   :  { %v4031_v4 = vpop.permute.xlu0 %4030 }
0x3246   :  { %v4035_v11 = vadd.f32 %v4031_v4, %v4015_v58 }
0x3247   :  { %v4029_v40 = vpop.permute.xlu1 %4028 }
0x3248   :  { %7190 = vtanh.f32 %v4035_v11  ;;  %v4034_v31 = vadd.f32 %v4029_v40, %v4014_v21  ;;  %v4150_v1 = vrot.slane %v4035_v11, 7 }
0x324a   :  { %7192 = vtanh.f32 %v4034_v31  ;;  %v4149_v53 = vrot.slane %v4034_v31, 7 }
0x3255   :  { %v7191_v7 = vpop.eup %7190 }
0x3256   :  { %4042 = vrot.lane.b32.xlu0 %v7191_v7, %s7336_s3 }
0x3257   :  { %v7193_v26 = vpop.eup %7192 }
0x3258   :  { %4040 = vrot.lane.b32.xlu1 %v7193_v26, %s7336_s3 }
0x32c8   :  { %v4043_v52 = vpop.permute.xlu0 %4042 }
0x32c9   :  { %v4047_v44 = vmul.f32 %v7187_v23, %v4043_v52 }
0x32ca   :  { %v4041_v59 = vpop.permute.xlu1 %4040 }
0x32cb   :  { %v4046_v45 = vmul.f32 %v7189_v63, %v4041_v59 }
0x32cd   :  { %v4050_v36 = vrot.slane %v4046_v45, 1 }
0x32cf   :  { %v4051_v61 = vsel %vm3912_vm5, %v4047_v44, %v4050_v36 }
0x32d0   :  { %4052 = vrot.lane.b32.xlu1 %v4051_v61, %s7337_s26 }
0x3342   :  { %v8617_v2 = vpop.permute.xlu1 %4052 }
0x3343   :  { %6674 = vmatmul.mubr.msk.f32.vlgmr.msra.gmra.mxu1 %vm440_vm2, %v8617_v2 }
0x3344   :  { %6677 = vmatpush3.msra.mxu1 %v8513_v29  ;;  %6684 = vmatprep.mubr.msk.f32.mxu1 %vm7339_vm4, %v7335_v39 }
0x3345   :  { %6678 = vmatprep.subr.mxu1 %v7335_v39 }
0x3346   :  { %6679 = vmatpush3.msra.mxu1 %v8520_v33 }
0x3347   :  { %6680 = vmatprep.subr.mxu1 %v7335_v39 }
0x3348   :  { %6681 = vmatpush3.msra.mxu1 %v8527_v3 }
0x3349   :  { %6682 = vmatprep.subr.mxu1 %v7335_v39 }
0x334a   :  { %6683 = vmatpush3.msra.mxu1 %v8534_v32 }
0x334b   :  { %6687 = vmatprep.subr.mxu1 %v7335_v39 }
0x3403   :  { %v4122_v48 = vpop.f32.mrf.mxu1 }
0x3404   :  { %v4127_v24 = vrot.slane %v4122_v48, 6  ;;  %v4128_v38 = vrot.slane %v4122_v48, 7 }
0x3405   :  { %v6675_v50 = vpop.f32.mrf.mxu1 }
0x3406   :  { %v4131_v35 = vadd.f32 %v4127_v24, %v8575_v5  ;;  %v4132_v46 = vadd.f32 %v4128_v38, %v8577_v30 }
0x3408   :  { %7194 = vtanh.f32 %v4131_v35  ;;  %v6062_v37 = vmul.f32 -1.442695, %v4131_v35  ;;  %v6063_v51 = vmul.f32 -1.442695, %v4132_v46 }
0x3409   :  { %7196 = vtanh.f32 %v4132_v46 }
0x340a   :  { %7198 = vpow2.f32 %v6062_v37 }
0x340b   :  { %7200 = vpow2.f32 %v6063_v51 }
0x3415   :  { %v7195_v8 = vpop.eup %7194 }
0x3416   :  { %v7197_v27 = vpop.eup %7196  ;;  %4157 = vrot.lane.b32.xlu0 %v7195_v8, %s7336_s3 }
0x3417   :  { %4159 = vrot.lane.b32.xlu1 %v7197_v27, %s7336_s3  ;;  %v7199_v14 = vpop.eup %7198 }
0x3418   :  { %v7201_v18 = vpop.eup %7200  ;;  %v4139_v43 = vadd.f32 1.0, %v7199_v14 }
0x3419   :  { %v4140_v13 = vadd.f32 1.0, %v7201_v18 }
0x341a   :  { %7202 = vrcp.f32 %v4139_v43 }
0x341b   :  { %7204 = vrcp.f32 %v4140_v13 }
0x3427   :  { %v7203_v57 = vpop.eup %7202 }
0x3428   :  { %v7205_v17 = vpop.eup %7204  ;;  %v4153_v47 = vmul.f32 %v7203_v57, %v4149_v53 }
0x3429   :  { %v4154_v41 = vmul.f32 %v7205_v17, %v4150_v1 }
0x3488   :  { %v4158_v10 = vpop.permute.xlu0 %4157 }
0x3489   :  { %v4160_v60 = vpop.permute.xlu1 %4159  ;;  %v4163_v16 = vmul.f32 %v7203_v57, %v4158_v10 }
0x348a   :  { %v4164_v20 = vmul.f32 %v7205_v17, %v4160_v60 }
0x348b   :  { %4167 = vrot.lane.b32.xlu0 %v4163_v16, %s7337_s26 }
0x348c   :  { %4169 = vrot.lane.b32.xlu1 %v4164_v20, %s7337_s26 }
0x34fd   :  { %v4168_v62 = vpop.permute.xlu0 %4167 }
0x34fe   :  { %v4170_v55 = vpop.permute.xlu1 %4169  ;;  %v4173_v22 = vadd.f32 %v4168_v62, %v4153_v47 }
0x34ff   :  { %v4174_v15 = vadd.f32 %v4170_v55, %v4154_v41 }
0x3500   :  { %7206 = vtanh.f32 %v4173_v22  ;;  %v4289_v50 = vrot.slane %v4173_v22, 7 }
0x3501   :  { %7208 = vtanh.f32 %v4174_v15  ;;  %v4290_v35 = vrot.slane %v4174_v15, 7 }
0x350d   :  { %v7207_v56 = vpop.eup %7206 }
0x350e   :  { %v7209_v28 = vpop.eup %7208  ;;  %4179 = vrot.lane.b32.xlu0 %v7207_v56, %s7336_s3 }
0x350f   :  { %4181 = vrot.lane.b32.xlu1 %v7209_v28, %s7336_s3 }
0x3580   :  { %v4180_v34 = vpop.permute.xlu0 %4179 }
0x3581   :  { %v4182_v54 = vpop.permute.xlu1 %4181  ;;  %v4185_v49 = vmul.f32 %v7203_v57, %v4180_v34 }
0x3582   :  { %v4186_v23 = vmul.f32 %v7205_v17, %v4182_v54 }
0x3583   :  { %v4189_v6 = vrot.slane %v4185_v49, 2 }
0x3584   :  { %v4190_v19 = vrot.slane %v4186_v23, 1 }
0x3586   :  { %v4191_v63 = vsel %vm3912_vm5, %v4190_v19, %v4189_v6 }
0x3587   :  { %4192 = vrot.lane.b32.xlu0 %v4191_v63, %s7337_s26 }
0x35f9   :  { %v8641_v9 = vpop.permute.xlu0 %4192 }
0x35fa   :  { %6685 = vmatmul.mubr.msk.f32.vlgmr.msra.gmra.mxu1 %vm440_vm2, %v8641_v9 }
0x35fb   :  { %6688 = vmatpush3.msra.mxu1 %v8513_v29  ;;  %6695 = vmatprep.mubr.msk.f32.mxu1 %vm7339_vm4, %v7335_v39 }
0x35fc   :  { %6689 = vmatprep.subr.mxu1 %v7335_v39 }
0x35fd   :  { %6690 = vmatpush3.msra.mxu1 %v8520_v33 }
0x35fe   :  { %6691 = vmatprep.subr.mxu1 %v7335_v39 }
0x35ff   :  { %6692 = vmatpush3.msra.mxu1 %v8527_v3 }
0x3600   :  { %6693 = vmatprep.subr.mxu1 %v7335_v39 }
0x3601   :  { %6694 = vmatpush3.msra.mxu1 %v8534_v32 }
0x3602   :  { %6698 = vmatprep.subr.mxu1 %v7335_v39 }
0x36ba   :  { %v4262_v12 = vpop.f32.mrf.mxu1 }
0x36bb   :  { %v4267_v0 = vrot.slane %v4262_v12, 5  ;;  %v4268_v58 = vrot.slane %v4262_v12, 6 }
0x36bc   :  { %v6686_v42 = vpop.f32.mrf.mxu1 }
0x36bd   :  { %v4271_v4 = vadd.f32 %v4267_v0, %v8575_v5  ;;  %v4272_v11 = vadd.f32 %v4268_v58, %v8577_v30 }
0x36bf   :  { %7210 = vtanh.f32 %v4271_v4  ;;  %v6065_v31 = vmul.f32 -1.442695, %v4271_v4  ;;  %v6066_v7 = vmul.f32 -1.442695, %v4272_v11 }
0x36c0   :  { %7212 = vtanh.f32 %v4272_v11 }
0x36c1   :  { %7214 = vpow2.f32 %v6065_v31 }
0x36c2   :  { %7216 = vpow2.f32 %v6066_v7 }
0x36cc   :  { %v7211_v21 = vpop.eup %7210 }
0x36cd   :  { %v7213_v40 = vpop.eup %7212  ;;  %4297 = vrot.lane.b32.xlu1 %v7211_v21, %s7336_s3 }
0x36ce   :  { %4299 = vrot.lane.b32.xlu0 %v7213_v40, %s7336_s3  ;;  %v7215_v26 = vpop.eup %7214 }
0x36cf   :  { %v7217_v52 = vpop.eup %7216  ;;  %v4279_v59 = vadd.f32 1.0, %v7215_v26 }
0x36d0   :  { %v4280_v45 = vadd.f32 1.0, %v7217_v52 }
0x36d1   :  { %7218 = vrcp.f32 %v4279_v59 }
0x36d2   :  { %7220 = vrcp.f32 %v4280_v45 }
0x36de   :  { %v7219_v44 = vpop.eup %7218 }
0x36df   :  { %v7221_v61 = vpop.eup %7220  ;;  %v4293_v46 = vmul.f32 %v7219_v44, %v4289_v50 }
0x36e0   :  { %v4294_v8 = vmul.f32 %v7221_v61, %v4290_v35 }
0x373f   :  { %v4298_v36 = vpop.permute.xlu1 %4297 }
0x3740   :  { %v4300_v48 = vpop.permute.xlu0 %4299  ;;  %v4303_v24 = vmul.f32 %v7219_v44, %v4298_v36 }
0x3741   :  { %v4304_v38 = vmul.f32 %v7221_v61, %v4300_v48 }
0x3742   :  { %4307 = vrot.lane.b32.xlu1 %v4303_v24, %s7337_s26 }
0x3743   :  { %4309 = vrot.lane.b32.xlu0 %v4304_v38, %s7337_s26 }
0x37b4   :  { %v4308_v27 = vpop.permute.xlu1 %4307 }
0x37b5   :  { %v4310_v37 = vpop.permute.xlu0 %4309  ;;  %v4313_v51 = vadd.f32 %v4308_v27, %v4293_v46 }
0x37b6   :  { %v4314_v14 = vadd.f32 %v4310_v37, %v4294_v8 }
0x37b7   :  { %7222 = vtanh.f32 %v4313_v51  ;;  %v4429_v4 = vrot.slane %v4313_v51, 7 }
0x37b8   :  { %7224 = vtanh.f32 %v4314_v14  ;;  %v4430_v11 = vrot.slane %v4314_v14, 7 }
0x37c4   :  { %v7223_v18 = vpop.eup %7222 }
0x37c5   :  { %v7225_v43 = vpop.eup %7224  ;;  %4319 = vrot.lane.b32.xlu1 %v7223_v18, %s7336_s3 }
0x37c6   :  { %4321 = vrot.lane.b32.xlu0 %v7225_v43, %s7336_s3 }
0x3837   :  { %v4320_v13 = vpop.permute.xlu1 %4319 }
0x3838   :  { %v4322_v57 = vpop.permute.xlu0 %4321  ;;  %v4325_v10 = vmul.f32 %v7219_v44, %v4320_v13 }
0x3839   :  { %v4326_v17 = vmul.f32 %v7221_v61, %v4322_v57 }
0x383a   :  { %v4329_v60 = vrot.slane %v4325_v10, 3 }
0x383b   :  { %v4330_v16 = vrot.slane %v4326_v17, 2 }
0x383d   :  { %v4331_v20 = vsel %vm3912_vm5, %v4330_v16, %v4329_v60 }
0x383e   :  { %4332 = vrot.lane.b32.xlu1 %v4331_v20, %s7337_s26 }
0x38b0   :  { %v8665_v53 = vpop.permute.xlu1 %4332 }
0x38b1   :  { %6696 = vmatmul.mubr.msk.f32.vlgmr.msra.gmra.mxu1 %vm440_vm2, %v8665_v53 }
0x38b2   :  { %6699 = vmatpush3.msra.mxu1 %v8513_v29  ;;  %6706 = vmatprep.mubr.msk.f32.mxu1 %vm7339_vm4, %v7335_v39 }
0x38b3   :  { %6700 = vmatprep.subr.mxu1 %v7335_v39 }
0x38b4   :  { %6701 = vmatpush3.msra.mxu1 %v8520_v33 }
0x38b5   :  { %6702 = vmatprep.subr.mxu1 %v7335_v39 }
0x38b6   :  { %6703 = vmatpush3.msra.mxu1 %v8527_v3 }
0x38b7   :  { %6704 = vmatprep.subr.mxu1 %v7335_v39 }
0x38b8   :  { %6705 = vmatpush3.msra.mxu1 %v8534_v32 }
0x38b9   :  { %6709 = vmatprep.subr.mxu1 %v7335_v39 }
0x3971   :  { %v4402_v1 = vpop.f32.mrf.mxu1 }
0x3972   :  { %v4407_v47 = vrot.slane %v4402_v1, 4  ;;  %v4408_v41 = vrot.slane %v4402_v1, 5 }
0x3973   :  { %v6697_v62 = vpop.f32.mrf.mxu1 }
0x3974   :  { %v4411_v55 = vadd.f32 %v4407_v47, %v8575_v5  ;;  %v4412_v22 = vadd.f32 %v4408_v41, %v8577_v30 }
0x3976   :  { %7226 = vtanh.f32 %v4411_v55  ;;  %v6068_v28 = vmul.f32 -1.442695, %v4411_v55  ;;  %v6069_v34 = vmul.f32 -1.442695, %v4412_v22 }
0x3977   :  { %7228 = vtanh.f32 %v4412_v22 }
0x3978   :  { %7230 = vpow2.f32 %v6068_v28 }
0x3979   :  { %7232 = vpow2.f32 %v6069_v34 }
0x3983   :  { %v7227_v15 = vpop.eup %7226 }
0x3984   :  { %v7229_v56 = vpop.eup %7228  ;;  %4437 = vrot.lane.b32.xlu0 %v7227_v15, %s7336_s3 }
0x3985   :  { %4439 = vrot.lane.b32.xlu1 %v7229_v56, %s7336_s3  ;;  %v7231_v54 = vpop.eup %7230 }
0x3986   :  { %v7233_v49 = vpop.eup %7232  ;;  %v4419_v23 = vadd.f32 1.0, %v7231_v54 }
0x3987   :  { %v4420_v6 = vadd.f32 1.0, %v7233_v49 }
0x3988   :  { %7234 = vrcp.f32 %v4419_v23 }
0x3989   :  { %7236 = vrcp.f32 %v4420_v6 }
0x3995   :  { %v7235_v19 = vpop.eup %7234 }
0x3996   :  { %v7237_v12 = vpop.eup %7236  ;;  %v4433_v21 = vmul.f32 %v7235_v19, %v4429_v4 }
0x3997   :  { %v4434_v40 = vmul.f32 %v7237_v12, %v4430_v11 }
0x39f6   :  { %v4438_v63 = vpop.permute.xlu0 %4437 }
0x39f7   :  { %v4440_v0 = vpop.permute.xlu1 %4439  ;;  %v4443_v58 = vmul.f32 %v7235_v19, %v4438_v63 }
0x39f8   :  { %v4444_v42 = vmul.f32 %v7237_v12, %v4440_v0 }
0x39f9   :  { %4447 = vrot.lane.b32.xlu0 %v4443_v58, %s7337_s26 }
0x39fa   :  { %4449 = vrot.lane.b32.xlu1 %v4444_v42, %s7337_s26 }
0x3a6b   :  { %v4448_v31 = vpop.permute.xlu0 %4447 }
0x3a6c   :  { %v4450_v7 = vpop.permute.xlu1 %4449  ;;  %v4453_v26 = vadd.f32 %v4448_v31, %v4433_v21 }
0x3a6d   :  { %v4454_v52 = vadd.f32 %v4450_v7, %v4434_v40 }
0x3a6e   :  { %7238 = vtanh.f32 %v4453_v26  ;;  %v4569_v47 = vrot.slane %v4453_v26, 7 }
0x3a6f   :  { %7240 = vtanh.f32 %v4454_v52  ;;  %v4570_v41 = vrot.slane %v4454_v52, 7 }
0x3a7b   :  { %v7239_v59 = vpop.eup %7238 }
0x3a7c   :  { %v7241_v45 = vpop.eup %7240  ;;  %4459 = vrot.lane.b32.xlu0 %v7239_v59, %s7336_s3 }
0x3a7d   :  { %4461 = vrot.lane.b32.xlu1 %v7241_v45, %s7336_s3 }
0x3aee   :  { %v4460_v44 = vpop.permute.xlu0 %4459 }
0x3aef   :  { %v4462_v36 = vpop.permute.xlu1 %4461  ;;  %v4465_v61 = vmul.f32 %v7235_v19, %v4460_v44 }
0x3af0   :  { %v4466_v48 = vmul.f32 %v7237_v12, %v4462_v36 }
0x3af1   :  { %v4469_v24 = vrot.slane %v4465_v61, 4 }
0x3af2   :  { %v4470_v38 = vrot.slane %v4466_v48, 3 }
0x3af4   :  { %v4471_v50 = vsel %vm3912_vm5, %v4470_v38, %v4469_v24 }
0x3af5   :  { %4472 = vrot.lane.b32.xlu0 %v4471_v50, %s7337_s26 }
0x3b67   :  { %v8689_v35 = vpop.permute.xlu0 %4472 }
0x3b68   :  { %6707 = vmatmul.mubr.msk.f32.vlgmr.msra.gmra.mxu1 %vm440_vm2, %v8689_v35 }
0x3b69   :  { %6710 = vmatpush3.msra.mxu1 %v8513_v29  ;;  %6717 = vmatprep.mubr.msk.f32.mxu1 %vm7339_vm4, %v7335_v39 }
0x3b6a   :  { %6711 = vmatprep.subr.mxu1 %v7335_v39 }
0x3b6b   :  { %6712 = vmatpush3.msra.mxu1 %v8520_v33 }
0x3b6c   :  { %6713 = vmatprep.subr.mxu1 %v7335_v39 }
0x3b6d   :  { %6714 = vmatpush3.msra.mxu1 %v8527_v3 }
0x3b6e   :  { %6715 = vmatprep.subr.mxu1 %v7335_v39 }
0x3b6f   :  { %6716 = vmatpush3.msra.mxu1 %v8534_v32 }
0x3b70   :  { %6731 = vmatprep.subr.mxu1 %v7335_v39 }
0x3c28   :  { %v4542_v46 = vpop.f32.mrf.mxu1 }
0x3c29   :  { %v4547_v8 = vrot.slane %v4542_v46, 3  ;;  %v4548_v29 = vrot.slane %v4542_v46, 4 }
0x3c2a   :  { %v6708_v27 = vpop.f32.mrf.mxu1 }
0x3c2b   :  { %v4551_v37 = vadd.f32 %v4547_v8, %v8575_v5  ;;  %v4552_v51 = vadd.f32 %v4548_v29, %v8577_v30 }
0x3c2d   :  { %7242 = vtanh.f32 %v4551_v37  ;;  %v6071_v3 = vmul.f32 -1.442695, %v4551_v37  ;;  %v6072_v32 = vmul.f32 -1.442695, %v4552_v51 }
0x3c2e   :  { %7244 = vtanh.f32 %v4552_v51 }
0x3c2f   :  { %7246 = vpow2.f32 %v6071_v3 }
0x3c30   :  { %7248 = vpow2.f32 %v6072_v32 }
0x3c3a   :  { %v7243_v33 = vpop.eup %7242 }
0x3c3b   :  { %v7245_v14 = vpop.eup %7244  ;;  %4577 = vrot.lane.b32.xlu1 %v7243_v33, %s7336_s3 }
0x3c3c   :  { %4579 = vrot.lane.b32.xlu0 %v7245_v14, %s7336_s3  ;;  %v7247_v18 = vpop.eup %7246 }
0x3c3d   :  { %v7249_v43 = vpop.eup %7248  ;;  %v4559_v13 = vadd.f32 1.0, %v7247_v18 }
0x3c3e   :  { %v4560_v57 = vadd.f32 1.0, %v7249_v43 }
0x3c3f   :  { %7250 = vrcp.f32 %v4559_v13 }
0x3c40   :  { %7252 = vrcp.f32 %v4560_v57 }
0x3c4c   :  { %v7251_v10 = vpop.eup %7250 }
0x3c4d   :  { %v7253_v60 = vpop.eup %7252  ;;  %v4573_v62 = vmul.f32 %v7251_v10, %v4569_v47 }
0x3c4e   :  { %v4574_v55 = vmul.f32 %v7253_v60, %v4570_v41  ;;  %v8747_v41 = vld [vmem:[%s9065_s11 + $0x10] sm:$0xff] }
0x3cad   :  { %v4578_v17 = vpop.permute.xlu1 %4577 }
0x3cae   :  { %v4580_v16 = vpop.permute.xlu0 %4579  ;;  %v4583_v20 = vmul.f32 %v7251_v10, %v4578_v17 }
0x3caf   :  { %v4584_v1 = vmul.f32 %v7253_v60, %v4580_v16 }
0x3cb0   :  { %4587 = vrot.lane.b32.xlu1 %v4583_v20, %s7337_s26 }
0x3cb1   :  { %4589 = vrot.lane.b32.xlu0 %v4584_v1, %s7337_s26  ;;  %v8738_v1 = vld [vmem:[%s9065_s11 + $0x18] sm:$0xff] }
0x3d22   :  { %v4588_v22 = vpop.permute.xlu1 %4587 }
0x3d23   :  { %v4590_v15 = vpop.permute.xlu0 %4589  ;;  %v4593_v56 = vadd.f32 %v4588_v22, %v4573_v62  ;;  %v8756_v62 = vld [vmem:[%s9065_s11 + $0x8] sm:$0xff] }
0x3d24   :  { %v4594_v28 = vadd.f32 %v4590_v15, %v4574_v55  ;;  %v8763_v55 = vld [vmem:[%s9065_s11] sm:$0xff] }
0x3d25   :  { %7254 = vtanh.f32 %v4593_v56  ;;  %v4709_v29 = vrot.slane %v4593_v56, 7 }
0x3d26   :  { %7256 = vtanh.f32 %v4594_v28  ;;  %v4710_v27 = vrot.slane %v4594_v28, 7 }
0x3d32   :  { %v7255_v34 = vpop.eup %7254 }
0x3d33   :  { %v7257_v54 = vpop.eup %7256  ;;  %4599 = vrot.lane.b32.xlu1 %v7255_v34, %s7336_s3 }
0x3d34   :  { %4601 = vrot.lane.b32.xlu0 %v7257_v54, %s7336_s3 }
0x3da5   :  { %v4600_v49 = vpop.permute.xlu1 %4599 }
0x3da6   :  { %v4602_v23 = vpop.permute.xlu0 %4601  ;;  %v4605_v6 = vmul.f32 %v7251_v10, %v4600_v49 }
0x3da7   :  { %v4606_v19 = vmul.f32 %v7253_v60, %v4602_v23 }
0x3da8   :  { %v4609_v63 = vrot.slane %v4605_v6, 5 }
0x3da9   :  { %v4610_v12 = vrot.slane %v4606_v19, 4 }
0x3dab   :  { %v4611_v0 = vsel %vm3912_vm5, %v4610_v12, %v4609_v63 }
0x3dac   :  { %4612 = vrot.lane.b32.xlu1 %v4611_v0, %s7337_s26 }
0x3e1e   :  { %v8713_v58 = vpop.permute.xlu1 %4612 }
0x3e1f   :  { %6718 = vmatmul.mubr.msk.f32.vlgmr.msra.gmra.mxu1 %vm440_vm2, %v8713_v58 }
0x3e20   :  { %6739 = vmatprep.mubr.msk.f32.mxu1 %vm7339_vm4, %v7335_v39 }
0x3edf   :  { %v4682_v42 = vpop.f32.mrf.mxu1 }
0x3ee0   :  { %v4687_v4 = vrot.slane %v4682_v42, 2  ;;  %v4688_v11 = vrot.slane %v4682_v42, 3 }
0x3ee1   :  { %v6719_v21 = vpop.f32.mrf.mxu1 }
0x3ee2   :  { %v4691_v40 = vadd.f32 %v4687_v4, %v8575_v5  ;;  %v4692_v31 = vadd.f32 %v4688_v11, %v8577_v30 }
0x3ee4   :  { %7258 = vtanh.f32 %v4691_v40  ;;  %v6074_v52 = vmul.f32 -1.442695, %v4691_v40  ;;  %v6075_v59 = vmul.f32 -1.442695, %v4692_v31 }
0x3ee5   :  { %7260 = vtanh.f32 %v4692_v31 }
0x3ee6   :  { %7262 = vpow2.f32 %v6074_v52 }
0x3ee7   :  { %7264 = vpow2.f32 %v6075_v59 }
0x3ef1   :  { %v7259_v7 = vpop.eup %7258 }
0x3ef2   :  { %v7261_v26 = vpop.eup %7260  ;;  %4717 = vrot.lane.b32.xlu0 %v7259_v7, %s7336_s3 }
0x3ef3   :  { %4719 = vrot.lane.b32.xlu1 %v7261_v26, %s7336_s3  ;;  %v7263_v45 = vpop.eup %7262 }
0x3ef4   :  { %v7265_v44 = vpop.eup %7264  ;;  %v4699_v36 = vadd.f32 1.0, %v7263_v45 }
0x3ef5   :  { %v4700_v61 = vadd.f32 1.0, %v7265_v44 }
0x3ef6   :  { %7266 = vrcp.f32 %v4699_v36 }
0x3ef7   :  { %7268 = vrcp.f32 %v4700_v61 }
0x3f03   :  { %v7267_v48 = vpop.eup %7266 }
0x3f04   :  { %v7269_v38 = vpop.eup %7268  ;;  %v4713_v37 = vmul.f32 %v7267_v48, %v4709_v29 }
0x3f05   :  { %v4714_v51 = vmul.f32 %v7269_v38, %v4710_v27  ;;  %v4890_v27 = vld [vmem:[%s9066_s12 + $0x18] sm:$0xff] }
0x3f06   :  { %6732 = vmatpush3.msra.mxu1 %v4890_v27 }
0x3f07   :  { %6733 = vmatprep.subr.mxu1 %v7335_v39 }
0x3f64   :  { %v4718_v24 = vpop.permute.xlu0 %4717 }
0x3f65   :  { %v4720_v50 = vpop.permute.xlu1 %4719  ;;  %v4723_v46 = vmul.f32 %v7267_v48, %v4718_v24 }
0x3f66   :  { %v4724_v8 = vmul.f32 %v7269_v38, %v4720_v50 }
0x3f67   :  { %4727 = vrot.lane.b32.xlu0 %v4723_v46, %s7337_s26 }
0x3f68   :  { %4729 = vrot.lane.b32.xlu1 %v4724_v8, %s7337_s26 }
0x3fd9   :  { %v4728_v33 = vpop.permute.xlu0 %4727 }
0x3fda   :  { %v4730_v14 = vpop.permute.xlu1 %4729  ;;  %v8725_v3 = vadd.f32 %v4728_v33, %v4713_v37  ;;  %v4889_v37 = vld [vmem:[%s9066_s12 + $0x10] sm:$0xff]  ;;  %v4887_v33 = vld [vmem:[%s9066_s12] sm:$0xff] }
0x3fdb   :  { %v8727_v32 = vadd.f32 %v4730_v14, %v4714_v51  ;;  %v4888_v51 = vld [vmem:[%s9066_s12 + $0x8] sm:$0xff]  ;;  %6734 = vmatpush3.msra.mxu1 %v4889_v37 }
0x3fdc   :  { %7270 = vtanh.f32 %v8725_v3  ;;  %v4849_v61 = vrot.slane %v8725_v3, 7  ;;  %6735 = vmatprep.subr.mxu1 %v7335_v39 }
0x3fdd   :  { %7272 = vtanh.f32 %v8727_v32  ;;  %6736 = vmatpush3.msra.mxu1 %v4888_v51 }
0x3fde   :  { %6737 = vmatprep.subr.mxu1 %v7335_v39 }
0x3fdf   :  { %6738 = vmatpush3.msra.mxu1 %v4887_v33 }
0x3fe0   :  { %6753 = vmatprep.subr.mxu1 %v7335_v39 }
0x3fe9   :  { %v7271_v18 = vpop.eup %7270 }
0x3fea   :  { %v7273_v43 = vpop.eup %7272  ;;  %4739 = vrot.lane.b32.xlu0 %v7271_v18, %s7336_s3 }
0x3feb   :  { %4741 = vrot.lane.b32.xlu1 %v7273_v43, %s7336_s3 }
0x405c   :  { %v4740_v13 = vpop.permute.xlu0 %4739 }
0x405d   :  { %v4742_v57 = vpop.permute.xlu1 %4741  ;;  %v4745_v10 = vmul.f32 %v7267_v48, %v4740_v13  ;;  %v4850_v48 = vrot.slane %v8727_v32, 7 }
0x405e   :  { %v4746_v17 = vmul.f32 %v7269_v38, %v4742_v57 }
0x405f   :  { %v4749_v60 = vrot.slane %v4745_v10, 6 }
0x4060   :  { %v4750_v16 = vrot.slane %v4746_v17, 5 }
0x4062   :  { %v4751_v20 = vsel %vm3912_vm5, %v4750_v16, %v4749_v60  ;;  %v6079_v16 = vld [vmem:[%s9067_s13] ss:$0 sm:$0xff] }
0x4063   :  { %4752 = vrot.lane.b32.xlu0 %v4751_v20, %s7337_s26 }
0x40d5   :  { %v8740_v47 = vpop.permute.xlu0 %4752 }
0x40d6   :  { %6729 = vmatmul.mubr.msk.f32.vlgmr.msra.gmra.mxu0 %vm440_vm2, %v8740_v47 }
0x40d7   :  { %6743 = vmatpush3.msra.mxu0 %v8738_v1  ;;  %6750 = vmatprep.mubr.msk.f32.mxu0 %vm7339_vm4, %v7335_v39 }
0x40d8   :  { %6744 = vmatprep.subr.mxu0 %v7335_v39 }
0x40d9   :  { %6745 = vmatpush3.msra.mxu0 %v8747_v41 }
0x40da   :  { %6746 = vmatprep.subr.mxu0 %v7335_v39 }
0x40db   :  { %6747 = vmatpush3.msra.mxu0 %v8756_v62 }
0x40dc   :  { %6748 = vmatprep.subr.mxu0 %v7335_v39 }
0x40dd   :  { %6749 = vmatpush3.msra.mxu0 %v8763_v55 }
0x40de   :  { %6751 = vmatmul.mubr.msk.f32.vlgmr.msra.gmra.mxu0 %vm440_vm2, %v8592_v25  ;;  %6764 = vmatprep.subr.mxu0 %v7335_v39 }
0x40df   :  { %6765 = vmatpush3.msra.mxu0 %v8738_v1  ;;  %6772 = vmatprep.mubr.msk.f32.mxu0 %vm7339_vm4, %v7335_v39 }
0x40e0   :  { %6766 = vmatprep.subr.mxu0 %v7335_v39 }
0x40e1   :  { %6767 = vmatpush3.msra.mxu0 %v8747_v41 }
0x40e2   :  { %6768 = vmatprep.subr.mxu0 %v7335_v39 }
0x40e3   :  { %6769 = vmatpush3.msra.mxu0 %v8756_v62 }
0x40e4   :  { %6770 = vmatprep.subr.mxu0 %v7335_v39 }
0x40e5   :  { %6771 = vmatpush3.msra.mxu0 %v8763_v55 }
0x40e6   :  { %6773 = vmatmul.mubr.msk.f32.vlgmr.msra.gmra.mxu0 %vm440_vm2, %v8641_v9  ;;  %6786 = vmatprep.subr.mxu0 %v7335_v39 }
0x40e7   :  { %6787 = vmatpush3.msra.mxu0 %v8738_v1  ;;  %6794 = vmatprep.mubr.msk.f32.mxu0 %vm7339_vm4, %v7335_v39 }
0x40e8   :  { %6788 = vmatprep.subr.mxu0 %v7335_v39 }
0x40e9   :  { %6789 = vmatpush3.msra.mxu0 %v8747_v41 }
0x40ea   :  { %6790 = vmatprep.subr.mxu0 %v7335_v39 }
0x40eb   :  { %6791 = vmatpush3.msra.mxu0 %v8756_v62 }
0x40ec   :  { %6792 = vmatprep.subr.mxu0 %v7335_v39 }
0x40ed   :  { %6793 = vmatpush3.msra.mxu0 %v8763_v55 }
0x40ee   :  { %6795 = vmatmul.mubr.msk.f32.vlgmr.msra.gmra.mxu0 %vm440_vm2, %v8689_v35  ;;  %6808 = vmatprep.subr.mxu0 %v7335_v39 }
0x40ef   :  { %6809 = vmatpush3.msra.mxu0 %v8738_v1  ;;  %6816 = vmatprep.mubr.msk.f32.mxu0 %vm7339_vm4, %v7335_v39 }
0x40f0   :  { %6810 = vmatprep.subr.mxu0 %v7335_v39 }
0x40f1   :  { %6811 = vmatpush3.msra.mxu0 %v8747_v41 }
0x40f2   :  { %6812 = vmatprep.subr.mxu0 %v7335_v39 }
0x40f3   :  { %6813 = vmatpush3.msra.mxu0 %v8756_v62 }
0x40f4   :  { %6814 = vmatprep.subr.mxu0 %v7335_v39 }
0x40f5   :  { %6815 = vmatpush3.msra.mxu0 %v8763_v55 }
0x40f6   :  { %6817 = vmatmul.mubr.msk.f32.vlgmr.msra.gmra.mxu0 %vm440_vm2, %v8740_v47 }
0x40f7   :  { %5793 = vmatprep.mubr.f32.mxu0 %v7335_v39 }
0x4196   :  { %v4822_v22 = vpop.f32.mrf.mxu0 }
0x4197   :  { %v4827_v15 = vrot.slane %v4822_v22, 1  ;;  %v4828_v56 = vrot.slane %v4822_v22, 2 }
0x4198   :  { %v6730_v28 = vpop.f32.mrf.mxu0 }
0x4199   :  { %v4831_v34 = vadd.f32 %v4827_v15, %v8575_v5  ;;  %v4832_v54 = vadd.f32 %v4828_v56, %v8577_v30 }
0x419b   :  { %7274 = vtanh.f32 %v4831_v34  ;;  %v6077_v4 = vmul.f32 -1.442695, %v4831_v34  ;;  %v6078_v11 = vmul.f32 -1.442695, %v4832_v54 }
0x419c   :  { %7276 = vtanh.f32 %v4832_v54 }
0x419d   :  { %7278 = vpow2.f32 %v6077_v4 }
0x419e   :  { %v8809_v49 = vpop.f32.mrf.mxu0  ;;  %7280 = vpow2.f32 %v6078_v11 }
0x41a0   :  { %v6752_v23 = vpop.f32.mrf.mxu0 }
0x41a6   :  { %v8811_v6 = vpop.f32.mrf.mxu0 }
0x41a8   :  { %v7275_v19 = vpop.eup %7274  ;;  %v6774_v63 = vpop.f32.mrf.mxu0 }
0x41a9   :  { %v7277_v12 = vpop.eup %7276  ;;  %4857 = vrot.lane.b32.xlu1 %v7275_v19, %s7336_s3 }
0x41aa   :  { %4859 = vrot.lane.b32.xlu0 %v7277_v12, %s7336_s3  ;;  %v7279_v21 = vpop.eup %7278 }
0x41ab   :  { %v7281_v40 = vpop.eup %7280  ;;  %v4839_v31 = vadd.f32 1.0, %v7279_v21 }
0x41ac   :  { %v4840_v7 = vadd.f32 1.0, %v7281_v40 }
0x41ad   :  { %7282 = vrcp.f32 %v4839_v31 }
0x41ae   :  { %v8815_v0 = vpop.f32.mrf.mxu0  ;;  %7284 = vrcp.f32 %v4840_v7 }
0x41b0   :  { %v6796_v42 = vpop.f32.mrf.mxu0 }
0x41b6   :  { %v8817_v5 = vpop.f32.mrf.mxu0 }
0x41b8   :  { %v6818_v30 = vpop.f32.mrf.mxu0 }
0x41ba   :  { %v7283_v26 = vpop.eup %7282 }
0x41bb   :  { %v7285_v59 = vpop.eup %7284  ;;  %v4853_v24 = vmul.f32 %v7283_v26, %v4849_v61 }
0x41bc   :  { %v4854_v38 = vmul.f32 %v7285_v59, %v4850_v48 }
0x421b   :  { %v4858_v52 = vpop.permute.xlu1 %4857 }
0x421c   :  { %v4860_v45 = vpop.permute.xlu0 %4859  ;;  %v4863_v44 = vmul.f32 %v7283_v26, %v4858_v52 }
0x421d   :  { %v4864_v36 = vmul.f32 %v7285_v59, %v4860_v45 }
0x421e   :  { %4867 = vrot.lane.b32.xlu1 %v4863_v44, %s7337_s26 }
0x421f   :  { %4869 = vrot.lane.b32.xlu0 %v4864_v36, %s7337_s26 }
0x4290   :  { %v4868_v50 = vpop.permute.xlu1 %4867 }
0x4291   :  { %v4870_v46 = vpop.permute.xlu0 %4869  ;;  %v4873_v8 = vadd.f32 %v4868_v50, %v4853_v24 }
0x4292   :  { %v4874_v29 = vadd.f32 %v4870_v46, %v4854_v38  ;;  %v6083_v46 = vld [vmem:[#allocation4] ss:$0 sm:$0xff] }
0x4293   :  { %7286 = vtanh.f32 %v4873_v8 }
0x4294   :  { %7288 = vtanh.f32 %v4874_v29 }
0x42a0   :  { %v7287_v14 = vpop.eup %7286 }
0x42a1   :  { %v7289_v3 = vpop.eup %7288  ;;  %4879 = vrot.lane.b32.xlu1 %v7287_v14, %s7336_s3 }
0x42a2   :  { %4881 = vrot.lane.b32.xlu0 %v7289_v3, %s7336_s3 }
0x4313   :  { %v4880_v32 = vpop.permute.xlu1 %4879 }
0x4314   :  { %v4882_v18 = vpop.permute.xlu0 %4881  ;;  %v4885_v43 = vmul.f32 %v7283_v26, %v4880_v32 }
0x4315   :  { %v4886_v13 = vmul.f32 %v7285_v59, %v4882_v18 }
0x4316   :  { %v4900_v57 = vrot.slane %v4885_v43, 7 }
0x4317   :  { %v4901_v10 = vrot.slane %v4886_v13, 6 }
0x4319   :  { %v4902_v17 = vsel %vm3912_vm5, %v4901_v10, %v4900_v57 }
0x431a   :  { %4903 = vrot.lane.b32.xlu1 %v4902_v17, %s7337_s26 }
0x438c   :  { %v8843_v60 = vpop.permute.xlu1 %4903 }
0x438d   :  { %6740 = vmatmul.mubr.msk.f32.vlgmr.msra.gmra.mxu1 %vm440_vm2, %v8843_v60 }
0x438e   :  { %6754 = vmatpush3.msra.mxu1 %v8738_v1  ;;  %6761 = vmatprep.mubr.msk.f32.mxu1 %vm7339_vm4, %v7335_v39 }
0x438f   :  { %6755 = vmatprep.subr.mxu1 %v7335_v39 }
0x4390   :  { %6756 = vmatpush3.msra.mxu1 %v8747_v41 }
0x4391   :  { %6757 = vmatprep.subr.mxu1 %v7335_v39 }
0x4392   :  { %6758 = vmatpush3.msra.mxu1 %v8756_v62 }
0x4393   :  { %6759 = vmatprep.subr.mxu1 %v7335_v39 }
0x4394   :  { %6760 = vmatpush3.msra.mxu1 %v8763_v55 }
0x4395   :  { %6762 = vmatmul.mubr.msk.f32.vlgmr.msra.gmra.mxu1 %vm440_vm2, %v8617_v2  ;;  %6775 = vmatprep.subr.mxu1 %v7335_v39 }
0x4396   :  { %6776 = vmatpush3.msra.mxu1 %v8738_v1  ;;  %6783 = vmatprep.mubr.msk.f32.mxu1 %vm7339_vm4, %v7335_v39 }
0x4397   :  { %6777 = vmatprep.subr.mxu1 %v7335_v39 }
0x4398   :  { %6778 = vmatpush3.msra.mxu1 %v8747_v41 }
0x4399   :  { %6779 = vmatprep.subr.mxu1 %v7335_v39 }
0x439a   :  { %6780 = vmatpush3.msra.mxu1 %v8756_v62 }
0x439b   :  { %6781 = vmatprep.subr.mxu1 %v7335_v39 }
0x439c   :  { %6782 = vmatpush3.msra.mxu1 %v8763_v55 }
0x439d   :  { %6784 = vmatmul.mubr.msk.f32.vlgmr.msra.gmra.mxu1 %vm440_vm2, %v8665_v53  ;;  %6797 = vmatprep.subr.mxu1 %v7335_v39 }
0x439e   :  { %6798 = vmatpush3.msra.mxu1 %v8738_v1  ;;  %6805 = vmatprep.mubr.msk.f32.mxu1 %vm7339_vm4, %v7335_v39 }
0x439f   :  { %6799 = vmatprep.subr.mxu1 %v7335_v39 }
0x43a0   :  { %6800 = vmatpush3.msra.mxu1 %v8747_v41 }
0x43a1   :  { %6801 = vmatprep.subr.mxu1 %v7335_v39 }
0x43a2   :  { %6802 = vmatpush3.msra.mxu1 %v8756_v62 }
0x43a3   :  { %6803 = vmatprep.subr.mxu1 %v7335_v39 }
0x43a4   :  { %6804 = vmatpush3.msra.mxu1 %v8763_v55 }
0x43a5   :  { %6806 = vmatmul.mubr.msk.f32.vlgmr.msra.gmra.mxu1 %vm440_vm2, %v8713_v58  ;;  %6819 = vmatprep.subr.mxu1 %v7335_v39 }
0x43a6   :  { %6820 = vmatpush3.msra.mxu1 %v8738_v1  ;;  %6827 = vmatprep.mubr.msk.f32.mxu1 %vm7339_vm4, %v7335_v39 }
0x43a7   :  { %6821 = vmatprep.subr.mxu1 %v7335_v39 }
0x43a8   :  { %6822 = vmatpush3.msra.mxu1 %v8747_v41 }
0x43a9   :  { %6823 = vmatprep.subr.mxu1 %v7335_v39 }
0x43aa   :  { %6824 = vmatpush3.msra.mxu1 %v8756_v62  ;;  %v6082_v62 = vld [vmem:[%s9068_s14] ss:$0 sm:$0xff] }
0x43ab   :  { %6825 = vmatprep.subr.mxu1 %v7335_v39 }
0x43ac   :  { %6826 = vmatpush3.msra.mxu1 %v8763_v55 }
0x43ad   :  { %6828 = vmatmul.mubr.msk.f32.vlgmr.msra.gmra.mxu1 %vm440_vm2, %v8843_v60  ;;  %5836 = vmatprep.subr.mxu1 %v7335_v39 }
0x444d   :  { %v4973_v20 = vpop.f32.mrf.mxu1 }
0x444e   :  { %v4974_v1 = vadd.f32 %v6079_v16, %v4973_v20 }
0x444f   :  { %v6741_v41 = vpop.f32.mrf.mxu1 }
0x4450   :  { %v5048_v22 = vadd.f32 %v8809_v49, %v4974_v1  ;;  %v5213_v55 = vadd.f32 %v8811_v6, %v4974_v1  ;;  %v5363_v23 = vadd.f32 %v8815_v0, %v4974_v1  ;;  %v5513_v6 = vadd.f32 %v8817_v5, %v4974_v1 }
0x4452   :  { %v5058_v15 = vmul.f32 %v6082_v62, %v5048_v22  ;;  %v5216_v28 = vmul.f32 %v6082_v62, %v5213_v55  ;;  %v5366_v49 = vmul.f32 %v6082_v62, %v5363_v23  ;;  %v5516_v21 = vmul.f32 %v6082_v62, %v5513_v6 }
0x4454   :  { %v5060_v56 = vsel %vm5059_vm6, %v5058_v15, 0.0  ;;  %v5217_v12 = vsel %vm5059_vm6, %v5216_v28, 0.0  ;;  %v5367_v11 = vsel %vm5059_vm6, %v5366_v49, 0.0  ;;  %v5517_v0 = vsel %vm5059_vm6, %v5516_v21, 0.0 }
0x4455   :  { %v5137_v34 = vpop.f32.mrf.mxu1  ;;  %5061 = vadd.xlane.f32.xlu0 %v5060_v56 }
0x4456   :  { %v5138_v54 = vadd.f32 %v5137_v34, %v4974_v1 }
0x4457   :  { %v6763_v19 = vpop.f32.mrf.mxu1 }
0x4458   :  { %v5141_v63 = vmul.f32 %v6082_v62, %v5138_v54 }
0x4459   :  { %5218 = vadd.xlane.f32.xlu0 %v5217_v12 }
0x445a   :  { %v5142_v42 = vsel %vm5059_vm6, %v5141_v63, 0.0 }
0x445b   :  { %5143 = vadd.xlane.f32.xlu1 %v5142_v42 }
0x445d   :  { %v5287_v30 = vpop.f32.mrf.mxu1 }
0x445e   :  { %v5288_v4 = vadd.f32 %v5287_v30, %v4974_v1 }
0x445f   :  { %5368 = vadd.xlane.f32.xlu1 %v5367_v11  ;;  %v6785_v40 = vpop.f32.mrf.mxu1 }
0x4460   :  { %v5291_v31 = vmul.f32 %v6082_v62, %v5288_v4 }
0x4462   :  { %v5292_v7 = vsel %vm5059_vm6, %v5291_v31, 0.0 }
0x4463   :  { %5518 = vadd.xlane.f32.xlu1 %v5517_v0  ;;  %5293 = vadd.xlane.f32.xlu0 %v5292_v7 }
0x4465   :  { %v5437_v26 = vpop.f32.mrf.mxu1 }
0x4466   :  { %v5438_v52 = vadd.f32 %v5437_v26, %v4974_v1 }
0x4467   :  { %v6807_v59 = vpop.f32.mrf.mxu1 }
0x4468   :  { %v5441_v45 = vmul.f32 %v6082_v62, %v5438_v52 }
0x446a   :  { %v5442_v5 = vsel %vm5059_vm6, %v5441_v45, 0.0 }
0x446b   :  { %5443 = vadd.xlane.f32.xlu0 %v5442_v5 }
0x446d   :  { %v5587_v44 = vpop.f32.mrf.mxu1 }
0x446e   :  { %v5588_v36 = vadd.f32 %v5587_v44, %v4974_v1 }
0x446f   :  { %v6829_v61 = vpop.f32.mrf.mxu1 }
0x4470   :  { %v5591_v48 = vmul.f32 %v6082_v62, %v5588_v36 }
0x4472   :  { %v5592_v24 = vsel %vm5059_vm6, %v5591_v48, 0.0 }
0x4473   :  { %5593 = vadd.xlane.f32.xlu0 %v5592_v24  ;;  %v5713_v24 = vld [vmem:[%s9069_s16 + $0x38] sm:$0xff] }
0x4474   :  { %5753 = vmatprep.subr.mxu0 %v5713_v24 }
0x44de   :  { %v5062_v38 = vpop.xlane.xlu0 %5061 }
0x44df   :  { %v5070_v27 = vadd.f32 %v6083_v46, %v5062_v38  ;;  %v5712_v38 = vld [vmem:[%s9069_s16 + $0x30] sm:$0xff] }
0x44e0   :  { %5754 = vmatpush1.msra.mxu0 %v5712_v38  ;;  %v5714_v38 = vld [vmem:[%s9070_s17] sm:$0x3]  ;;  %s7313_s17 = scalar_lea.vmem %s5915_s23, 32 }
0x44e1   :  { %p7314_p0 = scmp.ne.s32.totalorder %s5915_s23, %s7313_s17  ;;  %p7319_p2 = scmp.lt.s32.totalorder %s7313_s17, %s7313_s17 }
0x44e2   :  { %v5219_v8 = vpop.xlane.xlu0 %5218 }
0x44e3   :  { %v5220_v33 = vadd.f32 %v6083_v46, %v5219_v8  ;;  %v5710_v8 = vld [vmem:[%s9069_s16 + $0x20] sm:$0xff]  ;;  %p7320_p3 = por %p7319_p2, %p7318_p1 }
0x44e4   :  { %v5144_v50 = vpop.xlane.xlu1 %5143 }
0x44e5   :  { %v5145_v29 = vadd.f32 %v6083_v46, %v5144_v50  ;;  %v5711_v50 = vld [vmem:[%s9069_s16 + $0x28] sm:$0xff]  ;;  %p7321_p4 = pnand %p7320_p3, %p7314_p0 }
0x44e6   :  { %5755 = vmatprep.subr.mxu0 %v5711_v50 }
0x44e7   :  { %v5596_v51 = vmax.f32 %v5070_v27, %v5145_v29  ;;  %5756 = vmatpush1.msra.mxu0 %v5710_v8 }
0x44e8   :  { %v5369_v32 = vpop.xlane.xlu1 %5368 }
0x44e9   :  { %v5597_v3 = vmax.f32 %v5596_v51, %v5220_v33  ;;  %v5370_v13 = vadd.f32 %v6083_v46, %v5369_v32  ;;  %v5706_v51 = vld [vmem:[%s9069_s16] sm:$0xff]  ;;  %v5813_v32 = vld [vmem:[%s9071_s18 + $0x68] sm:$0xff] }
0x44ec   :  { %v5294_v37 = vpop.xlane.xlu0 %5293  ;;  %v5519_v17 = vpop.xlane.xlu1 %5518 }
0x44ed   :  { %v5295_v14 = vadd.f32 %v6083_v46, %v5294_v37  ;;  %v5520_v20 = vadd.f32 %v6083_v46, %v5519_v17  ;;  %v5707_v37 = vld [vmem:[%s9069_s16 + $0x8] sm:$0xff]  ;;  %v5807_v17 = vld [vmem:[%s9071_s18 + $0x38] sm:$0xff] }
0x44ef   :  { %v5598_v18 = vmax.f32 %v5597_v3, %v5295_v14 }
0x44f1   :  { %v5599_v10 = vmax.f32 %v5598_v18, %v5370_v13  ;;  %v5812_v18 = vld [vmem:[%s9071_s18 + $0x60] sm:$0xff] }
0x44f4   :  { %v5444_v43 = vpop.xlane.xlu0 %5443 }
0x44f5   :  { %v5445_v57 = vadd.f32 %v6083_v46, %v5444_v43  ;;  %v5811_v43 = vld [vmem:[%s9071_s18 + $0x58] sm:$0xff] }
0x44f7   :  { %v5600_v16 = vmax.f32 %v5599_v10, %v5445_v57  ;;  %v5808_v10 = vld [vmem:[%s9071_s18 + $0x40] sm:$0xff] }
0x44f9   :  { %v5601_v41 = vmax.f32 %v5600_v16, %v5520_v20  ;;  %v5806_v16 = vld [vmem:[%s9071_s18 + $0x30] sm:$0xff] }
0x44fc   :  { %v5594_v1 = vpop.xlane.xlu0 %5593 }
0x44fd   :  { %v5595_v62 = vadd.f32 %v6083_v46, %v5594_v1  ;;  %v5804_v1 = vld [vmem:[%s9071_s18 + $0x20] sm:$0xff] }
0x44ff   :  { %v5602_v22 = vmax.f32 %v5601_v41, %v5595_v62  ;;  %v5803_v41 = vld [vmem:[%s9071_s18 + $0x18] sm:$0xff] }
0x4501   :  { %v5603_v55 = vsub.f32 %v5070_v27, %v5602_v22  ;;  %v5615_v15 = vsub.f32 %v5145_v29, %v5602_v22  ;;  %v5627_v56 = vsub.f32 %v5220_v33, %v5602_v22  ;;  %v5639_v28 = vsub.f32 %v5295_v14, %v5602_v22  ;;  %v5709_v29 = vld [vmem:[%s9069_s16 + $0x18] sm:$0xff]  ;;  %v5708_v27 = vld [vmem:[%s9069_s16 + $0x10] sm:$0xff] }
0x4502   :  { %v5651_v34 = vsub.f32 %v5370_v13, %v5602_v22  ;;  %v5663_v12 = vsub.f32 %v5445_v57, %v5602_v22  ;;  %v5675_v49 = vsub.f32 %v5520_v20, %v5602_v22  ;;  %v5687_v4 = vsub.f32 %v5595_v62, %v5602_v22  ;;  %5757 = vmatprep.subr.mxu0 %v5709_v29  ;;  %v5815_v33 = vld [vmem:[%s9071_s18 + $0x78] sm:$0xff]  ;;  %v5814_v14 = vld [vmem:[%s9071_s18 + $0x70] sm:$0xff]  ;;  %v5809_v57 = vld [vmem:[%s9071_s18 + $0x48] sm:$0xff] }
0x4503   :  { %v5604_v54 = vmul.f32 1.442695, %v5603_v55  ;;  %v5616_v23 = vmul.f32 1.442695, %v5615_v15  ;;  %v5628_v19 = vmul.f32 1.442695, %v5627_v56  ;;  %5758 = vmatpush1.msra.mxu0 %v5708_v27  ;;  %5837 = vmatpush1.msra.mxu1 %v5815_v33 }
0x4504   :  { %v5640_v63 = vmul.f32 1.442695, %v5639_v28  ;;  %v5652_v42 = vmul.f32 1.442695, %v5651_v34  ;;  %v5664_v6 = vmul.f32 1.442695, %v5663_v12  ;;  %5759 = vmatprep.subr.mxu0 %v5707_v37  ;;  %5838 = vmatprep.subr.mxu1 %v7335_v39 }
0x4505   :  { %7290 = vpow2.f32 %v5604_v54  ;;  %v5676_v30 = vmul.f32 1.442695, %v5675_v49  ;;  %v5688_v11 = vmul.f32 1.442695, %v5687_v4  ;;  %5760 = vmatpush1.msra.mxu0 %v5706_v51  ;;  %5839 = vmatpush1.msra.mxu1 %v5814_v14  ;;  %v5810_v13 = vld [vmem:[%s9071_s18 + $0x50] sm:$0xff]  ;;  %v5805_v20 = vld [vmem:[%s9071_s18 + $0x28] sm:$0xff] }
0x4506   :  { %7292 = vpow2.f32 %v5616_v23  ;;  %5840 = vmatprep.subr.mxu1 %v7335_v39  ;;  %v5802_v62 = vld [vmem:[%s9071_s18 + $0x10] sm:$0xff]  ;;  %v5801_v22 = vld [vmem:[%s9071_s18 + $0x8] sm:$0xff]  ;;  %v5800_v55 = vld [vmem:[%s9071_s18] sm:$0xff] }
0x4507   :  { %7294 = vpow2.f32 %v5628_v19  ;;  %5841 = vmatpush1.msra.mxu1 %v5813_v32  ;;  %v5824_v15 = vld [vmem:[%s9071_s18 + $0xc0] sm:$0xff]  ;;  %v5823_v56 = vld [vmem:[%s9071_s18 + $0xb8] sm:$0xff]  ;;  %v5822_v28 = vld [vmem:[%s9071_s18 + $0xb0] sm:$0xff] }
0x4508   :  { %7296 = vpow2.f32 %v5640_v63  ;;  %5842 = vmatprep.subr.mxu1 %v7335_v39  ;;  %v5821_v34 = vld [vmem:[%s9071_s18 + $0xa8] sm:$0xff]  ;;  %v5820_v54 = vld [vmem:[%s9071_s18 + $0xa0] sm:$0xff]  ;;  %v5819_v23 = vld [vmem:[%s9071_s18 + $0x98] sm:$0xff] }
0x4509   :  { %7298 = vpow2.f32 %v5652_v42  ;;  %5843 = vmatpush1.msra.mxu1 %v5812_v18 }
0x450a   :  { %7300 = vpow2.f32 %v5664_v6  ;;  %5844 = vmatprep.subr.mxu1 %v7335_v39 }
0x450b   :  { %7302 = vpow2.f32 %v5676_v30  ;;  %5845 = vmatpush1.msra.mxu1 %v5811_v43 }
0x450c   :  { %7304 = vpow2.f32 %v5688_v11  ;;  %5846 = vmatprep.subr.mxu1 %v7335_v39 }
0x450d   :  { %5847 = vmatpush1.msra.mxu1 %v5810_v13 }
0x450e   :  { %5848 = vmatprep.subr.mxu1 %v7335_v39 }
0x450f   :  { %5849 = vmatpush1.msra.mxu1 %v5809_v57 }
0x4510   :  { %5850 = vmatprep.subr.mxu1 %v7335_v39 }
0x4511   :  { %5851 = vmatpush1.msra.mxu1 %v5808_v10 }
0x4512   :  { %v7291_v21 = vpop.eup %7290  ;;  %5852 = vmatprep.subr.mxu1 %v7335_v39 }
0x4513   :  { %v7293_v40 = vpop.eup %7292  ;;  %5609 = vperm.xlu1 %6836, %v7291_v21   ;;  %5853 = vmatpush1.msra.mxu1 %v5807_v17 }
0x4514   :  { %v5618_v31 = vadd.f32 %v7293_v40, %v7291_v21  ;;  %5621 = vperm.xlu0 %6837, %v7293_v40   ;;  %v7295_v0 = vpop.eup %7294  ;;  %5854 = vmatprep.subr.mxu1 %v7335_v39 }
0x4515   :  { %v7297_v7 = vpop.eup %7296  ;;  %5855 = vmatpush1.msra.mxu1 %v5806_v16 }
0x4516   :  { %v5630_v26 = vadd.f32 %v7295_v0, %v5618_v31  ;;  %v7299_v52 = vpop.eup %7298  ;;  %5856 = vmatprep.subr.mxu1 %v7335_v39 }
0x4517   :  { %5633 = vperm.xlu1 %6836, %v7295_v0   ;;  %v7301_v45 = vpop.eup %7300  ;;  %5857 = vmatpush1.msra.mxu1 %v5805_v20 }
0x4518   :  { %v5642_v59 = vadd.f32 %v7297_v7, %v5630_v26  ;;  %5657 = vperm.xlu0 %6837, %v7299_v52   ;;  %v7303_v44 = vpop.eup %7302  ;;  %5858 = vmatprep.subr.mxu1 %v7335_v39 }
0x4519   :  { %v7305_v48 = vpop.eup %7304  ;;  %5859 = vmatpush1.msra.mxu1 %v5804_v1 }
0x451a   :  { %v5654_v5 = vadd.f32 %v7299_v52, %v5642_v59  ;;  %5860 = vmatprep.subr.mxu1 %v7335_v39 }
0x451b   :  { %5645 = vperm.xlu1 %6836, %v7297_v7   ;;  %5861 = vmatpush1.msra.mxu1 %v5803_v41 }
0x451c   :  { %v5666_v36 = vadd.f32 %v7301_v45, %v5654_v5  ;;  %5681 = vperm.xlu0 %6837, %v7303_v44   ;;  %5862 = vmatprep.subr.mxu1 %v7335_v39 }
0x451d   :  { %5863 = vmatpush1.msra.mxu1 %v5802_v62 }
0x451e   :  { %v5678_v61 = vadd.f32 %v7303_v44, %v5666_v36  ;;  %5864 = vmatprep.subr.mxu1 %v7335_v39 }
0x451f   :  { %5669 = vperm.xlu1 %6836, %v7301_v45   ;;  %5865 = vmatpush1.msra.mxu1 %v5801_v22 }
0x4520   :  { %v5690_v46 = vadd.f32 %v7305_v48, %v5678_v61  ;;  %5866 = vmatprep.subr.mxu1 %v7335_v39 }
0x4521   :  { %5867 = vmatpush1.msra.mxu1 %v5800_v55 }
0x4522   :  { %7306 = vrcp.f32 %v5690_v46  ;;  %5882 = vmatprep.subr.mxu1 %v7335_v39 }
0x4523   :  { %5693 = vperm.xlu1 %6836, %v7305_v48   ;;  %5883 = vmatpush2.msra.mxu1 %v5824_v15 }
0x4524   :  { %5884 = vmatprep.subr.mxu1 %v7335_v39 }
0x4525   :  { %5885 = vmatpush2.msra.mxu1 %v5823_v56 }
0x4526   :  { %5886 = vmatprep.subr.mxu1 %v7335_v39 }
0x4527   :  { %5887 = vmatpush2.msra.mxu1 %v5822_v28 }
0x4528   :  { %5888 = vmatprep.subr.mxu1 %v7335_v39 }
0x4529   :  { %5889 = vmatpush2.msra.mxu1 %v5821_v34 }
0x452a   :  { %5890 = vmatprep.subr.mxu1 %v7335_v39 }
0x452b   :  { %5891 = vmatpush2.msra.mxu1 %v5820_v54 }
0x452c   :  { %5892 = vmatprep.subr.mxu1 %v7335_v39 }
0x452d   :  { %5893 = vmatpush2.msra.mxu1 %v5819_v23 }
0x452e   :  { %5894 = vmatprep.subr.mxu1 %v7335_v39 }
0x452f   :  { %v7307_v3 = vpop.eup %7306 }
0x4530   :  { %5702 = vperm.xlu0 %6837, %v7307_v3  }
0x458e   :  { %v5610_v19 = vpop.permute.xlu1 %5609 }
0x458f   :  { %v5622_v63 = vpop.permute.xlu0 %5621  ;;  %v5613_v42 = vmul.f32 %v5610_v19, %v8592_v25 }
0x4590   :  { %v5625_v12 = vmul.f32 %v5622_v63, %v8617_v2 }
0x4592   :  { %v5634_v49 = vpop.permute.xlu1 %5633  ;;  %v5626_v30 = vadd.f32 %v5625_v12, %v5613_v42 }
0x4593   :  { %v5637_v6 = vmul.f32 %v5634_v49, %v8641_v9  ;;  %v5658_v40 = vpop.permute.xlu0 %5657 }
0x4594   :  { %v5661_v7 = vmul.f32 %v5658_v40, %v8689_v35  ;;  %v5818_v35 = vld [vmem:[%s9071_s18 + $0x90] sm:$0xff] }
0x4595   :  { %v5638_v21 = vadd.f32 %v5637_v6, %v5626_v30  ;;  %5895 = vmatpush2.msra.mxu1 %v5818_v35 }
0x4596   :  { %v5646_v4 = vpop.permute.xlu1 %5645  ;;  %5896 = vmatprep.subr.mxu1 %v7335_v39 }
0x4597   :  { %v5649_v11 = vmul.f32 %v5646_v4, %v8665_v53  ;;  %v5682_v59 = vpop.permute.xlu0 %5681 }
0x4598   :  { %v5685_v25 = vmul.f32 %v5682_v59, %v8740_v47  ;;  %v5816_v47 = vld [vmem:[%s9071_s18 + $0x80] sm:$0xff] }
0x4599   :  { %v5650_v31 = vadd.f32 %v5649_v11, %v5638_v21 }
0x459a   :  { %v5670_v0 = vpop.permute.xlu1 %5669 }
0x459b   :  { %v5662_v26 = vadd.f32 %v5661_v7, %v5650_v31  ;;  %v5673_v52 = vmul.f32 %v5670_v0, %v8713_v58  ;;  %v5817_v58 = vld [vmem:[%s9071_s18 + $0x88] sm:$0xff] }
0x459c   :  { %5897 = vmatpush2.msra.mxu1 %v5817_v58 }
0x459d   :  { %v5674_v2 = vadd.f32 %v5673_v52, %v5662_v26  ;;  %5898 = vmatprep.subr.mxu1 %v7335_v39  ;;  %v6092_v39 = vld [vmem:[%s9072_s19] ss:$0 sm:$0xff] }
0x459e   :  { %v5694_v45 = vpop.permute.xlu1 %5693  ;;  %5899 = vmatpush2.msra.mxu1 %v5816_v47 }
0x459f   :  { %v5697_v9 = vmul.f32 %v5694_v45, %v8843_v60  ;;  %v5686_v5 = vadd.f32 %v5685_v25, %v5674_v2  ;;  %v5716_v60 = vlaneseq }
0x45a1   :  { %v5698_v44 = vadd.f32 %v5697_v9, %v5686_v5  ;;  %v5717_v61 = vshrl.u32 %v5716_v60, 7 }
0x45a3   :  { %v5722_v48 = vsub.s32 1, %v5717_v61  ;;  %v5718_v24 = vsub.s32 0, %v5717_v61 }
0x45a5   :  { %v5723_v50 = vrot.slane %v5714_v38, %v5722_v48  ;;  %v5719_v46 = vrot.slane %v5714_v38, %v5718_v24 }
0x45ab   :  { %v5703_v36 = vpop.permute.xlu0 %5702 }
0x45ac   :  { %v5705_v53 = vmul.f32 %v5703_v36, %v5698_v44 }
0x45ae   :  { %6091 = vmatmul.mubr.msk.f32.vlgmr.msra.gmra.mxu0 %vm440_vm2, %v5705_v53 }
0x466e   :  { %v5795_v8 = vpop.f32.mrf.mxu0 }
0x466f   :  { %v5796_v37 = vadd.f32 %v5795_v8, %v5719_v46 }
0x4670   :  { %v5797_v29 = vpop.f32.mrf.mxu0 }
0x4671   :  { %v5798_v27 = vadd.f32 %v5797_v29, %v5723_v50 }
0x4673   :  { %6093 = vmatprep.mubr.msk.f32.mxu1 %vm5832_vm7, %v5798_v27 }
0x4674   :  { %5901 = vmatmul.mubr.f32.vlgmr.msra.gmra.mxu1 %v5796_v37 }
0x4734   :  { %v5902_v51 = vpop.f32.mrf.mxu1 }
0x4735   :  { %v5903_v33 = vadd.f32 %v6092_v39, %v5902_v51 }
0x4736   :  { %v5904_v14 = vpop.f32.mrf.mxu1 }
0x4737   :  { %5907 = vst.msk [vmem:[#allocation5] sm:$0x3] %vm5906_vm8, %v5903_v33 }
0x4738   :  { %7324 = shalt.err (!%p7321_p4)
}
0x4739   :  { %5917 = dma.vmem_to_hbm [thread:$0]  %s5915_s23, 32, %s9073_s20, [#allocation6]  }
0x473a   :  { %7333 = dma.done.wait [#allocation6], 32  }
0x473b   :  { %7334 = vsyncadd [#allocation6], 4294967264 }
0x473c   :  { %5921 = vsyncpa [#allocation6], 1 }

</bundles_post_ra>
